<compile_context>
chip_gen: v6e
topology: v6e:2x2x1
jax: 0.10.0
libtpu: 0.0.40
codegen_flags: <defaults>
</compile_context>

<pallas_src>
import numpy as np
import jax
import jax.numpy as jnp
from jax import lax
from jax.experimental import pallas as pl
from jax.experimental.pallas import tpu as pltpu

# ---------------- configuration ----------------
B = 2
DIM = 32                     # C
NUM_HEADS = 4
HDIM = DIM // NUM_HEADS      # 8
H, W = 8, 8                  # input_resolution
HD_RES, WD_RES = 16, 16      # skip_connection_resolution
WS = 4                       # window_size (min(input_resolution)=8 > 4, no adjustment)
WS_SKIP = 2 * WS             # 8
C_D = DIM // 2               # 16
MLP_HIDDEN = int(C_D * 4.0)  # 64
N_KV = WS * WS               # 16 kv tokens / window
N_Q = WS_SKIP * WS_SKIP      # 64 q tokens / window
L = H * W                    # 64
LD = HD_RES * WD_RES         # 256
NW = (H // WS) * (W // WS)   # 4 windows / batch element
NW_TOT = B * NW              # 8
SCALE = HDIM ** -0.5
EPS = 1e-5

assert H % WS == 0 and W % WS == 0
assert HD_RES % WS_SKIP == 0 and WD_RES % WS_SKIP == 0


# ---------------- host-side helpers ----------------
def window_partition(x, ws):
    b, h, w, c = x.shape
    x = x.reshape(b, h // ws, ws, w // ws, ws, c)
    return x.transpose(0, 1, 3, 2, 4, 5).reshape(-1, ws, ws, c)


def window_reverse(windows, ws, h, w):
    b = windows.shape[0] // ((h // ws) * (w // ws))
    x = windows.reshape(b, h // ws, w // ws, ws, ws, -1)
    return x.transpose(0, 1, 3, 2, 4, 5).reshape(b, h, w, -1)


def _bilinear_matrix(n_in, n_out):
    # nn.UpsamplingBilinear2d semantics: align_corners=True
    i = np.arange(n_out)
    src = i * (n_in - 1) / (n_out - 1) if n_out > 1 else np.zeros_like(i, dtype=np.float64)
    lo = np.clip(np.floor(src).astype(np.int64), 0, n_in - 1)
    hi = np.clip(lo + 1, 0, n_in - 1)
    frac = (src - lo).astype(np.float32)
    m = np.zeros((n_out, n_in), np.float32)
    m[i, lo] += (1.0 - frac)
    m[i, hi] += frac
    return m


def _relative_position_index(ws):
    # Faithful port of the torch buffer computation in WindowCrossAttention.__init__
    coords_h = np.repeat(np.arange(ws), 2)
    coords_w = np.repeat(np.arange(ws), 2)
    coords = np.stack(np.meshgrid(coords_h, coords_w, indexing="ij"))      # (2, 2ws, 2ws)
    coords_flatten = coords.reshape(2, -1)                                  # (2, 4ws^2)
    rel = coords_flatten[:, :, None] - coords_flatten[:, None, :]           # (2, 4ws^2, 4ws^2)
    rel = rel[:, :, ::4]                                                    # (2, 4ws^2, ws^2)
    rel = rel.transpose(1, 2, 0).astype(np.int64)                           # (4ws^2, ws^2, 2)
    rel[:, :, 0] += ws - 1
    rel[:, :, 1] += ws - 1
    rel[:, :, 0] *= 2 * ws - 1
    return rel.sum(-1)                                                      # (4ws^2, ws^2)


# ---------------- the single fused Pallas kernel (gridless, B folded into tokens) ----------------
def _fused_block_kernel(x_ref, xd_ref,
                        wsc_ref, mup_ref, g1_ref, be1_ref,
                        wq_ref, bq_ref, wk_ref, bk_ref, wv_ref, bv_ref,
                        hsel_ref, bias_ref, wp_ref, bres_ref,
                        g2_ref, be2_ref, w1_ref, b1_ref, w2_ref, b2_ref,
                        o_ref):
    f32 = jnp.float32
    x = x_ref[...]                         # (B*64, 32)  kv tokens, window order
    xd = xd_ref[...]                       # (B*256, 16) q tokens, window order

    # ---- shortcut branch (channels-major): proj_shortcut, then bilinear x2 upsample as a matmul
    sc_t = lax.dot_general(wsc_ref[...], x, (((1,), (1,)), ((), ())),
                           preferred_element_type=f32)                     # (16, 128)
    scup_t = jnp.dot(sc_t, mup_ref[...], preferred_element_type=f32)       # (16, 512)

    # ---- norm1 on kv tokens
    mu = jnp.mean(x, axis=-1, keepdims=True)
    var = jnp.mean((x - mu) ** 2, axis=-1, keepdims=True)
    xn = (x - mu) * lax.rsqrt(var + EPS) * g1_ref[...] + be1_ref[...]       # (128, 32)

    # ---- merged projections, heads live on lanes; SCALE pre-folded into wq/bq
    q = jnp.dot(xd, wq_ref[...], preferred_element_type=f32) + bq_ref[...]  # (512, 32)
    k = jnp.dot(xn, wk_ref[...], preferred_element_type=f32) + bk_ref[...]  # (128, 32)
    v = jnp.dot(xn, wv_ref[...], preferred_element_type=f32) + bv_ref[...]  # (128, 32)

    hsel = hsel_ref[...]                                                    # (64, 32) 0/1 head selector
    q_r = q.reshape(NW_TOT, N_Q, DIM)                                       # (8, 64, 32)
    k_r = k.reshape(NW_TOT, N_KV, DIM)                                      # (8, 16, 32)
    v_r = v.reshape(NW_TOT, N_KV, DIM)
    # head-block-diagonal expansion: row t = head*16 + kv_idx, only that head's 8 channels kept
    k_exp = jnp.concatenate([k_r, k_r, k_r, k_r], axis=1) * hsel            # (8, 64, 32)
    v_exp = jnp.concatenate([v_r, v_r, v_r, v_r], axis=1) * hsel            # (8, 64, 32)

    # ---- block-diagonal windowed scores: (window, q token, head*kv token), lane-dense
    s = lax.dot_general(q_r, k_exp, (((2,), (2,)), ((0,), (0,))),
                        preferred_element_type=f32)                         # (8, 64, 64)
    s = s + bias_ref[...]                                                   # true rel-pos bias
    m = jnp.max(s, axis=-1, keepdims=True)      # global row max: valid shift for every head group
    p = jnp.exp(s - m)
    o = lax.dot_general(p, v_exp, (((2,), (1,)), ((0,), (0,))),
                        preferred_element_type=f32)                         # (8, 64, 32)
    o2 = o.reshape(NW_TOT * N_Q, DIM)                                       # (512, 32)
    denom = jnp.dot(p.reshape(NW_TOT * N_Q, NUM_HEADS * N_KV), hsel,
                    preferred_element_type=f32)                             # (512, 32) per-head sums
    o2 = o2 * pl.reciprocal(denom, approx=True)                             # softmax normalization

    # ---- output projection (all heads in one matmul) + residual, channels-major
    attn_t = lax.dot_general(wp_ref[...], o2, (((1,), (1,)), ((), ())),
                             preferred_element_type=f32)                    # (16, 512)
    y_t = attn_t + scup_t + bres_ref[...]                                   # (16, 512)

    # ---- norm2 (over channels = sublanes) + MLP, fully lane-dense
    mu2 = jnp.mean(y_t, axis=0, keepdims=True)
    var2 = jnp.mean((y_t - mu2) ** 2, axis=0, keepdims=True)
    yn_t = (y_t - mu2) * lax.rsqrt(var2 + EPS) * g2_ref[...] + be2_ref[...]
    h1 = jnp.dot(w1_ref[...], yn_t, preferred_element_type=f32) + b1_ref[...]   # (64, 512)
    c0 = 0.7978845608028654                                                  # sqrt(2/pi), tanh GELU (EUP)
    h1 = 0.5 * h1 * (1.0 + jnp.tanh(c0 * (h1 + 0.044715 * h1 * h1 * h1)))
    h2 = jnp.dot(w2_ref[...], h1, preferred_element_type=f32) + b2_ref[...]     # (16, 512)
    o_ref[...] = (y_t + h2).astype(o_ref.dtype)                              # lane-dense store


_FUSED_ORDER = (
    "w_sc_t", "m_up_t", "norm1_g", "norm1_b",
    "w_q_s", "b_q_s", "w_k", "b_k", "w_v", "b_v",
    "head_sel", "bias_lane", "w_proj_t", "b_res_col",
    "norm2_g_col", "norm2_b_col",
    "mlp_w1_t", "mlp_b1_col", "mlp_w2_t", "mlp_b2_col",
)


# ---------------- wrapper ----------------
def cross_attention_block(x, x_down, padwh, fused):
    bx, l, c = x.shape
    bd, ld, cd = x_down.shape
    assert l == L and c == DIM and ld == LD and cd == C_D and bd == bx == B
    # TODO(synk): nonzero padwh (window padding + shortcut cropping) is not required for this
    #             configuration (resolutions divide the window sizes exactly) and is unsupported.
    assert tuple(padwh) == (0, 0)

    # Layout plumbing outside the kernel: window order, B folded into the token (row) dimension.
    x_perm = (x.reshape(B, H // WS, WS, W // WS, WS, DIM)
               .transpose(0, 1, 3, 2, 4, 5).reshape(B * L, DIM))
    xd_perm = (x_down.reshape(B, HD_RES // WS_SKIP, WS_SKIP, WD_RES // WS_SKIP, WS_SKIP, C_D)
                .transpose(0, 1, 3, 2, 4, 5).reshape(B * LD, C_D))

    args = [x_perm, xd_perm] + [fused[k] for k in _FUSED_ORDER]
    out_t = pl.pallas_call(
        _fused_block_kernel,
        out_shape=jax.ShapeDtypeStruct((C_D, B * LD), jnp.float32),
        in_specs=[pl.BlockSpec(memory_space=pltpu.MemorySpace.VMEM)] * len(args),
        out_specs=pl.BlockSpec(memory_space=pltpu.MemorySpace.VMEM),
    )(*args)                                                   # (16, B*256), channels-major

    out = (out_t.T.reshape(B, HD_RES // WS_SKIP, WD_RES // WS_SKIP, WS_SKIP, WS_SKIP, C_D)
             .transpose(0, 1, 3, 2, 4, 5).reshape(B, LD, C_D))
    return out, HD_RES, WD_RES


# ---------------- parameter init (PyTorch-layout) and kernel-layout preparation ----------------
def init_params(key):
    ks = jax.random.split(key, 13)
    w = lambda k, shape: jax.random.normal(k, shape, jnp.float32) * 0.02
    params = {
        "norm1_g": jnp.ones((1, DIM), jnp.float32),
        "norm1_b": jnp.zeros((1, DIM), jnp.float32),
        "w_kv": w(ks[0], (DIM, 2 * DIM)), "b_kv": w(ks[1], (1, 2 * DIM)),
        "w_q": w(ks[2], (C_D, DIM)), "b_q": w(ks[3], (1, DIM)),
        "w_proj": w(ks[4], (DIM, C_D)), "b_proj": w(ks[5], (1, C_D)),
        "w_sc": w(ks[6], (DIM, C_D)), "b_sc": w(ks[7], (1, C_D)),
        "norm2_g": jnp.ones((1, C_D), jnp.float32),
        "norm2_b": jnp.zeros((1, C_D), jnp.float32),
        "mlp_w1": w(ks[8], (C_D, MLP_HIDDEN)), "mlp_b1": w(ks[9], (1, MLP_HIDDEN)),
        "mlp_w2": w(ks[10], (MLP_HIDDEN, C_D)), "mlp_b2": w(ks[11], (1, C_D)),
    }
    table = jax.random.normal(ks[12], ((2 * WS * 2 - 1) * (2 * WS * 2 - 1), NUM_HEADS),
                              jnp.float32) * 0.02
    idx = _relative_position_index(WS)                               # (N_Q, N_KV)
    rel_bias = table[jnp.asarray(idx.reshape(-1))].reshape(N_Q, N_KV, NUM_HEADS)
    params["rel_bias"] = jnp.transpose(rel_bias, (2, 0, 1))          # (num_heads, N_Q, N_KV)
    return params


def prepare_fused_params(params):
    f = jnp.float32
    w_kv = np.asarray(params["w_kv"])
    b_kv = np.asarray(params["b_kv"])
    w_k, w_v = w_kv[:, :DIM], w_kv[:, DIM:]
    b_k, b_v = b_kv[:, :DIM], b_kv[:, DIM:]

    # Bilinear x2 (align_corners) upsample of the shortcut folded into one matmul whose rows/cols
    # are pre-permuted to window order and block-diagonal over the folded batch dimension.
    m_up_nat = np.kron(_bilinear_matrix(H, HD_RES), _bilinear_matrix(W, WD_RES))   # (256, 64)
    r = np.arange(LD)
    wq_, iq = np.divmod(r, N_Q)
    wr, wc = np.divmod(wq_, WD_RES // WS_SKIP)
    ir, ic = np.divmod(iq, WS_SKIP)
    q_nat = (wr * WS_SKIP + ir) * WD_RES + (wc * WS_SKIP + ic)
    rk = np.arange(L)
    wk_, jk = np.divmod(rk, N_KV)
    kwr, kwc = np.divmod(wk_, W // WS)
    jr, jc = np.divmod(jk, WS)
    kv_nat = (kwr * WS + jr) * W + (kwc * WS + jc)
    m_up_perm = m_up_nat[np.ix_(q_nat, kv_nat)]                                    # (256, 64)
    m_up_big = np.kron(np.eye(B, dtype=np.float32), m_up_perm)                     # (512, 128)

    # 0/1 head selector: row t = head*16 + kv_idx keeps only that head's 8 output channels.
    head_sel = np.kron(np.eye(NUM_HEADS, dtype=np.float32),
                       np.ones((N_KV, HDIM), np.float32))                          # (64, 32)
    rel = np.asarray(params["rel_bias"])                                           # (4, 64, 16)
    bias_lane = np.transpose(rel, (1, 0, 2)).reshape(N_Q, NUM_HEADS * N_KV)        # (64, 64)

    col = lambda a, n: jnp.asarray(np.asarray(a).reshape(n, 1), f)
    return {
        "w_sc_t": jnp.asarray(np.asarray(params["w_sc"]).T, f),                    # (16, 32)
        "m_up_t": jnp.asarray(m_up_big.T, f),                                      # (128, 512)
        "norm1_g": params["norm1_g"], "norm1_b": params["norm1_b"],                # (1, 32)
        "w_q_s": params["w_q"] * SCALE, "b_q_s": params["b_q"] * SCALE,            # scale folded
        "w_k": jnp.asarray(w_k, f), "b_k": jnp.asarray(b_k, f),
        "w_v": jnp.asarray(w_v, f), "b_v": jnp.asarray(b_v, f),
        "head_sel": jnp.asarray(head_sel, f),
        "bias_lane": jnp.asarray(bias_lane, f),
        "w_proj_t": jnp.asarray(np.asarray(params["w_proj"]).T, f),                # (16, 32)
        "b_res_col": col(np.asarray(params["b_proj"]) + np.asarray(params["b_sc"]), C_D),
        "norm2_g_col": col(params["norm2_g"], C_D),
        "norm2_b_col": col(params["norm2_b"], C_D),
        "mlp_w1_t": jnp.asarray(np.asarray(params["mlp_w1"]).T, f),                # (64, 16)
        "mlp_b1_col": col(params["mlp_b1"], MLP_HIDDEN),
        "mlp_w2_t": jnp.asarray(np.asarray(params["mlp_w2"]).T, f),                # (16, 64)
        "mlp_b2_col": col(params["mlp_b2"], C_D),
    }


# ---------------- pure-JAX reference (faithful windowed formulation) ----------------
def reference_forward(x, x_down, params):
    def ln(t, g, b):
        mu = t.mean(-1, keepdims=True)
        var = ((t - mu) ** 2).mean(-1, keepdims=True)
        return (t - mu) / jnp.sqrt(var + EPS) * g + b

    sc = x @ params["w_sc"] + params["b_sc"][0]
    sc = sc.reshape(B, H, W, C_D)
    sc = jnp.einsum("oh,bhwc->bowc", jnp.asarray(_bilinear_matrix(H, 2 * H)), sc)
    sc = jnp.einsum("pw,bowc->bopc", jnp.asarray(_bilinear_matrix(W, 2 * W)), sc)
    sc = sc.reshape(B, HD_RES * WD_RES, C_D)

    xn = ln(x, params["norm1_g"][0], params["norm1_b"][0])
    kvw = window_partition(xn.reshape(B, H, W, DIM), WS).reshape(-1, N_KV, DIM)
    qw = window_partition(x_down.reshape(B, HD_RES, WD_RES, C_D), WS_SKIP).reshape(-1, N_Q, C_D)
    bw = kvw.shape[0]
    kvp = kvw @ params["w_kv"] + params["b_kv"][0]
    qp = qw @ params["w_q"] + params["b_q"][0]
    k = kvp[..., :DIM].reshape(bw, N_KV, NUM_HEADS, HDIM).transpose(0, 2, 1, 3)
    v = kvp[..., DIM:].reshape(bw, N_KV, NUM_HEADS, HDIM).transpose(0, 2, 1, 3)
    q = qp.reshape(bw, N_Q, NUM_HEADS, HDIM).transpose(0, 2, 1, 3) * SCALE
    attn = q @ k.transpose(0, 1, 3, 2) + params["rel_bias"][None]
    attn = jax.nn.softmax(attn, axis=-1)
    o = (attn @ v).transpose(0, 2, 1, 3).reshape(bw, N_Q, DIM)
    o = o @ params["w_proj"] + params["b_proj"][0]
    o = window_reverse(o.reshape(-1, WS_SKIP, WS_SKIP, C_D), WS_SKIP, HD_RES, WD_RES)
    o = o.reshape(B, HD_RES * WD_RES, C_D)

    y = o + sc
    yn = ln(y, params["norm2_g"][0], params["norm2_b"][0])
    h1 = jax.nn.gelu(yn @ params["mlp_w1"] + params["mlp_b1"][0], approximate=False)
    return y + h1 @ params["mlp_w2"] + params["mlp_b2"][0]


# TODO(synk): PatchExpand (residual_patch_expand=True branch) has no provided definition,
#             so the proj_shortcut + UpsamplingBilinear2d branch is implemented instead.

if __name__ == "__main__":
    key = jax.random.PRNGKey(0)
    kx, kd, kp = jax.random.split(key, 3)
    x = jax.random.normal(kx, (B, H * W, DIM), jnp.float32)                 # (2, 64, 32)
    x_down = jax.random.normal(kd, (B, HD_RES * WD_RES, C_D), jnp.float32)  # (2, 256, 16)
    params = init_params(kp)
    fused = prepare_fused_params(params)

    out, hd, wd = cross_attention_block(x, x_down, (0, 0), fused)
    out = jax.block_until_ready(out)
    assert out.shape == (B, HD_RES * WD_RES, C_D) and (hd, wd) == (HD_RES, WD_RES)

    ref = jax.block_until_ready(reference_forward(x, x_down, params))
    if not np.allclose(np.asarray(out), np.asarray(ref), atol=5e-3, rtol=5e-3):
        raise SystemExit(
            f"mismatch vs reference: max abs err = {float(jnp.max(jnp.abs(out - ref)))}")
    print("KERNEL_OK")
</pallas_src>

<mosaic_0001>
module attributes {stable_mosaic.version = 11 : i64} {
  func.func @_fused_block_kernel(%arg0: memref<128x32xf32, #tpu.memory_space<vmem>>, %arg1: memref<512x16xf32, #tpu.memory_space<vmem>>, %arg2: memref<16x32xf32, #tpu.memory_space<vmem>>, %arg3: memref<128x512xf32, #tpu.memory_space<vmem>>, %arg4: memref<1x32xf32, #tpu.memory_space<vmem>>, %arg5: memref<1x32xf32, #tpu.memory_space<vmem>>, %arg6: memref<16x32xf32, #tpu.memory_space<vmem>>, %arg7: memref<1x32xf32, #tpu.memory_space<vmem>>, %arg8: memref<32x32xf32, #tpu.memory_space<vmem>>, %arg9: memref<1x32xf32, #tpu.memory_space<vmem>>, %arg10: memref<32x32xf32, #tpu.memory_space<vmem>>, %arg11: memref<1x32xf32, #tpu.memory_space<vmem>>, %arg12: memref<64x32xf32, #tpu.memory_space<vmem>>, %arg13: memref<64x64xf32, #tpu.memory_space<vmem>>, %arg14: memref<16x32xf32, #tpu.memory_space<vmem>>, %arg15: memref<16x1xf32, #tpu.memory_space<vmem>>, %arg16: memref<16x1xf32, #tpu.memory_space<vmem>>, %arg17: memref<16x1xf32, #tpu.memory_space<vmem>>, %arg18: memref<64x16xf32, #tpu.memory_space<vmem>>, %arg19: memref<64x1xf32, #tpu.memory_space<vmem>>, %arg20: memref<16x64xf32, #tpu.memory_space<vmem>>, %arg21: memref<16x1xf32, #tpu.memory_space<vmem>>, %arg22: memref<16x512xf32, #tpu.memory_space<vmem>>) attributes {dimension_semantics = [], scalar_prefetch = 0 : i64, scratch_operands = 0 : i64, tpu.core_type = #tpu.core_type<tc>} {
    %c0 = arith.constant 0 : index
    %c0_0 = arith.constant 0 : index
    %0 = vector.load %arg0[%c0, %c0_0] : memref<128x32xf32, #tpu.memory_space<vmem>>, vector<128x32xf32>
    %c0_1 = arith.constant 0 : index
    %c0_2 = arith.constant 0 : index
    %1 = vector.load %arg1[%c0_1, %c0_2] : memref<512x16xf32, #tpu.memory_space<vmem>>, vector<512x16xf32>
    %c0_3 = arith.constant 0 : index
    %c0_4 = arith.constant 0 : index
    %2 = vector.load %arg2[%c0_3, %c0_4] : memref<16x32xf32, #tpu.memory_space<vmem>>, vector<16x32xf32>
    %cst = arith.constant dense<0.000000e+00> : vector<16x128xf32>
    %3 = tpu.matmul %2, %0, %cst {dimension_numbers = #tpu.dot_dimension_numbers<[1], [1], [0], [0], [0, 0, 1, 0], [], []>} : vector<16x32xf32>, vector<128x32xf32>, vector<16x128xf32> -> vector<16x128xf32>
    %c0_5 = arith.constant 0 : index
    %c0_6 = arith.constant 0 : index
    %4 = vector.load %arg3[%c0_5, %c0_6] : memref<128x512xf32, #tpu.memory_space<vmem>>, vector<128x512xf32>
    %cst_7 = arith.constant dense<0.000000e+00> : vector<16x512xf32>
    %5 = tpu.matmul %3, %4, %cst_7 {dimension_numbers = #tpu.dot_dimension_numbers<[1], [0], [0], [1], [0, 0, 1, 1], [], []>} : vector<16x128xf32>, vector<128x512xf32>, vector<16x512xf32> -> vector<16x512xf32>
    %cst_8 = arith.constant dense<0.000000e+00> : vector<128xf32>
    %6 = vector.multi_reduction <add>, %0, %cst_8 [1] : vector<128x32xf32> to vector<128xf32>
    %7 = vector.shape_cast %6 : vector<128xf32> to vector<128x1xf32>
    %cst_9 = arith.constant 3.200000e+01 : f32
    %8 = vector.broadcast %cst_9 : f32 to vector<128x1xf32>
    %9 = arith.divf %7, %8 : vector<128x1xf32>
    %10 = vector.broadcast %9 : vector<128x1xf32> to vector<128x32xf32>
    %11 = arith.subf %0, %10 : vector<128x32xf32>
    %12 = arith.mulf %11, %11 : vector<128x32xf32>
    %cst_10 = arith.constant dense<0.000000e+00> : vector<128xf32>
    %13 = vector.multi_reduction <add>, %12, %cst_10 [1] : vector<128x32xf32> to vector<128xf32>
    %14 = vector.shape_cast %13 : vector<128xf32> to vector<128x1xf32>
    %cst_11 = arith.constant 3.200000e+01 : f32
    %15 = vector.broadcast %cst_11 : f32 to vector<128x1xf32>
    %16 = arith.divf %14, %15 : vector<128x1xf32>
    %17 = vector.broadcast %9 : vector<128x1xf32> to vector<128x32xf32>
    %18 = arith.subf %0, %17 : vector<128x32xf32>
    %cst_12 = arith.constant 9.99999974E-6 : f32
    %19 = vector.broadcast %cst_12 : f32 to vector<128x1xf32>
    %20 = arith.addf %16, %19 : vector<128x1xf32>
    %21 = math.rsqrt %20 : vector<128x1xf32>
    %22 = vector.broadcast %21 : vector<128x1xf32> to vector<128x32xf32>
    %23 = arith.mulf %18, %22 : vector<128x32xf32>
    %c0_13 = arith.constant 0 : index
    %c0_14 = arith.constant 0 : index
    %24 = vector.load %arg4[%c0_13, %c0_14] : memref<1x32xf32, #tpu.memory_space<vmem>>, vector<1x32xf32>
    %25 = vector.broadcast %24 : vector<1x32xf32> to vector<128x32xf32>
    %26 = arith.mulf %23, %25 : vector<128x32xf32>
    %c0_15 = arith.constant 0 : index
    %c0_16 = arith.constant 0 : index
    %27 = vector.load %arg5[%c0_15, %c0_16] : memref<1x32xf32, #tpu.memory_space<vmem>>, vector<1x32xf32>
    %28 = vector.broadcast %27 : vector<1x32xf32> to vector<128x32xf32>
    %29 = arith.addf %26, %28 : vector<128x32xf32>
    %c0_17 = arith.constant 0 : index
    %c0_18 = arith.constant 0 : index
    %30 = vector.load %arg6[%c0_17, %c0_18] : memref<16x32xf32, #tpu.memory_space<vmem>>, vector<16x32xf32>
    %cst_19 = arith.constant dense<0.000000e+00> : vector<512x32xf32>
    %31 = tpu.matmul %1, %30, %cst_19 {dimension_numbers = #tpu.dot_dimension_numbers<[1], [0], [0], [1], [0, 0, 1, 1], [], []>} : vector<512x16xf32>, vector<16x32xf32>, vector<512x32xf32> -> vector<512x32xf32>
    %c0_20 = arith.constant 0 : index
    %c0_21 = arith.constant 0 : index
    %32 = vector.load %arg7[%c0_20, %c0_21] : memref<1x32xf32, #tpu.memory_space<vmem>>, vector<1x32xf32>
    %33 = vector.broadcast %32 : vector<1x32xf32> to vector<512x32xf32>
    %34 = arith.addf %31, %33 : vector<512x32xf32>
    %c0_22 = arith.constant 0 : index
    %c0_23 = arith.constant 0 : index
    %35 = vector.load %arg8[%c0_22, %c0_23] : memref<32x32xf32, #tpu.memory_space<vmem>>, vector<32x32xf32>
    %cst_24 = arith.constant dense<0.000000e+00> : vector<128x32xf32>
    %36 = tpu.matmul %29, %35, %cst_24 {dimension_numbers = #tpu.dot_dimension_numbers<[1], [0], [0], [1], [0, 0, 1, 1], [], []>} : vector<128x32xf32>, vector<32x32xf32>, vector<128x32xf32> -> vector<128x32xf32>
    %c0_25 = arith.constant 0 : index
    %c0_26 = arith.constant 0 : index
    %37 = vector.load %arg9[%c0_25, %c0_26] : memref<1x32xf32, #tpu.memory_space<vmem>>, vector<1x32xf32>
    %38 = vector.broadcast %37 : vector<1x32xf32> to vector<128x32xf32>
    %39 = arith.addf %36, %38 : vector<128x32xf32>
    %c0_27 = arith.constant 0 : index
    %c0_28 = arith.constant 0 : index
    %40 = vector.load %arg10[%c0_27, %c0_28] : memref<32x32xf32, #tpu.memory_space<vmem>>, vector<32x32xf32>
    %cst_29 = arith.constant dense<0.000000e+00> : vector<128x32xf32>
    %41 = tpu.matmul %29, %40, %cst_29 {dimension_numbers = #tpu.dot_dimension_numbers<[1], [0], [0], [1], [0, 0, 1, 1], [], []>} : vector<128x32xf32>, vector<32x32xf32>, vector<128x32xf32> -> vector<128x32xf32>
    %c0_30 = arith.constant 0 : index
    %c0_31 = arith.constant 0 : index
    %42 = vector.load %arg11[%c0_30, %c0_31] : memref<1x32xf32, #tpu.memory_space<vmem>>, vector<1x32xf32>
    %43 = vector.broadcast %42 : vector<1x32xf32> to vector<128x32xf32>
    %44 = arith.addf %41, %43 : vector<128x32xf32>
    %c0_32 = arith.constant 0 : index
    %c0_33 = arith.constant 0 : index
    %45 = vector.load %arg12[%c0_32, %c0_33] : memref<64x32xf32, #tpu.memory_space<vmem>>, vector<64x32xf32>
    %46 = vector.shape_cast %34 : vector<512x32xf32> to vector<8x64x32xf32>
    %47 = vector.shape_cast %39 : vector<128x32xf32> to vector<8x16x32xf32>
    %48 = vector.shape_cast %44 : vector<128x32xf32> to vector<8x16x32xf32>
    %49 = tpu.concatenate %47, %47, %47, %47 in 1 : vector<8x16x32xf32>, vector<8x16x32xf32>, vector<8x16x32xf32>, vector<8x16x32xf32> -> vector<8x64x32xf32>
    %50 = vector.shape_cast %45 : vector<64x32xf32> to vector<1x64x32xf32>
    %51 = vector.broadcast %50 : vector<1x64x32xf32> to vector<8x64x32xf32>
    %52 = arith.mulf %49, %51 : vector<8x64x32xf32>
    %53 = tpu.concatenate %48, %48, %48, %48 in 1 : vector<8x16x32xf32>, vector<8x16x32xf32>, vector<8x16x32xf32>, vector<8x16x32xf32> -> vector<8x64x32xf32>
    %54 = vector.shape_cast %45 : vector<64x32xf32> to vector<1x64x32xf32>
    %55 = vector.broadcast %54 : vector<1x64x32xf32> to vector<8x64x32xf32>
    %56 = arith.mulf %53, %55 : vector<8x64x32xf32>
    %cst_34 = arith.constant dense<0.000000e+00> : vector<8x64x64xf32>
    %57 = tpu.matmul %46, %52, %cst_34 {dimension_numbers = #tpu.dot_dimension_numbers<[2], [2], [1], [1], [0, 0, 0, 1, 1, 1], [0], [0]>} : vector<8x64x32xf32>, vector<8x64x32xf32>, vector<8x64x64xf32> -> vector<8x64x64xf32>
    %c0_35 = arith.constant 0 : index
    %c0_36 = arith.constant 0 : index
    %58 = vector.load %arg13[%c0_35, %c0_36] : memref<64x64xf32, #tpu.memory_space<vmem>>, vector<64x64xf32>
    %59 = vector.shape_cast %58 : vector<64x64xf32> to vector<1x64x64xf32>
    %60 = vector.broadcast %59 : vector<1x64x64xf32> to vector<8x64x64xf32>
    %61 = arith.addf %57, %60 : vector<8x64x64xf32>
    %cst_37 = arith.constant dense<0xFF800000> : vector<8x64xf32>
    %62 = vector.multi_reduction <maximumf>, %61, %cst_37 [2] : vector<8x64x64xf32> to vector<8x64xf32>
    %63 = vector.shape_cast %62 : vector<8x64xf32> to vector<8x64x1xf32>
    %64 = vector.broadcast %63 : vector<8x64x1xf32> to vector<8x64x64xf32>
    %65 = arith.subf %61, %64 : vector<8x64x64xf32>
    %66 = math.exp %65 : vector<8x64x64xf32>
    %cst_38 = arith.constant dense<0.000000e+00> : vector<8x64x32xf32>
    %67 = tpu.matmul %66, %56, %cst_38 {dimension_numbers = #tpu.dot_dimension_numbers<[2], [1], [1], [2], [0, 0, 0, 1, 1, 2], [0], [0]>} : vector<8x64x64xf32>, vector<8x64x32xf32>, vector<8x64x32xf32> -> vector<8x64x32xf32>
    %68 = vector.shape_cast %67 : vector<8x64x32xf32> to vector<512x32xf32>
    %69 = vector.shape_cast %66 : vector<8x64x64xf32> to vector<512x64xf32>
    %cst_39 = arith.constant dense<0.000000e+00> : vector<512x32xf32>
    %70 = tpu.matmul %69, %45, %cst_39 {dimension_numbers = #tpu.dot_dimension_numbers<[1], [0], [0], [1], [0, 0, 1, 1], [], []>} : vector<512x64xf32>, vector<64x32xf32>, vector<512x32xf32> -> vector<512x32xf32>
    %71 = tpu.reciprocal %70 {approx = true} : vector<512x32xf32> -> vector<512x32xf32>
    %72 = arith.mulf %68, %71 : vector<512x32xf32>
    %c0_40 = arith.constant 0 : index
    %c0_41 = arith.constant 0 : index
    %73 = vector.load %arg14[%c0_40, %c0_41] : memref<16x32xf32, #tpu.memory_space<vmem>>, vector<16x32xf32>
    %cst_42 = arith.constant dense<0.000000e+00> : vector<16x512xf32>
    %74 = tpu.matmul %73, %72, %cst_42 {dimension_numbers = #tpu.dot_dimension_numbers<[1], [1], [0], [0], [0, 0, 1, 0], [], []>} : vector<16x32xf32>, vector<512x32xf32>, vector<16x512xf32> -> vector<16x512xf32>
    %75 = arith.addf %74, %5 : vector<16x512xf32>
    %c0_43 = arith.constant 0 : index
    %c0_44 = arith.constant 0 : index
    %76 = vector.load %arg15[%c0_43, %c0_44] : memref<16x1xf32, #tpu.memory_space<vmem>>, vector<16x1xf32>
    %77 = vector.broadcast %76 : vector<16x1xf32> to vector<16x512xf32>
    %78 = arith.addf %75, %77 : vector<16x512xf32>
    %cst_45 = arith.constant dense<0.000000e+00> : vector<512xf32>
    %79 = vector.multi_reduction <add>, %78, %cst_45 [0] : vector<16x512xf32> to vector<512xf32>
    %80 = vector.shape_cast %79 : vector<512xf32> to vector<1x512xf32>
    %cst_46 = arith.constant 1.600000e+01 : f32
    %81 = vector.broadcast %cst_46 : f32 to vector<1x512xf32>
    %82 = arith.divf %80, %81 : vector<1x512xf32>
    %83 = vector.broadcast %82 : vector<1x512xf32> to vector<16x512xf32>
    %84 = arith.subf %78, %83 : vector<16x512xf32>
    %85 = arith.mulf %84, %84 : vector<16x512xf32>
    %cst_47 = arith.constant dense<0.000000e+00> : vector<512xf32>
    %86 = vector.multi_reduction <add>, %85, %cst_47 [0] : vector<16x512xf32> to vector<512xf32>
    %87 = vector.shape_cast %86 : vector<512xf32> to vector<1x512xf32>
    %cst_48 = arith.constant 1.600000e+01 : f32
    %88 = vector.broadcast %cst_48 : f32 to vector<1x512xf32>
    %89 = arith.divf %87, %88 : vector<1x512xf32>
    %90 = vector.broadcast %82 : vector<1x512xf32> to vector<16x512xf32>
    %91 = arith.subf %78, %90 : vector<16x512xf32>
    %cst_49 = arith.constant 9.99999974E-6 : f32
    %92 = vector.broadcast %cst_49 : f32 to vector<1x512xf32>
    %93 = arith.addf %89, %92 : vector<1x512xf32>
    %94 = math.rsqrt %93 : vector<1x512xf32>
    %95 = vector.broadcast %94 : vector<1x512xf32> to vector<16x512xf32>
    %96 = arith.mulf %91, %95 : vector<16x512xf32>
    %c0_50 = arith.constant 0 : index
    %c0_51 = arith.constant 0 : index
    %97 = vector.load %arg16[%c0_50, %c0_51] : memref<16x1xf32, #tpu.memory_space<vmem>>, vector<16x1xf32>
    %98 = vector.broadcast %97 : vector<16x1xf32> to vector<16x512xf32>
    %99 = arith.mulf %96, %98 : vector<16x512xf32>
    %c0_52 = arith.constant 0 : index
    %c0_53 = arith.constant 0 : index
    %100 = vector.load %arg17[%c0_52, %c0_53] : memref<16x1xf32, #tpu.memory_space<vmem>>, vector<16x1xf32>
    %101 = vector.broadcast %100 : vector<16x1xf32> to vector<16x512xf32>
    %102 = arith.addf %99, %101 : vector<16x512xf32>
    %c0_54 = arith.constant 0 : index
    %c0_55 = arith.constant 0 : index
    %103 = vector.load %arg18[%c0_54, %c0_55] : memref<64x16xf32, #tpu.memory_space<vmem>>, vector<64x16xf32>
    %cst_56 = arith.constant dense<0.000000e+00> : vector<64x512xf32>
    %104 = tpu.matmul %103, %102, %cst_56 {dimension_numbers = #tpu.dot_dimension_numbers<[1], [0], [0], [1], [0, 0, 1, 1], [], []>} : vector<64x16xf32>, vector<16x512xf32>, vector<64x512xf32> -> vector<64x512xf32>
    %c0_57 = arith.constant 0 : index
    %c0_58 = arith.constant 0 : index
    %105 = vector.load %arg19[%c0_57, %c0_58] : memref<64x1xf32, #tpu.memory_space<vmem>>, vector<64x1xf32>
    %106 = vector.broadcast %105 : vector<64x1xf32> to vector<64x512xf32>
    %107 = arith.addf %104, %106 : vector<64x512xf32>
    %cst_59 = arith.constant 5.000000e-01 : f32
    %108 = vector.broadcast %cst_59 : f32 to vector<64x512xf32>
    %109 = arith.mulf %108, %107 : vector<64x512xf32>
    %cst_60 = arith.constant 4.471500e-02 : f32
    %110 = vector.broadcast %cst_60 : f32 to vector<64x512xf32>
    %111 = arith.mulf %110, %107 : vector<64x512xf32>
    %112 = arith.mulf %111, %107 : vector<64x512xf32>
    %113 = arith.mulf %112, %107 : vector<64x512xf32>
    %114 = arith.addf %107, %113 : vector<64x512xf32>
    %cst_61 = arith.constant 0.797884583 : f32
    %115 = vector.broadcast %cst_61 : f32 to vector<64x512xf32>
    %116 = arith.mulf %115, %114 : vector<64x512xf32>
    %117 = math.tanh %116 : vector<64x512xf32>
    %cst_62 = arith.constant 1.000000e+00 : f32
    %118 = vector.broadcast %cst_62 : f32 to vector<64x512xf32>
    %119 = arith.addf %118, %117 : vector<64x512xf32>
    %120 = arith.mulf %109, %119 : vector<64x512xf32>
    %c0_63 = arith.constant 0 : index
    %c0_64 = arith.constant 0 : index
    %121 = vector.load %arg20[%c0_63, %c0_64] : memref<16x64xf32, #tpu.memory_space<vmem>>, vector<16x64xf32>
    %cst_65 = arith.constant dense<0.000000e+00> : vector<16x512xf32>
    %122 = tpu.matmul %121, %120, %cst_65 {dimension_numbers = #tpu.dot_dimension_numbers<[1], [0], [0], [1], [0, 0, 1, 1], [], []>} : vector<16x64xf32>, vector<64x512xf32>, vector<16x512xf32> -> vector<16x512xf32>
    %c0_66 = arith.constant 0 : index
    %c0_67 = arith.constant 0 : index
    %123 = vector.load %arg21[%c0_66, %c0_67] : memref<16x1xf32, #tpu.memory_space<vmem>>, vector<16x1xf32>
    %124 = vector.broadcast %123 : vector<16x1xf32> to vector<16x512xf32>
    %125 = arith.addf %122, %124 : vector<16x512xf32>
    %126 = arith.addf %78, %125 : vector<16x512xf32>
    %c0_68 = arith.constant 0 : index
    %c0_69 = arith.constant 0 : index
    %127 = vector.load %arg22[%c0_68, %c0_69] : memref<16x512xf32, #tpu.memory_space<vmem>>, vector<16x512xf32>
    tpu.vector_store %arg22[%c0_68, %c0_69], %126 {strides = array<i32>} : memref<16x512xf32, #tpu.memory_space<vmem>>, vector<16x512xf32>,
    return
  }
}

</mosaic_0001>

<bundles_post_ra>
// kernel: tpu_custom_call.1
= control target key start
LH: loop header
LB: loop body
LE: loop exit
PB: predicated region body
PF: predicated region fallthrough
CT: control target
= control target key end

     0   :  { %s12062_s0 = inlined_call_operand.vmem [shape: f32[128,32], index: 0, kind: input, shape index: {}]   ;;  %s12063_s1 = inlined_call_operand.vmem [shape: f32[512,16], index: 1, kind: input, shape index: {}]   ;;  %s12064_s2 = inlined_call_operand.vmem [shape: f32[16,32], index: 2, kind: input, shape index: {}]   ;;  %s12065_s3 = inlined_call_operand.vmem [shape: f32[128,512], index: 3, kind: input, shape index: {}]   ;;  %s12066_s4 = inlined_call_operand.vmem [shape: f32[1,32], index: 4, kind: input, shape index: {}]   ;;  %s12067_s5 = inlined_call_operand.vmem [shape: f32[1,32], index: 5, kind: input, shape index: {}]   ;;  %s12068_s6 = inlined_call_operand.vmem [shape: f32[16,32], index: 6, kind: input, shape index: {}]   ;;  %s12069_s7 = inlined_call_operand.vmem [shape: f32[1,32], index: 7, kind: input, shape index: {}]   ;;  %s12070_s8 = inlined_call_operand.vmem [shape: f32[32,32], index: 8, kind: input, shape index: {}]   ;;  %s12071_s9 = inlined_call_operand.vmem [shape: f32[1,32], index: 9, kind: input, shape index: {}]   ;;  %s12072_s10 = inlined_call_operand.vmem [shape: f32[32,32], index: 10, kind: input, shape index: {}]   ;;  %s12073_s11 = inlined_call_operand.vmem [shape: f32[1,32], index: 11, kind: input, shape index: {}]   ;;  %s12074_s12 = inlined_call_operand.vmem [shape: f32[64,32], index: 12, kind: input, shape index: {}]   ;;  %s12075_s13 = inlined_call_operand.vmem [shape: f32[64,64], index: 13, kind: input, shape index: {}]   ;;  %s12076_s14 = inlined_call_operand.vmem [shape: f32[16,32], index: 14, kind: input, shape index: {}]   ;;  %s12077_s15 = inlined_call_operand.vmem [shape: f32[16,1], index: 15, kind: input, shape index: {}]   ;;  %s12078_s16 = inlined_call_operand.vmem [shape: f32[16,1], index: 16, kind: input, shape index: {}]   ;;  %s12079_s17 = inlined_call_operand.vmem [shape: f32[16,1], index: 17, kind: input, shape index: {}]   ;;  %s12080_s18 = inlined_call_operand.vmem [shape: f32[64,16], index: 18, kind: input, shape index: {}]   ;;  %s12081_s19 = inlined_call_operand.vmem [shape: f32[64,1], index: 19, kind: input, shape index: {}]   ;;  %s12082_s20 = inlined_call_operand.vmem [shape: f32[16,64], index: 20, kind: input, shape index: {}]   ;;  %s12083_s21 = inlined_call_operand.vmem [shape: f32[16,1], index: 21, kind: input, shape index: {}]   ;;  %s12084_s22 = inlined_call_operand.hbm [shape: f32[16,512], index: 22, kind: output, shape index: {}]  }
   0x1   :  { %12126 = sst [smem:[#allocation44_spill]] %s12062_s0 }
   0x2   :  { %12127 = sst [smem:[#allocation45_spill]] %s12063_s1 }
   0x3   :  { %12128 = sst [smem:[#allocation46_spill]] %s12064_s2 }
   0x4   :  { %12129 = sst [smem:[#allocation47_spill]] %s12065_s3 }
   0x5   :  { %12130 = sst [smem:[#allocation48_spill]] %s12066_s4 }
   0x6   :  { %12131 = sst [smem:[#allocation49_spill]] %s12067_s5 }
   0x7   :  { %12132 = sst [smem:[#allocation50_spill]] %s12068_s6 }
   0x8   :  { %s12133_s29 = sld [smem:[#allocation44_spill]]  ;;  %vm154_vm0 = vcmask 261120  }
   0x9   :  { %s12134_s1 = sld [smem:[#allocation46_spill]] }
   0xe   :  { %v8582_v0 = vld [vmem:[%s12133_s29 + $0x78] sm:$0xff]  ;;  %v8587_v1 = vld [vmem:[%s12133_s29] sm:$0xff]  ;;  %v8592_v2 = vld [vmem:[%s12133_s29 + $0x70] sm:$0xff] }
   0xf   :  { %7300 = vmatprep.subr.msk.mxu0 %vm154_vm0, %v8582_v0  ;;  %v502_v3 = vsel %vm154_vm0, %v8587_v1, 0.0  ;;  %v8601_v4 = vld [vmem:[%s12133_s29 + $0x10] sm:$0xff]  ;;  %v8606_v5 = vld [vmem:[%s12133_s29 + $0x8] sm:$0xff]  ;;  %v8615_v7 = vld [vmem:[%s12133_s29 + $0x18] sm:$0xff] }
  0x10   :  { %7301 = vmatpush3.xpose.msk.msra.mxu0 %vm154_vm0, %v8582_v0  ;;  %503 = vadd.xlane.f32.xlu0 %v502_v3  ;;  %v508_v6 = vsel %vm154_vm0, %v8601_v4, 0.0  ;;  %v505_v8 = vsel %vm154_vm0, %v8606_v5, 0.0  ;;  %v8624_v9 = vld [vmem:[%s12133_s29 + $0x68] sm:$0xff]  ;;  %v511_v10 = vsel %vm154_vm0, %v8615_v7, 0.0  ;;  %v8631_v11 = vld [vmem:[%s12133_s29 + $0x20] sm:$0xff] }
  0x11   :  { %7302 = vmatprep.subr.msk.mxu0 %vm154_vm0, %v8592_v2  ;;  %509 = vadd.xlane.f32.xlu1 %v508_v6  ;;  %v8636_v12 = vld [vmem:[%s12133_s29 + $0x28] sm:$0xff]  ;;  %v152_v13 = vld [vmem:[%s12134_s1] sm:$0xff] }
  0x14   :  { %7303 = vmatpush3.xpose.msk.msra.mxu0 %vm154_vm0, %v8592_v2  ;;  %506 = vadd.xlane.f32.xlu0 %v505_v8 }
  0x15   :  { %27 = vsyncpa [#allocation3], 0  ;;  %7304 = vmatprep.subr.msk.mxu0 %vm154_vm0, %v8624_v9  ;;  %512 = vadd.xlane.f32.xlu1 %v511_v10  ;;  %v514_v14 = vsel %vm154_vm0, %v8631_v11, 0.0  ;;  %v8650_v15 = vld [vmem:[%s12133_s29 + $0x60] sm:$0xff]  ;;  %v517_v16 = vsel %vm154_vm0, %v8636_v12, 0.0  ;;  %v8657_v17 = vld [vmem:[%s12133_s29 + $0x30] sm:$0xff] }
  0x16   :  { %7332 = vmatprep.mubr.msk.f32.mxu0 %vm154_vm0, %v152_v13  ;;  %v8663_v18 = vld [vmem:[%s12133_s29 + $0x38] sm:$0xff]  ;;  %v520_v19 = vsel %vm154_vm0, %v8657_v17, 0.0  ;;  %v8681_v22 = vld [vmem:[%s12133_s29 + $0x40] sm:$0xff]  ;;  %v8686_v23 = vld [vmem:[%s12133_s29 + $0x48] sm:$0xff]  ;;  %v538_v29 = vsel %vm154_vm0, %v8650_v15, 0.0  ;;  %v541_v30 = vsel %vm154_vm0, %v8624_v9, 0.0 }
  0x17   :  { %v8674_v20 = vld [vmem:[%s12133_s29 + $0x58] sm:$0xff]  ;;  %v523_v21 = vsel %vm154_vm0, %v8663_v18, 0.0  ;;  %v526_v24 = vsel %vm154_vm0, %v8681_v22, 0.0  ;;  %v8697_v25 = vld [vmem:[%s12133_s29 + $0x50] sm:$0xff]  ;;  %v529_v26 = vsel %vm154_vm0, %v8686_v23, 0.0  ;;  %s12135_s25 = sld [smem:[#allocation47_spill]] }
  0x18   :  { %7305 = vmatpush3.xpose.msk.msra.mxu0 %vm154_vm0, %v8624_v9  ;;  %515 = vadd.xlane.f32.xlu0 %v514_v14  ;;  %v532_v27 = vsel %vm154_vm0, %v8697_v25, 0.0  ;;  %v535_v28 = vsel %vm154_vm0, %v8674_v20, 0.0  ;;  %v153_v44 = vld [vmem:[%s12134_s1 + $0x8] sm:$0xff]  ;;  %v12090_v6 = vmov 0.0   ;;  %s12136_s30 = sld [smem:[#allocation50_spill]]  ;;  %vm766_vm1 = vcmask 130048  }
  0x19   :  { %7306 = vmatprep.subr.msk.mxu0 %vm154_vm0, %v8650_v15  ;;  %518 = vadd.xlane.f32.xlu1 %v517_v16  ;;  %s12137_s5 = sld [smem:[#allocation45_spill]]  ;;  %vm3072_vm2 = vcmask 523264  }
  0x1a   :  { %412 = vmatprep.mubr.f32.mxu1 %v12090_v6  ;;  %s12138_s1 = sld [smem:[#allocation48_spill]] }
  0x1b   :  { %s12139_s26 = sld [smem:[#allocation49_spill]] }
  0x1c   :  { %7307 = vmatpush3.xpose.msk.msra.mxu0 %vm154_vm0, %v8650_v15  ;;  %521 = vadd.xlane.f32.xlu0 %v520_v19 }
  0x1d   :  { %7308 = vmatprep.subr.msk.mxu0 %vm154_vm0, %v8674_v20  ;;  %524 = vadd.xlane.f32.xlu1 %v523_v21  ;;  %v345_v31 = vld [vmem:[%s12135_s25 + $0x1e8] sm:$0xff]  ;;  %v344_v32 = vld [vmem:[%s12135_s25 + $0x1e0] sm:$0xff]  ;;  %v347_v3 = vld [vmem:[%s12135_s25 + $0x1f8] sm:$0xff] }
  0x1e   :  { %v341_v33 = vld [vmem:[%s12135_s25 + $0x1c8] sm:$0xff]  ;;  %348 = vmatprep.subr.mxu1 %v345_v31  ;;  %v340_v34 = vld [vmem:[%s12135_s25 + $0x1c0] sm:$0xff] }
  0x1f   :  { %349 = vmatpush1.msra.mxu1 %v344_v32  ;;  %v337_v35 = vld [vmem:[%s12135_s25 + $0x1a8] sm:$0xff]  ;;  %v336_v36 = vld [vmem:[%s12135_s25 + $0x1a0] sm:$0xff] }
  0x20   :  { %7309 = vmatpush3.xpose.msk.msra.mxu0 %vm154_vm0, %v8674_v20  ;;  %527 = vadd.xlane.f32.xlu0 %v526_v24  ;;  %v333_v37 = vld [vmem:[%s12135_s25 + $0x188] sm:$0xff]  ;;  %v332_v38 = vld [vmem:[%s12135_s25 + $0x180] sm:$0xff] }
  0x21   :  { %7310 = vmatprep.subr.msk.mxu0 %vm154_vm0, %v8697_v25  ;;  %530 = vadd.xlane.f32.xlu1 %v529_v26  ;;  %v329_v39 = vld [vmem:[%s12135_s25 + $0x168] sm:$0xff]  ;;  %v328_v40 = vld [vmem:[%s12135_s25 + $0x160] sm:$0xff] }
  0x22   :  { %350 = vmatprep.subr.mxu1 %v341_v33  ;;  %v325_v41 = vld [vmem:[%s12135_s25 + $0x148] sm:$0xff]  ;;  %v324_v42 = vld [vmem:[%s12135_s25 + $0x140] sm:$0xff] }
  0x23   :  { %351 = vmatpush1.msra.mxu1 %v340_v34  ;;  %v321_v43 = vld [vmem:[%s12135_s25 + $0x128] sm:$0xff]  ;;  %v320_v45 = vld [vmem:[%s12135_s25 + $0x120] sm:$0xff] }
  0x24   :  { %7311 = vmatpush3.xpose.msk.msra.mxu0 %vm154_vm0, %v8697_v25  ;;  %533 = vadd.xlane.f32.xlu0 %v532_v27  ;;  %v317_v46 = vld [vmem:[%s12135_s25 + $0x108] sm:$0xff]  ;;  %v316_v47 = vld [vmem:[%s12135_s25 + $0x100] sm:$0xff] }
  0x25   :  { %7312 = vmatprep.subr.msk.mxu0 %vm154_vm0, %v8686_v23  ;;  %536 = vadd.xlane.f32.xlu1 %v535_v28  ;;  %v313_v48 = vld [vmem:[%s12135_s25 + $0xe8] sm:$0xff]  ;;  %v312_v49 = vld [vmem:[%s12135_s25 + $0xe0] sm:$0xff] }
  0x26   :  { %352 = vmatprep.subr.mxu1 %v337_v35  ;;  %v309_v50 = vld [vmem:[%s12135_s25 + $0xc8] sm:$0xff]  ;;  %v308_v51 = vld [vmem:[%s12135_s25 + $0xc0] sm:$0xff] }
  0x27   :  { %353 = vmatpush1.msra.mxu1 %v336_v36  ;;  %v305_v52 = vld [vmem:[%s12135_s25 + $0xa8] sm:$0xff]  ;;  %v304_v53 = vld [vmem:[%s12135_s25 + $0xa0] sm:$0xff] }
  0x28   :  { %7313 = vmatpush3.xpose.msk.msra.mxu0 %vm154_vm0, %v8686_v23  ;;  %539 = vadd.xlane.f32.xlu0 %v538_v29  ;;  %v301_v54 = vld [vmem:[%s12135_s25 + $0x88] sm:$0xff]  ;;  %v300_v55 = vld [vmem:[%s12135_s25 + $0x80] sm:$0xff] }
  0x29   :  { %7314 = vmatprep.subr.msk.mxu0 %vm154_vm0, %v8681_v22  ;;  %542 = vadd.xlane.f32.xlu1 %v541_v30  ;;  %v297_v56 = vld [vmem:[%s12135_s25 + $0x68] sm:$0xff]  ;;  %v296_v57 = vld [vmem:[%s12135_s25 + $0x60] sm:$0xff] }
  0x2a   :  { %354 = vmatprep.subr.mxu1 %v333_v37  ;;  %v293_v58 = vld [vmem:[%s12135_s25 + $0x48] sm:$0xff]  ;;  %v292_v59 = vld [vmem:[%s12135_s25 + $0x40] sm:$0xff] }
  0x2b   :  { %355 = vmatpush1.msra.mxu1 %v332_v38  ;;  %v289_v60 = vld [vmem:[%s12135_s25 + $0x28] sm:$0xff]  ;;  %v288_v61 = vld [vmem:[%s12135_s25 + $0x20] sm:$0xff] }
  0x2c   :  { %7315 = vmatpush3.xpose.msk.msra.mxu0 %vm154_vm0, %v8681_v22  ;;  %356 = vmatprep.subr.mxu1 %v329_v39  ;;  %v285_v62 = vld [vmem:[%s12135_s25 + $0x8] sm:$0xff]  ;;  %v284_v63 = vld [vmem:[%s12135_s25] sm:$0xff] }
  0x2d   :  { %7316 = vmatprep.subr.msk.mxu0 %vm154_vm0, %v8663_v18  ;;  %357 = vmatpush1.msra.mxu1 %v328_v40 }
  0x2e   :  { %358 = vmatprep.subr.mxu1 %v325_v41 }
  0x2f   :  { %359 = vmatpush1.msra.mxu1 %v324_v42 }
  0x30   :  { %7317 = vmatpush3.xpose.msk.msra.mxu0 %vm154_vm0, %v8663_v18  ;;  %360 = vmatprep.subr.mxu1 %v321_v43 }
  0x31   :  { %7318 = vmatprep.subr.msk.mxu0 %vm154_vm0, %v8657_v17  ;;  %361 = vmatpush1.msra.mxu1 %v320_v45 }
  0x32   :  { %362 = vmatprep.subr.mxu1 %v317_v46 }
  0x33   :  { %363 = vmatpush1.msra.mxu1 %v316_v47 }
  0x34   :  { %7319 = vmatpush3.xpose.msk.msra.mxu0 %vm154_vm0, %v8657_v17  ;;  %364 = vmatprep.subr.mxu1 %v313_v48 }
  0x35   :  { %7320 = vmatprep.subr.msk.mxu0 %vm154_vm0, %v8636_v12  ;;  %365 = vmatpush1.msra.mxu1 %v312_v49 }
  0x36   :  { %366 = vmatprep.subr.mxu1 %v309_v50 }
  0x37   :  { %367 = vmatpush1.msra.mxu1 %v308_v51 }
  0x38   :  { %7321 = vmatpush3.xpose.msk.msra.mxu0 %vm154_vm0, %v8636_v12  ;;  %368 = vmatprep.subr.mxu1 %v305_v52 }
  0x39   :  { %7322 = vmatprep.subr.msk.mxu0 %vm154_vm0, %v8631_v11  ;;  %369 = vmatpush1.msra.mxu1 %v304_v53 }
  0x3a   :  { %370 = vmatprep.subr.mxu1 %v301_v54 }
  0x3b   :  { %371 = vmatpush1.msra.mxu1 %v300_v55 }
  0x3c   :  { %7323 = vmatpush3.xpose.msk.msra.mxu0 %vm154_vm0, %v8631_v11  ;;  %372 = vmatprep.subr.mxu1 %v297_v56 }
  0x3d   :  { %7324 = vmatprep.subr.msk.mxu0 %vm154_vm0, %v8615_v7  ;;  %373 = vmatpush1.msra.mxu1 %v296_v57 }
  0x3e   :  { %374 = vmatprep.subr.mxu1 %v293_v58 }
  0x3f   :  { %375 = vmatpush1.msra.mxu1 %v292_v59 }
  0x40   :  { %7325 = vmatpush3.xpose.msk.msra.mxu0 %vm154_vm0, %v8615_v7  ;;  %376 = vmatprep.subr.mxu1 %v289_v60 }
  0x41   :  { %7326 = vmatprep.subr.msk.mxu0 %vm154_vm0, %v8601_v4  ;;  %377 = vmatpush1.msra.mxu1 %v288_v61 }
  0x42   :  { %378 = vmatprep.subr.mxu1 %v285_v62 }
  0x43   :  { %379 = vmatpush1.msra.mxu1 %v284_v63 }
  0x44   :  { %7327 = vmatpush3.xpose.msk.msra.mxu0 %vm154_vm0, %v8601_v4  ;;  %425 = vmatprep.subr.mxu1 %v347_v3 }
  0x45   :  { %7328 = vmatprep.subr.msk.mxu0 %vm154_vm0, %v8606_v5 }
  0x48   :  { %7329 = vmatpush3.xpose.msk.msra.mxu0 %vm154_vm0, %v8606_v5 }
  0x49   :  { %7330 = vmatprep.subr.msk.mxu0 %vm154_vm0, %v8587_v1 }
  0x4c   :  { %7331 = vmatpush3.xpose.msk.msra.mxu0 %vm154_vm0, %v8587_v1 }
  0x4f   :  { %7333 = vmatmul.mubr.msk.f32.vlgmr.msra.gmra.mxu0 %vm154_vm0, %v153_v44 }
  0x99   :  { %v504_v8 = vpop.xlane.xlu0 %503 }
  0x9a   :  { %v551_v10 = vmul.f32 0.03125, %v504_v8  ;;  %v510_v13 = vpop.xlane.xlu1 %509 }
  0x9b   :  { %v553_v14 = vmul.f32 0.03125, %v510_v13 }
  0x9c   :  { %v8860_v16 = vsub.f32 %v8587_v1, %v551_v10 }
  0x9d   :  { %v8863_v19 = vsub.f32 %v8601_v4, %v553_v14  ;;  %v507_v21 = vpop.xlane.xlu0 %506 }
  0x9e   :  { %v552_v24 = vmul.f32 0.03125, %v507_v21  ;;  %v513_v26 = vpop.xlane.xlu1 %512  ;;  %v583_v27 = vmul.f32 %v8860_v16, %v8860_v16 }
  0x9f   :  { %v554_v28 = vmul.f32 0.03125, %v513_v26  ;;  %v585_v29 = vmul.f32 %v8863_v19, %v8863_v19 }
  0xa0   :  { %v8870_v30 = vsub.f32 %v8606_v5, %v552_v24  ;;  %v599_v31 = vsel %vm154_vm0, %v583_v27, 0.0 }
  0xa1   :  { %v8874_v1 = vsub.f32 %v8615_v7, %v554_v28  ;;  %600 = vadd.xlane.f32.xlu0 %v599_v31  ;;  %v516_v4 = vpop.xlane.xlu0 %515  ;;  %v605_v34 = vsel %vm154_vm0, %v585_v29, 0.0  ;;  %v547_v31 = vsel %vm154_vm0, %v8582_v0, 0.0  ;;  %v89_v0 = vld [vmem:[%s12137_s5 + $0x8] sm:$0xff] }
  0xa2   :  { %v555_v32 = vmul.f32 0.03125, %v516_v4  ;;  %v519_v33 = vpop.xlane.xlu1 %518  ;;  %v584_v35 = vmul.f32 %v8870_v30, %v8870_v30  ;;  %v758_v4 = vld [vmem:[%s12136_s30 + $0x8] sm:$0xff] }
  0xa3   :  { %v556_v36 = vmul.f32 0.03125, %v519_v33  ;;  %v586_v37 = vmul.f32 %v8874_v1, %v8874_v1  ;;  %7335 = vmatprep.subr.mxu0 %v758_v4  ;;  %v90_v33 = vld [vmem:[%s12137_s5 + $0x10] sm:$0xff] }
  0xa4   :  { %v8882_v5 = vsub.f32 %v8631_v11, %v555_v32  ;;  %v602_v38 = vsel %vm154_vm0, %v584_v35, 0.0  ;;  %7336 = vmatpush3.msra.mxu0 %v758_v4  ;;  %v757_v32 = vld [vmem:[%s12136_s30] sm:$0xff]  ;;  %v334_v4 = vld [vmem:[%s12135_s25 + $0x190] sm:$0xff] }
  0xa5   :  { %v8886_v7 = vsub.f32 %v8636_v12, %v556_v36  ;;  %606 = vadd.xlane.f32.xlu0 %v605_v34  ;;  %603 = vadd.xlane.f32.xlu1 %v602_v38  ;;  %v522_v39 = vpop.xlane.xlu0 %521  ;;  %v608_v42 = vsel %vm154_vm0, %v586_v37, 0.0  ;;  %v91_v34 = vld [vmem:[%s12137_s5 + $0x18] sm:$0xff]  ;;  %v92_v35 = vld [vmem:[%s12137_s5 + $0x20] sm:$0xff]  ;;  %v93_v36 = vld [vmem:[%s12137_s5 + $0x28] sm:$0xff] }
  0xa6   :  { %v557_v40 = vmul.f32 0.03125, %v522_v39  ;;  %v525_v41 = vpop.xlane.xlu1 %524  ;;  %v587_v43 = vmul.f32 %v8882_v5, %v8882_v5  ;;  %7337 = vmatprep.subr.mxu0 %v757_v32  ;;  %v94_v37 = vld [vmem:[%s12137_s5 + $0x30] sm:$0xff]  ;;  %v95_v38 = vld [vmem:[%s12137_s5 + $0x38] sm:$0xff]  ;;  %v96_v39 = vld [vmem:[%s12137_s5 + $0x40] sm:$0xff] }
  0xa7   :  { %v558_v44 = vmul.f32 0.03125, %v525_v41  ;;  %v588_v11 = vmul.f32 %v8886_v7, %v8886_v7  ;;  %7338 = vmatpush3.msra.mxu0 %v757_v32  ;;  %v98_v41 = vld [vmem:[%s12137_s5 + $0x50] sm:$0xff]  ;;  %v127_v32 = vld [vmem:[%s12137_s5 + $0x138] sm:$0xff] }
  0xa8   :  { %v8894_v45 = vsub.f32 %v8657_v17, %v557_v40  ;;  %v611_v12 = vsel %vm154_vm0, %v587_v43, 0.0  ;;  %v97_v40 = vld [vmem:[%s12137_s5 + $0x48] sm:$0xff]  ;;  %v100_v43 = vld [vmem:[%s12137_s5 + $0x60] sm:$0xff] }
  0xa9   :  { %v8898_v46 = vsub.f32 %v8663_v18, %v558_v44  ;;  %609 = vadd.xlane.f32.xlu1 %v608_v42  ;;  %612 = vadd.xlane.f32.xlu0 %v611_v12  ;;  %v528_v47 = vpop.xlane.xlu0 %527  ;;  %v614_v50 = vsel %vm154_vm0, %v588_v11, 0.0  ;;  %v99_v42 = vld [vmem:[%s12137_s5 + $0x58] sm:$0xff]  ;;  %v101_v44 = vld [vmem:[%s12137_s5 + $0x68] sm:$0xff]  ;;  %v102_v11 = vld [vmem:[%s12137_s5 + $0x70] sm:$0xff] }
  0xaa   :  { %v559_v48 = vmul.f32 0.03125, %v528_v47  ;;  %v531_v49 = vpop.xlane.xlu1 %530  ;;  %v589_v51 = vmul.f32 %v8894_v45, %v8894_v45  ;;  %v103_v12 = vld [vmem:[%s12137_s5 + $0x78] sm:$0xff]  ;;  %v104_v47 = vld [vmem:[%s12137_s5 + $0x80] sm:$0xff] }
  0xab   :  { %v560_v52 = vmul.f32 0.03125, %v531_v49  ;;  %v590_v17 = vmul.f32 %v8898_v46, %v8898_v46  ;;  %v106_v49 = vld [vmem:[%s12137_s5 + $0x90] sm:$0xff] }
  0xac   :  { %v8906_v53 = vsub.f32 %v8681_v22, %v559_v48  ;;  %v617_v18 = vsel %vm154_vm0, %v589_v51, 0.0  ;;  %v105_v48 = vld [vmem:[%s12137_s5 + $0x88] sm:$0xff]  ;;  %v108_v51 = vld [vmem:[%s12137_s5 + $0xa0] sm:$0xff] }
  0xad   :  { %v8910_v54 = vsub.f32 %v8686_v23, %v560_v52  ;;  %615 = vadd.xlane.f32.xlu1 %v614_v50  ;;  %618 = vadd.xlane.f32.xlu0 %v617_v18  ;;  %v534_v55 = vpop.xlane.xlu0 %533  ;;  %v620_v58 = vsel %vm154_vm0, %v590_v17, 0.0  ;;  %v107_v50 = vld [vmem:[%s12137_s5 + $0x98] sm:$0xff]  ;;  %v109_v52 = vld [vmem:[%s12137_s5 + $0xa8] sm:$0xff]  ;;  %v110_v17 = vld [vmem:[%s12137_s5 + $0xb0] sm:$0xff] }
  0xae   :  { %v561_v56 = vmul.f32 0.03125, %v534_v55  ;;  %v537_v57 = vpop.xlane.xlu1 %536  ;;  %v591_v59 = vmul.f32 %v8906_v53, %v8906_v53  ;;  %v111_v18 = vld [vmem:[%s12137_s5 + $0xb8] sm:$0xff]  ;;  %v112_v55 = vld [vmem:[%s12137_s5 + $0xc0] sm:$0xff] }
  0xaf   :  { %v562_v60 = vmul.f32 0.03125, %v537_v57  ;;  %v592_v22 = vmul.f32 %v8910_v54, %v8910_v54  ;;  %v114_v57 = vld [vmem:[%s12137_s5 + $0xd0] sm:$0xff] }
  0xb0   :  { %v8918_v61 = vsub.f32 %v8697_v25, %v561_v56  ;;  %v623_v23 = vsel %vm154_vm0, %v591_v59, 0.0  ;;  %v113_v56 = vld [vmem:[%s12137_s5 + $0xc8] sm:$0xff]  ;;  %v116_v59 = vld [vmem:[%s12137_s5 + $0xe0] sm:$0xff] }
  0xb1   :  { %v8922_v62 = vsub.f32 %v8674_v20, %v562_v60  ;;  %621 = vadd.xlane.f32.xlu1 %v620_v58  ;;  %624 = vadd.xlane.f32.xlu0 %v623_v23  ;;  %v540_v63 = vpop.xlane.xlu0 %539  ;;  %v626_v10 = vsel %vm154_vm0, %v592_v22, 0.0  ;;  %v115_v58 = vld [vmem:[%s12137_s5 + $0xd8] sm:$0xff]  ;;  %v117_v60 = vld [vmem:[%s12137_s5 + $0xe8] sm:$0xff]  ;;  %v118_v22 = vld [vmem:[%s12137_s5 + $0xf0] sm:$0xff] }
  0xb2   :  { %v563_v3 = vmul.f32 0.03125, %v540_v63  ;;  %v543_v8 = vpop.xlane.xlu1 %542  ;;  %v593_v13 = vmul.f32 %v8918_v61, %v8918_v61  ;;  %v119_v23 = vld [vmem:[%s12137_s5 + $0xf8] sm:$0xff]  ;;  %v120_v63 = vld [vmem:[%s12137_s5 + $0x100] sm:$0xff] }
  0xb3   :  { %v564_v14 = vmul.f32 0.03125, %v543_v8  ;;  %v594_v25 = vmul.f32 %v8922_v62, %v8922_v62  ;;  %v122_v8 = vld [vmem:[%s12137_s5 + $0x110] sm:$0xff] }
  0xb4   :  { %v8930_v21 = vsub.f32 %v8650_v15, %v563_v3  ;;  %v629_v20 = vsel %vm154_vm0, %v593_v13, 0.0  ;;  %v121_v3 = vld [vmem:[%s12137_s5 + $0x108] sm:$0xff] }
  0xb5   :  { %v8934_v24 = vsub.f32 %v8624_v9, %v564_v14  ;;  %627 = vadd.xlane.f32.xlu1 %v626_v10  ;;  %630 = vadd.xlane.f32.xlu0 %v629_v20  ;;  %v632_v26 = vsel %vm154_vm0, %v594_v25, 0.0  ;;  %v544_v9 = vsel %vm154_vm0, %v8592_v2, 0.0  ;;  %v88_v2 = vld [vmem:[%s12137_s5] sm:$0xff]  ;;  %v123_v10 = vld [vmem:[%s12137_s5 + $0x118] sm:$0xff]  ;;  %v346_v25 = vld [vmem:[%s12135_s25 + $0x1f0] sm:$0xff] }
  0xb6   :  { %v595_v27 = vmul.f32 %v8930_v21, %v8930_v21  ;;  %7339 = vmatprep.mubr.msk.f32.mxu0 %vm766_vm1, %v88_v2  ;;  %v124_v14 = vld [vmem:[%s12137_s5 + $0x120] sm:$0xff]  ;;  %v331_v2 = vld [vmem:[%s12135_s25 + $0x178] sm:$0xff] }
  0xb7   :  { %v596_v28 = vmul.f32 %v8934_v24, %v8934_v24  ;;  %7340 = vmatmul.mubr.msk.f32.vlgmr.msra.gmra.mxu0 %vm766_vm1, %v89_v0  ;;  %v128_v0 = vld [vmem:[%s12137_s5 + $0x140] sm:$0xff] }
  0xb8   :  { %v635_v29 = vsel %vm154_vm0, %v595_v27, 0.0  ;;  %7342 = vmatprep.mubr.msk.f32.mxu0 %vm766_vm1, %v90_v33  ;;  %v342_v27 = vld [vmem:[%s12135_s25 + $0x1d0] sm:$0xff] }
  0xb9   :  { %633 = vadd.xlane.f32.xlu1 %v632_v26  ;;  %636 = vadd.xlane.f32.xlu0 %v635_v29  ;;  %v638_v15 = vsel %vm154_vm0, %v596_v28, 0.0  ;;  %v343_v26 = vld [vmem:[%s12135_s25 + $0x1d8] sm:$0xff]  ;;  %v125_v28 = vld [vmem:[%s12137_s5 + $0x128] sm:$0xff]  ;;  %v330_v33 = vld [vmem:[%s12135_s25 + $0x170] sm:$0xff] }
  0xba   :  { %v339_v29 = vld [vmem:[%s12135_s25 + $0x1b8] sm:$0xff] }
  0xbb   :  { %7343 = vmatmul.mubr.msk.f32.gmra.mxu0 %vm766_vm1, %v91_v34  ;;  %v327_v34 = vld [vmem:[%s12135_s25 + $0x158] sm:$0xff] }
  0xbc   :  { %7345 = vmatprep.mubr.msk.f32.mxu0 %vm766_vm1, %v92_v35  ;;  %v326_v35 = vld [vmem:[%s12135_s25 + $0x150] sm:$0xff] }
  0xbd   :  { %639 = vadd.xlane.f32.xlu1 %v638_v15  ;;  %545 = vadd.xlane.f32.xlu0 %v544_v9  ;;  %v338_v15 = vld [vmem:[%s12135_s25 + $0x1b0] sm:$0xff]  ;;  %v335_v9 = vld [vmem:[%s12135_s25 + $0x198] sm:$0xff] }
  0xbf   :  { %7346 = vmatmul.mubr.msk.f32.gmra.mxu0 %vm766_vm1, %v93_v36  ;;  %v129_v36 = vld [vmem:[%s12137_s5 + $0x148] sm:$0xff] }
  0xc0   :  { %7348 = vmatprep.mubr.msk.f32.mxu0 %vm766_vm1, %v94_v37  ;;  %v323_v37 = vld [vmem:[%s12135_s25 + $0x138] sm:$0xff] }
  0xc1   :  { %548 = vadd.xlane.f32.xlu1 %v547_v31  ;;  %v126_v31 = vld [vmem:[%s12137_s5 + $0x130] sm:$0xff] }
  0xc3   :  { %7349 = vmatmul.mubr.msk.f32.gmra.mxu0 %vm766_vm1, %v95_v38  ;;  %v130_v38 = vld [vmem:[%s12137_s5 + $0x150] sm:$0xff] }
  0xc4   :  { %7351 = vmatprep.mubr.msk.f32.mxu0 %vm766_vm1, %v96_v39  ;;  %v322_v39 = vld [vmem:[%s12135_s25 + $0x130] sm:$0xff] }
  0xc7   :  { %7352 = vmatmul.mubr.msk.f32.gmra.mxu0 %vm766_vm1, %v97_v40  ;;  %v319_v40 = vld [vmem:[%s12135_s25 + $0x118] sm:$0xff] }
  0xc8   :  { %7354 = vmatprep.mubr.msk.f32.mxu0 %vm766_vm1, %v98_v41  ;;  %v318_v41 = vld [vmem:[%s12135_s25 + $0x110] sm:$0xff] }
  0xcb   :  { %7355 = vmatmul.mubr.msk.f32.gmra.mxu0 %vm766_vm1, %v99_v42  ;;  %v131_v42 = vld [vmem:[%s12137_s5 + $0x158] sm:$0xff] }
  0xcc   :  { %7357 = vmatprep.mubr.msk.f32.mxu0 %vm766_vm1, %v100_v43  ;;  %v315_v43 = vld [vmem:[%s12135_s25 + $0xf8] sm:$0xff] }
  0xcf   :  { %7358 = vmatmul.mubr.msk.f32.gmra.mxu0 %vm766_vm1, %v101_v44  ;;  %v132_v44 = vld [vmem:[%s12137_s5 + $0x160] sm:$0xff] }
  0xd0   :  { %7360 = vmatprep.mubr.msk.f32.mxu0 %vm766_vm1, %v102_v11  ;;  %v314_v11 = vld [vmem:[%s12135_s25 + $0xf0] sm:$0xff] }
  0xd3   :  { %7361 = vmatmul.mubr.msk.f32.gmra.mxu0 %vm766_vm1, %v103_v12  ;;  %v311_v12 = vld [vmem:[%s12135_s25 + $0xd8] sm:$0xff] }
  0xd4   :  { %7363 = vmatprep.mubr.msk.f32.mxu0 %vm766_vm1, %v104_v47  ;;  %v310_v47 = vld [vmem:[%s12135_s25 + $0xd0] sm:$0xff] }
  0xd7   :  { %7364 = vmatmul.mubr.msk.f32.gmra.mxu0 %vm766_vm1, %v105_v48  ;;  %v133_v48 = vld [vmem:[%s12137_s5 + $0x168] sm:$0xff] }
  0xd8   :  { %7366 = vmatprep.mubr.msk.f32.mxu0 %vm766_vm1, %v106_v49  ;;  %v307_v49 = vld [vmem:[%s12135_s25 + $0xb8] sm:$0xff] }
  0xdb   :  { %7367 = vmatmul.mubr.msk.f32.gmra.mxu0 %vm766_vm1, %v107_v50  ;;  %v134_v50 = vld [vmem:[%s12137_s5 + $0x170] sm:$0xff] }
  0xdc   :  { %7369 = vmatprep.mubr.msk.f32.mxu0 %vm766_vm1, %v108_v51  ;;  %v306_v51 = vld [vmem:[%s12135_s25 + $0xb0] sm:$0xff] }
  0xdf   :  { %7370 = vmatmul.mubr.msk.f32.gmra.mxu0 %vm766_vm1, %v109_v52  ;;  %v303_v52 = vld [vmem:[%s12135_s25 + $0x98] sm:$0xff] }
  0xe0   :  { %7372 = vmatprep.mubr.msk.f32.mxu0 %vm766_vm1, %v110_v17  ;;  %v302_v17 = vld [vmem:[%s12135_s25 + $0x90] sm:$0xff] }
  0xe3   :  { %7373 = vmatmul.mubr.msk.f32.gmra.mxu0 %vm766_vm1, %v111_v18  ;;  %v135_v18 = vld [vmem:[%s12137_s5 + $0x178] sm:$0xff] }
  0xe4   :  { %7375 = vmatprep.mubr.msk.f32.mxu0 %vm766_vm1, %v112_v55  ;;  %v299_v55 = vld [vmem:[%s12135_s25 + $0x78] sm:$0xff] }
  0xe7   :  { %7376 = vmatmul.mubr.msk.f32.gmra.mxu0 %vm766_vm1, %v113_v56  ;;  %v136_v56 = vld [vmem:[%s12137_s5 + $0x180] sm:$0xff] }
  0xe8   :  { %7378 = vmatprep.mubr.msk.f32.mxu0 %vm766_vm1, %v114_v57  ;;  %v298_v57 = vld [vmem:[%s12135_s25 + $0x70] sm:$0xff] }
  0xeb   :  { %7379 = vmatmul.mubr.msk.f32.gmra.mxu0 %vm766_vm1, %v115_v58  ;;  %v295_v58 = vld [vmem:[%s12135_s25 + $0x58] sm:$0xff] }
  0xec   :  { %7381 = vmatprep.mubr.msk.f32.mxu0 %vm766_vm1, %v116_v59 }
  0xef   :  { %7382 = vmatmul.mubr.msk.f32.gmra.mxu0 %vm766_vm1, %v117_v60  ;;  %v294_v60 = vld [vmem:[%s12135_s25 + $0x50] sm:$0xff] }
  0xf0   :  { %7384 = vmatprep.mubr.msk.f32.mxu0 %vm766_vm1, %v118_v22  ;;  %v137_v22 = vld [vmem:[%s12137_s5 + $0x188] sm:$0xff] }
  0xf3   :  { %7385 = vmatmul.mubr.msk.f32.gmra.mxu0 %vm766_vm1, %v119_v23 }
  0xf4   :  { %7387 = vmatprep.mubr.msk.f32.mxu0 %vm766_vm1, %v120_v63  ;;  %v291_v63 = vld [vmem:[%s12135_s25 + $0x38] sm:$0xff] }
  0xf7   :  { %7388 = vmatmul.mubr.msk.f32.gmra.mxu0 %vm766_vm1, %v121_v3  ;;  %v138_v3 = vld [vmem:[%s12137_s5 + $0x190] sm:$0xff] }
  0xf8   :  { %7390 = vmatprep.mubr.msk.f32.mxu0 %vm766_vm1, %v122_v8  ;;  %v290_v8 = vld [vmem:[%s12135_s25 + $0x30] sm:$0xff] }
  0xfb   :  { %7391 = vmatmul.mubr.msk.f32.gmra.mxu0 %vm766_vm1, %v123_v10 }
  0xfc   :  { %7393 = vmatprep.mubr.msk.f32.mxu0 %vm766_vm1, %v124_v14  ;;  %v287_v14 = vld [vmem:[%s12135_s25 + $0x18] sm:$0xff] }
  0xff   :  { %7394 = vmatmul.mubr.msk.f32.gmra.mxu0 %vm766_vm1, %v125_v28  ;;  %v139_v28 = vld [vmem:[%s12137_s5 + $0x198] sm:$0xff] }
 0x100   :  { %7396 = vmatprep.mubr.msk.f32.mxu0 %vm766_vm1, %v126_v31 }
 0x103   :  { %7397 = vmatmul.mubr.msk.f32.gmra.mxu0 %vm766_vm1, %v127_v32  ;;  %v1346_v32 = vld [vmem:[%s12070_s8 + $0x10] sm:$0xff] }
 0x104   :  { %7399 = vmatprep.mubr.msk.f32.mxu0 %vm766_vm1, %v128_v0 }
 0x107   :  { %7400 = vmatmul.mubr.msk.f32.gmra.mxu0 %vm766_vm1, %v129_v36 }
 0x108   :  { %7402 = vmatprep.mubr.msk.f32.mxu0 %vm766_vm1, %v130_v38 }
 0x10b   :  { %7403 = vmatmul.mubr.msk.f32.gmra.mxu0 %vm766_vm1, %v131_v42 }
 0x10c   :  { %7405 = vmatprep.mubr.msk.f32.mxu0 %vm766_vm1, %v132_v44 }
 0x10f   :  { %v9096_v13 = vpop.f32.mrf.mxu0  ;;  %7406 = vmatmul.mubr.msk.f32.gmra.mxu0 %vm766_vm1, %v133_v48 }
 0x110   :  { %7408 = vmatprep.mubr.msk.f32.mxu0 %vm766_vm1, %v134_v50 }
 0x111   :  { %v9104_v20 = vpop.f32.mrf.mxu0 }
 0x112   :  { %413 = vmatmul.mubr.f32.vlgmr.msra.gmra.mxu1 %v9104_v20 }
 0x113   :  { %426 = vmatpush1.msra.mxu1 %v346_v25  ;;  %418 = vmatprep.mubr.f32.mxu1 %v12090_v6 }
 0x114   :  { %427 = vmatprep.subr.mxu1 %v343_v26  ;;  %7409 = vmatmul.mubr.msk.f32.gmra.mxu0 %vm766_vm1, %v135_v18 }
 0x115   :  { %428 = vmatpush1.msra.mxu1 %v342_v27  ;;  %7411 = vmatprep.mubr.msk.f32.mxu0 %vm766_vm1, %v136_v56  ;;  %v286_v27 = vld [vmem:[%s12135_s25 + $0x10] sm:$0xff] }
 0x116   :  { %429 = vmatprep.subr.mxu1 %v339_v29  ;;  %419 = vmatmul.mubr.f32.gmra.mxu1 %v9096_v13 }
 0x117   :  { %430 = vmatpush1.msra.mxu1 %v338_v15  ;;  %489 = vmatprep.mubr.f32.mxu1 %v12090_v6 }
 0x118   :  { %431 = vmatprep.subr.mxu1 %v335_v9  ;;  %7412 = vmatmul.mubr.msk.f32.gmra.mxu0 %vm766_vm1, %v137_v22  ;;  %v1347_v9 = vld [vmem:[%s12070_s8 + $0x18] sm:$0xff] }
 0x119   :  { %432 = vmatpush1.msra.mxu1 %v334_v4  ;;  %7414 = vmatprep.mubr.msk.f32.mxu0 %vm766_vm1, %v138_v3 }
 0x11a   :  { %433 = vmatprep.subr.mxu1 %v331_v2  ;;  %v140_v2 = vld [vmem:[%s12137_s5 + $0x1a0] sm:$0xff] }
 0x11b   :  { %434 = vmatpush1.msra.mxu1 %v330_v33 }
 0x11c   :  { %435 = vmatprep.subr.mxu1 %v327_v34  ;;  %7415 = vmatmul.mubr.msk.f32.gmra.mxu0 %vm766_vm1, %v139_v28  ;;  %v141_v34 = vld [vmem:[%s12137_s5 + $0x1a8] sm:$0xff] }
 0x11d   :  { %436 = vmatpush1.msra.mxu1 %v326_v35  ;;  %7417 = vmatprep.mubr.msk.f32.mxu0 %vm766_vm1, %v140_v2 }
 0x11e   :  { %437 = vmatprep.subr.mxu1 %v323_v37  ;;  %v1345_v37 = vld [vmem:[%s12070_s8 + $0x8] sm:$0xff] }
 0x11f   :  { %438 = vmatpush1.msra.mxu1 %v322_v39 }
 0x120   :  { %439 = vmatprep.subr.mxu1 %v319_v40  ;;  %v1344_v40 = vld [vmem:[%s12070_s8] sm:$0xff]  ;;  %7418 = vmatmul.mubr.msk.f32.gmra.mxu0 %vm766_vm1, %v141_v34 }
 0x121   :  { %440 = vmatpush1.msra.mxu1 %v318_v41 }
 0x122   :  { %441 = vmatprep.subr.mxu1 %v315_v43  ;;  %v143_v43 = vld [vmem:[%s12137_s5 + $0x1b8] sm:$0xff] }
 0x123   :  { %442 = vmatpush1.msra.mxu1 %v314_v11 }
 0x124   :  { %443 = vmatprep.subr.mxu1 %v311_v12 }
 0x125   :  { %444 = vmatpush1.msra.mxu1 %v310_v47 }
 0x126   :  { %445 = vmatprep.subr.mxu1 %v307_v49 }
 0x127   :  { %446 = vmatpush1.msra.mxu1 %v306_v51 }
 0x128   :  { %447 = vmatprep.subr.mxu1 %v303_v52  ;;  %v9296_v52 = vld [vmem:[%s12138_s1] ss:$0 sm:$0xff] }
 0x129   :  { %448 = vmatpush1.msra.mxu1 %v302_v17 }
 0x12a   :  { %449 = vmatprep.subr.mxu1 %v299_v55  ;;  %v601_v59 = vpop.xlane.xlu0 %600 }
 0x12b   :  { %v647_v23 = vmul.f32 0.03125, %v601_v59  ;;  %450 = vmatpush1.msra.mxu1 %v298_v57 }
 0x12c   :  { %451 = vmatprep.subr.mxu1 %v295_v58  ;;  %v9302_v58 = vld [vmem:[%s12139_s26] ss:$0 sm:$0xff] }
 0x12d   :  { %v663_v10 = vadd.f32 1e-05, %v647_v23  ;;  %452 = vmatpush1.msra.mxu1 %v294_v60 }
 0x12e   :  { %453 = vmatprep.subr.mxu1 %v291_v63  ;;  %v604_v25 = vpop.xlane.xlu1 %603  ;;  %v607_v26 = vpop.xlane.xlu0 %606 }
 0x12f   :  { %8066 = vrsqrt.f32 %v663_v10  ;;  %v648_v29 = vmul.f32 0.03125, %v604_v25  ;;  %v649_v15 = vmul.f32 0.03125, %v607_v26  ;;  %454 = vmatpush1.msra.mxu1 %v290_v8 }
 0x130   :  { %455 = vmatprep.subr.mxu1 %v287_v14 }
 0x131   :  { %v664_v31 = vadd.f32 1e-05, %v648_v29  ;;  %v665_v4 = vadd.f32 1e-05, %v649_v15  ;;  %456 = vmatpush1.msra.mxu1 %v286_v27 }
 0x132   :  { %490 = vmatmul.mubr.f32.vlgmr.msra.gmra.mxu1 %v9104_v20  ;;  %v610_v0 = vpop.xlane.xlu1 %609  ;;  %v613_v33 = vpop.xlane.xlu0 %612  ;;  %7435 = vmatprep.subr.mxu1 %v1347_v9  ;;  %v142_v20 = vld [vmem:[%s12137_s5 + $0x1b0] sm:$0xff] }
 0x133   :  { %8068 = vrsqrt.f32 %v664_v31  ;;  %v650_v35 = vmul.f32 0.03125, %v610_v0  ;;  %v651_v36 = vmul.f32 0.03125, %v613_v33  ;;  %495 = vmatprep.mubr.f32.mxu1 %v12090_v6  ;;  %7436 = vmatpush3.msra.mxu1 %v1347_v9 }
 0x134   :  { %8070 = vrsqrt.f32 %v665_v4  ;;  %7437 = vmatprep.subr.mxu1 %v1346_v32  ;;  %7420 = vmatprep.mubr.msk.f32.mxu0 %vm766_vm1, %v142_v20 }
 0x135   :  { %v666_v38 = vadd.f32 1e-05, %v650_v35  ;;  %v667_v39 = vadd.f32 1e-05, %v651_v36  ;;  %7438 = vmatpush3.msra.mxu1 %v1346_v32  ;;  %7421 = vmatmul.mubr.msk.f32.gmra.mxu0 %vm766_vm1, %v143_v43 }
 0x136   :  { %496 = vmatmul.mubr.f32.gmra.mxu1 %v9096_v13  ;;  %v616_v41 = vpop.xlane.xlu1 %615  ;;  %v619_v42 = vpop.xlane.xlu0 %618  ;;  %7439 = vmatprep.subr.mxu1 %v1345_v37 }
 0x137   :  { %8072 = vrsqrt.f32 %v666_v38  ;;  %v652_v44 = vmul.f32 0.03125, %v616_v41  ;;  %v653_v11 = vmul.f32 0.03125, %v619_v42  ;;  %7440 = vmatpush3.msra.mxu1 %v1345_v37 }
 0x138   :  { %8074 = vrsqrt.f32 %v667_v39  ;;  %7441 = vmatprep.subr.mxu1 %v1344_v40 }
 0x139   :  { %v668_v12 = vadd.f32 1e-05, %v652_v44  ;;  %v669_v47 = vadd.f32 1e-05, %v653_v11  ;;  %7442 = vmatpush3.msra.mxu1 %v1344_v40 }
 0x13a   :  { %v622_v13 = vpop.xlane.xlu1 %621  ;;  %v625_v48 = vpop.xlane.xlu0 %624 }
 0x13b   :  { %8076 = vrsqrt.f32 %v668_v12  ;;  %v654_v49 = vmul.f32 0.03125, %v622_v13  ;;  %v655_v50 = vmul.f32 0.03125, %v625_v48 }
 0x13c   :  { %v8067_v51 = vpop.eup %8066  ;;  %8078 = vrsqrt.f32 %v669_v47 }
 0x13d   :  { %v670_v17 = vadd.f32 1e-05, %v654_v49  ;;  %v671_v18 = vadd.f32 1e-05, %v655_v50  ;;  %v695_v55 = vmul.f32 %v8067_v51, %v8860_v16 }
 0x13e   :  { %v628_v56 = vpop.xlane.xlu1 %627  ;;  %v631_v57 = vpop.xlane.xlu0 %630 }
 0x13f   :  { %8080 = vrsqrt.f32 %v670_v17  ;;  %v656_v59 = vmul.f32 0.03125, %v628_v56  ;;  %v657_v60 = vmul.f32 0.03125, %v631_v57  ;;  %v718_v22 = vmul.f32 %v9296_v52, %v695_v55 }
 0x140   :  { %v8069_v23 = vpop.eup %8068  ;;  %8082 = vrsqrt.f32 %v671_v18 }
 0x141   :  { %v8071_v63 = vpop.eup %8070  ;;  %v696_v3 = vmul.f32 %v8069_v23, %v8870_v30  ;;  %v672_v8 = vadd.f32 1e-05, %v656_v59  ;;  %v673_v10 = vadd.f32 1e-05, %v657_v60  ;;  %v9307_v16 = vadd.f32 %v9302_v58, %v718_v22 }
 0x142   :  { %v634_v14 = vpop.xlane.xlu1 %633  ;;  %v637_v25 = vpop.xlane.xlu0 %636  ;;  %v697_v26 = vmul.f32 %v8071_v63, %v8863_v19 }
 0x143   :  { %v719_v27 = vmul.f32 %v9296_v52, %v696_v3  ;;  %8084 = vrsqrt.f32 %v672_v8  ;;  %v658_v28 = vmul.f32 0.03125, %v634_v14  ;;  %v659_v29 = vmul.f32 0.03125, %v637_v25  ;;  %7443 = vmatprep.mubr.msk.f32.mxu1 %vm154_vm0, %v9307_v16 }
 0x144   :  { %v8073_v15 = vpop.eup %8072  ;;  %8086 = vrsqrt.f32 %v673_v10  ;;  %v720_v30 = vmul.f32 %v9296_v52, %v697_v26 }
 0x145   :  { %v8075_v9 = vpop.eup %8074  ;;  %v674_v31 = vadd.f32 1e-05, %v658_v28  ;;  %v675_v4 = vadd.f32 1e-05, %v659_v29  ;;  %v9315_v32 = vadd.f32 %v9302_v58, %v719_v27  ;;  %v698_v19 = vmul.f32 %v8073_v15, %v8874_v1 }
 0x146   :  { %v640_v2 = vpop.xlane.xlu1 %639  ;;  %v546_v0 = vpop.xlane.xlu0 %545  ;;  %v9319_v33 = vadd.f32 %v9302_v58, %v720_v30  ;;  %v699_v34 = vmul.f32 %v8075_v9, %v8882_v5  ;;  %v8426_v5 = vld [vmem:[%s12133_s29 + $0x70] sm:$0xff] }
 0x147   :  { %8088 = vrsqrt.f32 %v674_v31  ;;  %v660_v35 = vmul.f32 0.03125, %v640_v2  ;;  %v565_v36 = vmul.f32 0.03125, %v546_v0  ;;  %7444 = vmatmul.mubr.msk.f32.vlgmr.msra.gmra.mxu1 %vm154_vm0, %v9315_v32  ;;  %v721_v37 = vmul.f32 %v9296_v52, %v698_v19  ;;  %v1550_v19 = vld [vmem:[%s12072_s10 + $0x10] sm:$0xff]  ;;  %v1549_v2 = vld [vmem:[%s12072_s10 + $0x8] sm:$0xff]  ;;  %v1548_v0 = vld [vmem:[%s12072_s10] sm:$0xff] }
 0x148   :  { %v8077_v20 = vpop.eup %8076  ;;  %8090 = vrsqrt.f32 %v675_v4  ;;  %7446 = vmatprep.mubr.msk.f32.mxu1 %vm154_vm0, %v9319_v33  ;;  %v722_v1 = vmul.f32 %v9296_v52, %v699_v34 }
 0x149   :  { %v8079_v38 = vpop.eup %8078  ;;  %v676_v39 = vadd.f32 1e-05, %v660_v35  ;;  %v9331_v40 = vsub.f32 %v8426_v5, %v565_v36  ;;  %v9334_v41 = vadd.f32 %v9302_v58, %v721_v37  ;;  %v700_v42 = vmul.f32 %v8077_v20, %v8886_v7  ;;  %v144_v37 = vld [vmem:[%s12137_s5 + $0x1c0] sm:$0xff]  ;;  %v145_v20 = vld [vmem:[%s12137_s5 + $0x1c8] sm:$0xff] }
 0x14a   :  { %v549_v43 = vpop.xlane.xlu1 %548  ;;  %v9338_v44 = vadd.f32 %v9302_v58, %v722_v1  ;;  %v701_v11 = vmul.f32 %v8079_v38, %v8894_v45  ;;  %v8427_v45 = vld [vmem:[%s12133_s29 + $0x78] sm:$0xff]  ;;  %7423 = vmatprep.mubr.msk.f32.mxu0 %vm766_vm1, %v144_v37 }
 0x14b   :  { %8092 = vrsqrt.f32 %v676_v39  ;;  %v566_v12 = vmul.f32 0.03125, %v549_v43  ;;  %7447 = vmatmul.mubr.msk.f32.gmra.mxu1 %vm154_vm0, %v9334_v41  ;;  %v597_v47 = vmul.f32 %v9331_v40, %v9331_v40  ;;  %v723_v13 = vmul.f32 %v9296_v52, %v700_v42  ;;  %7424 = vmatmul.mubr.msk.f32.gmra.mxu0 %vm766_vm1, %v145_v20  ;;  %v146_v39 = vld [vmem:[%s12137_s5 + $0x1d0] sm:$0xff]  ;;  %v147_v42 = vld [vmem:[%s12137_s5 + $0x1d8] sm:$0xff] }
 0x14c   :  { %v8081_v48 = vpop.eup %8080  ;;  %7449 = vmatprep.mubr.msk.f32.mxu1 %vm154_vm0, %v9338_v44  ;;  %v724_v7 = vmul.f32 %v9296_v52, %v701_v11  ;;  %7426 = vmatprep.mubr.msk.f32.mxu0 %vm766_vm1, %v146_v39  ;;  %v148_v11 = vld [vmem:[%s12137_s5 + $0x1e0] sm:$0xff] }
 0x14d   :  { %v8083_v49 = vpop.eup %8082  ;;  %v9352_v50 = vsub.f32 %v8427_v45, %v566_v12  ;;  %v641_v51 = vsel %vm154_vm0, %v597_v47, 0.0  ;;  %v9356_v17 = vadd.f32 %v9302_v58, %v723_v13  ;;  %v702_v18 = vmul.f32 %v8081_v48, %v8898_v46  ;;  %v149_v47 = vld [vmem:[%s12137_s5 + $0x1e8] sm:$0xff]  ;;  %v150_v48 = vld [vmem:[%s12137_s5 + $0x1f0] sm:$0xff] }
 0x14e   :  { %642 = vadd.xlane.f32.xlu0 %v641_v51  ;;  %v9360_v55 = vadd.f32 %v9302_v58, %v724_v7  ;;  %v703_v56 = vmul.f32 %v8083_v49, %v8906_v53  ;;  %v151_v49 = vld [vmem:[%s12137_s5 + $0x1f8] sm:$0xff] }
 0x14f   :  { %7450 = vmatmul.mubr.msk.f32.gmra.mxu1 %vm154_vm0, %v9356_v17  ;;  %v598_v57 = vmul.f32 %v9352_v50, %v9352_v50  ;;  %v725_v59 = vmul.f32 %v9296_v52, %v702_v18  ;;  %7427 = vmatmul.mubr.msk.f32.gmra.mxu0 %vm766_vm1, %v147_v42 }
 0x150   :  { %v8085_v60 = vpop.eup %8084  ;;  %7452 = vmatprep.mubr.msk.f32.mxu1 %vm154_vm0, %v9360_v55  ;;  %v726_v46 = vmul.f32 %v9296_v52, %v703_v56  ;;  %7429 = vmatprep.mubr.msk.f32.mxu0 %vm766_vm1, %v148_v11 }
 0x151   :  { %v8087_v22 = vpop.eup %8086  ;;  %v644_v23 = vsel %vm154_vm0, %v598_v57, 0.0  ;;  %v9373_v63 = vadd.f32 %v9302_v58, %v725_v59  ;;  %v704_v53 = vmul.f32 %v8085_v60, %v8910_v54 }
 0x152   :  { %645 = vadd.xlane.f32.xlu1 %v644_v23  ;;  %v9377_v3 = vadd.f32 %v9302_v58, %v726_v46  ;;  %v705_v8 = vmul.f32 %v8087_v22, %v8918_v61  ;;  %v9498_v46 = vld [vmem:[%s12069_s7] ss:$0 sm:$0xff] }
 0x153   :  { %7453 = vmatmul.mubr.msk.f32.gmra.mxu1 %vm154_vm0, %v9373_v63  ;;  %v727_v10 = vmul.f32 %v9296_v52, %v704_v53  ;;  %7430 = vmatmul.mubr.msk.f32.gmra.mxu0 %vm766_vm1, %v149_v47 }
 0x154   :  { %v8089_v14 = vpop.eup %8088  ;;  %7455 = vmatprep.mubr.msk.f32.mxu1 %vm154_vm0, %v9377_v3  ;;  %v728_v25 = vmul.f32 %v9296_v52, %v705_v8  ;;  %7432 = vmatprep.mubr.msk.f32.mxu0 %vm766_vm1, %v150_v48 }
 0x155   :  { %v8091_v26 = vpop.eup %8090  ;;  %v9387_v54 = vadd.f32 %v9302_v58, %v727_v10  ;;  %v706_v27 = vmul.f32 %v8089_v14, %v8922_v62 }
 0x156   :  { %v9391_v28 = vadd.f32 %v9302_v58, %v728_v25  ;;  %v707_v61 = vmul.f32 %v8091_v26, %v8930_v21 }
 0x157   :  { %7456 = vmatmul.mubr.msk.f32.gmra.mxu1 %vm154_vm0, %v9387_v54  ;;  %v729_v29 = vmul.f32 %v9296_v52, %v706_v27  ;;  %7433 = vmatmul.mubr.msk.f32.gmra.mxu0 %vm766_vm1, %v151_v49 }
 0x158   :  { %v8093_v15 = vpop.eup %8092  ;;  %7458 = vmatprep.mubr.msk.f32.mxu1 %vm154_vm0, %v9391_v28  ;;  %v730_v30 = vmul.f32 %v9296_v52, %v707_v61 }
 0x159   :  { %v9401_v9 = vadd.f32 %v9302_v58, %v729_v29  ;;  %v708_v62 = vmul.f32 %v8093_v15, %v8934_v24  ;;  %v1551_v24 = vld [vmem:[%s12072_s10 + $0x18] sm:$0xff] }
 0x15a   :  { %v9405_v31 = vadd.f32 %v9302_v58, %v730_v30  ;;  %7467 = vmatprep.subr.mxu1 %v1551_v24 }
 0x15b   :  { %7459 = vmatmul.mubr.msk.f32.gmra.mxu1 %vm154_vm0, %v9401_v9  ;;  %v731_v21 = vmul.f32 %v9296_v52, %v708_v62 }
 0x15c   :  { %7461 = vmatprep.mubr.msk.f32.mxu1 %vm154_vm0, %v9405_v31  ;;  %7468 = vmatpush3.msra.mxu1 %v1551_v24 }
 0x15d   :  { %v9413_v4 = vadd.f32 %v9302_v58, %v731_v21  ;;  %7469 = vmatprep.subr.mxu1 %v1550_v19 }
 0x15e   :  { %7470 = vmatpush3.msra.mxu1 %v1550_v19 }
 0x15f   :  { %7462 = vmatmul.mubr.msk.f32.gmra.mxu1 %vm154_vm0, %v9413_v4  ;;  %7471 = vmatprep.subr.mxu1 %v1549_v2 }
 0x160   :  { %7472 = vmatpush3.msra.mxu1 %v1549_v2 }
 0x161   :  { %7473 = vmatprep.subr.mxu1 %v1548_v0 }
 0x162   :  { %7474 = vmatpush3.msra.mxu1 %v1548_v0 }
 0x177   :  { %v9429_v34 = vpop.f32.mrf.mxu0 }
 0x179   :  { %v9431_v35 = vpop.f32.mrf.mxu0 }
 0x17b   :  { %v9433_v36 = vpop.f32.mrf.mxu0 }
 0x17d   :  { %v9441_v1 = vpop.f32.mrf.mxu0 }
 0x17f   :  { %v9445_v38 = vpop.f32.mrf.mxu0 }
 0x181   :  { %v9450_v5 = vpop.f32.mrf.mxu0 }
 0x183   :  { %v9457_v43 = vpop.f32.mrf.mxu0 }
 0x185   :  { %v9462_v12 = vpop.f32.mrf.mxu0 }
 0x187   :  { %v9469_v13 = vpop.f32.mrf.mxu0 }
 0x189   :  { %v9474_v7 = vpop.f32.mrf.mxu0 }
 0x18b   :  { %v9481_v45 = vpop.f32.mrf.mxu0 }
 0x18d   :  { %v9483_v51 = vpop.f32.mrf.mxu0 }
 0x18f   :  { %v9485_v18 = vpop.f32.mrf.mxu0 }
 0x191   :  { %v9487_v56 = vpop.f32.mrf.mxu0 }
 0x193   :  { %v9489_v57 = vpop.f32.mrf.mxu0 }
 0x195   :  { %v9491_v59 = vpop.f32.mrf.mxu0 }
 0x197   :  { %v9493_v60 = vpop.f32.mrf.mxu0 }
 0x199   :  { %v1105_v22 = vpop.f32.mrf.mxu0 }
 0x19a   :  { %v1106_v23 = vadd.f32 %v9498_v46, %v1105_v22 }
 0x19b   :  { %v9502_v27 = vpop.f32.mrf.mxu0 }
 0x19c   :  { %7571 = vmatprep.mubr.msk.f32.mxu0 %vm154_vm0, %v1106_v23 }
 0x19d   :  { %v9504_v61 = vpop.f32.mrf.mxu0 }
 0x19f   :  { %v9506_v29 = vpop.f32.mrf.mxu0 }
 0x1a1   :  { %v9512_v24 = vpop.f32.mrf.mxu0 }
 0x1a3   :  { %v9520_v39 = vpop.f32.mrf.mxu0 }
 0x1a5   :  { %v9526_v11 = vpop.f32.mrf.mxu0 }
 0x1a7   :  { %v9534_v47 = vpop.f32.mrf.mxu0 }
 0x1d2   :  { %v9509_v62 = vpop.f32.mrf.mxu1 }
 0x1d3   :  { %12140 = vst [vmem:[#allocation5_spill] sm:$0xff] %v9509_v62 }
 0x1d4   :  { %v9516_v37 = vpop.f32.mrf.mxu1 }
 0x1d5   :  { %12141 = vst [vmem:[#allocation6_spill] sm:$0xff] %v9516_v37 }
 0x1d6   :  { %v9523_v42 = vpop.f32.mrf.mxu1 }
 0x1d7   :  { %v643_v53 = vpop.xlane.xlu0 %642  ;;  %12142 = vst [vmem:[#allocation7_spill] sm:$0xff] %v9523_v42 }
 0x1d8   :  { %v661_v8 = vmul.f32 0.03125, %v643_v53 }
 0x1da   :  { %v677_v10 = vadd.f32 1e-05, %v661_v8 }
 0x1db   :  { %v646_v14 = vpop.xlane.xlu1 %645 }
 0x1dc   :  { %8094 = vrsqrt.f32 %v677_v10  ;;  %v662_v25 = vmul.f32 0.03125, %v646_v14  ;;  %v9602_v14 = vld [vmem:[%s12074_s12 + $0x28] sm:$0xff] }
 0x1de   :  { %v678_v26 = vadd.f32 1e-05, %v662_v25 }
 0x1e0   :  { %8096 = vrsqrt.f32 %v678_v26 }
 0x1e9   :  { %v8095_v15 = vpop.eup %8094 }
 0x1ea   :  { %v709_v30 = vmul.f32 %v8095_v15, %v9331_v40 }
 0x1ec   :  { %v732_v21 = vmul.f32 %v9296_v52, %v709_v30  ;;  %v9616_v30 = vld [vmem:[%s12074_s12 + $0x20] sm:$0xff] }
 0x1ed   :  { %v8097_v19 = vpop.eup %8096 }
 0x1ee   :  { %v755_v2 = vadd.f32 %v9302_v58, %v732_v21  ;;  %v710_v0 = vmul.f32 %v8097_v19, %v9352_v50  ;;  %v9530_v50 = vpop.f32.mrf.mxu1  ;;  %v1026_v19 = vadd.f32 %v9498_v46, %v9431_v35 }
 0x1ef   :  { %12143 = vst [vmem:[#allocation8_spill] sm:$0xff] %v9530_v50 }
 0x1f0   :  { %7464 = vmatprep.mubr.msk.f32.mxu1 %vm154_vm0, %v755_v2  ;;  %v733_v20 = vmul.f32 %v9296_v52, %v710_v0 }
 0x1f2   :  { %v756_v40 = vadd.f32 %v9302_v58, %v733_v20  ;;  %v9536_v52 = vpop.f32.mrf.mxu1  ;;  %v9542_v58 = vpop.f32.mrf.mxu0 }
 0x1f3   :  { %12144 = vst [vmem:[#allocation9_spill] sm:$0xff] %v9536_v52 }
 0x1f4   :  { %7465 = vmatmul.mubr.msk.f32.gmra.mxu1 %vm154_vm0, %v756_v40  ;;  %v9544_v48 = vpop.f32.mrf.mxu1 }
 0x1f5   :  { %7475 = vmatprep.mubr.msk.f32.mxu1 %vm154_vm0, %v9307_v16  ;;  %12145 = vst [vmem:[#allocation10_spill] sm:$0xff] %v9544_v48  ;;  %v9550_v16 = vpop.f32.mrf.mxu0 }
 0x1f8   :  { %7476 = vmatmul.mubr.msk.f32.vlgmr.msra.gmra.mxu1 %vm154_vm0, %v9315_v32  ;;  %v9552_v32 = vpop.f32.mrf.mxu1 }
 0x1f9   :  { %7478 = vmatprep.mubr.msk.f32.mxu1 %vm154_vm0, %v9319_v33  ;;  %12146 = vst [vmem:[#allocation11_spill] sm:$0xff] %v9552_v32  ;;  %v9558_v33 = vpop.f32.mrf.mxu0 }
 0x1fb   :  { %v9577_v49 = vpop.f32.mrf.mxu0 }
 0x1fc   :  { %7479 = vmatmul.mubr.msk.f32.gmra.mxu1 %vm154_vm0, %v9334_v41  ;;  %v9560_v41 = vpop.f32.mrf.mxu1 }
 0x1fd   :  { %7481 = vmatprep.mubr.msk.f32.mxu1 %vm154_vm0, %v9338_v44  ;;  %12147 = vst [vmem:[#allocation12_spill] sm:$0xff] %v9560_v41  ;;  %v9567_v44 = vld [vmem:[%s12071_s9] ss:$0 sm:$0xff]  ;;  %v9592_v10 = vpop.f32.mrf.mxu0 }
 0x1ff   :  { %v9609_v15 = vpop.f32.mrf.mxu0 }
 0x200   :  { %7482 = vmatmul.mubr.msk.f32.gmra.mxu1 %vm154_vm0, %v9356_v17 }
 0x201   :  { %7484 = vmatprep.mubr.msk.f32.mxu1 %vm154_vm0, %v9360_v55  ;;  %v9572_v55 = vld [vmem:[%s12074_s12 + $0x38] sm:$0xff]  ;;  %v9630_v20 = vpop.f32.mrf.mxu0 }
 0x204   :  { %7485 = vmatmul.mubr.msk.f32.gmra.mxu1 %vm154_vm0, %v9373_v63 }
 0x205   :  { %7487 = vmatprep.mubr.msk.f32.mxu1 %vm154_vm0, %v9377_v3  ;;  %v9584_v3 = vld [vmem:[%s12074_s12 + $0x30] sm:$0xff] }
 0x207   :  { %v7445_v17 = vpop.f32.mrf.mxu1 }
 0x208   :  { %v1475_v63 = vadd.f32 %v7445_v17, %v9567_v44  ;;  %7488 = vmatmul.mubr.msk.f32.gmra.mxu1 %vm154_vm0, %v9387_v54  ;;  %v9637_v17 = vld [vmem:[%s12074_s12 + $0x18] sm:$0xff] }
 0x209   :  { %v1469_v22 = vpop.f32.mrf.mxu1  ;;  %7490 = vmatprep.mubr.msk.f32.mxu1 %vm154_vm0, %v9391_v28 }
 0x20a   :  { %v1470_v23 = vadd.f32 %v9567_v44, %v1469_v22  ;;  %v1719_v53 = vmul.f32 %v9572_v55, %v1475_v63  ;;  %v1717_v26 = vmul.f32 %v9602_v14, %v1475_v63  ;;  %v1715_v35 = vmul.f32 %v9637_v17, %v1475_v63 }
 0x20b   :  { %v7448_v8 = vpop.f32.mrf.mxu1 }
 0x20c   :  { %7491 = vmatmul.mubr.msk.f32.gmra.mxu1 %vm154_vm0, %v9401_v9  ;;  %7499 = vmatprep.subr.msk.mxu1 %vm154_vm0, %v1719_v53  ;;  %v1718_v54 = vmul.f32 %v9584_v3, %v1470_v23 }
 0x20d   :  { %v9594_v28 = vpop.f32.mrf.mxu1  ;;  %7493 = vmatprep.mubr.msk.f32.mxu1 %vm154_vm0, %v9405_v31  ;;  %7500 = vmatpush3.xpose.msk.msra.mxu1 %vm154_vm0, %v1719_v53  ;;  %v9650_v53 = vld [vmem:[%s12074_s12 + $0x10] sm:$0xff] }
 0x20e   :  { %7501 = vmatprep.subr.msk.mxu1 %vm154_vm0, %v1718_v54 }
 0x20f   :  { %v7451_v9 = vpop.f32.mrf.mxu1 }
 0x210   :  { %v1495_v25 = vadd.f32 %v7451_v9, %v9567_v44  ;;  %7494 = vmatmul.mubr.msk.f32.gmra.mxu1 %vm154_vm0, %v9413_v4 }
 0x211   :  { %v1489_v31 = vpop.f32.mrf.mxu1  ;;  %7496 = vmatprep.mubr.msk.f32.mxu1 %vm154_vm0, %v755_v2  ;;  %7502 = vmatpush3.xpose.msk.msra.mxu1 %vm154_vm0, %v1718_v54  ;;  %v1716_v2 = vmul.f32 %v9616_v30, %v1470_v23  ;;  %v1714_v54 = vmul.f32 %v9650_v53, %v1470_v23 }
 0x212   :  { %v9619_v21 = vadd.f32 %v9567_v44, %v1489_v31  ;;  %7503 = vmatprep.subr.msk.mxu1 %vm154_vm0, %v1717_v26  ;;  %v1735_v4 = vmul.f32 %v9572_v55, %v1495_v25  ;;  %v1733_v22 = vmul.f32 %v9602_v14, %v1495_v25  ;;  %v9664_v31 = vld [vmem:[%s12074_s12 + $0x8] sm:$0xff] }
 0x214   :  { %7497 = vmatmul.mubr.msk.f32.gmra.mxu1 %vm154_vm0, %v756_v40  ;;  %7555 = vmatprep.subr.msk.mxu0 %vm154_vm0, %v1735_v4  ;;  %v1734_v0 = vmul.f32 %v9584_v3, %v9619_v21  ;;  %v9643_v40 = vpop.f32.mrf.mxu0  ;;  %v1730_v6 = vmul.f32 %v9650_v53, %v9619_v21 }
 0x215   :  { %7504 = vmatpush3.xpose.msk.msra.mxu1 %vm154_vm0, %v1717_v26  ;;  %7515 = vmatprep.mubr.msk.f32.mxu1 %vm154_vm0, %v1026_v19  ;;  %v1732_v26 = vmul.f32 %v9616_v30, %v9619_v21 }
 0x216   :  { %7556 = vmatpush3.xpose.msk.msra.mxu0 %vm154_vm0, %v1735_v4  ;;  %7505 = vmatprep.subr.msk.mxu1 %vm154_vm0, %v1716_v2  ;;  %v9656_v9 = vpop.f32.mrf.mxu0  ;;  %v1713_v4 = vmul.f32 %v9664_v31, %v1475_v63  ;;  %v9685_v63 = vadd.f32 %v7448_v8, %v9567_v44  ;;  %v9700_v8 = vadd.f32 %v9567_v44, %v9594_v28 }
 0x217   :  { %7557 = vmatprep.subr.msk.mxu0 %vm154_vm0, %v1734_v0  ;;  %v1036_v28 = vadd.f32 %v9498_v46, %v9441_v1  ;;  %v1046_v1 = vadd.f32 %v9498_v46, %v9450_v5  ;;  %v1051_v5 = vadd.f32 %v9445_v38, %v9498_v46 }
 0x218   :  { %v9670_v19 = vpop.f32.mrf.mxu0 }
 0x219   :  { %7506 = vmatpush3.xpose.msk.msra.mxu1 %vm154_vm0, %v1716_v2  ;;  %v1731_v2 = vmul.f32 %v9637_v17, %v1495_v25 }
 0x21a   :  { %7558 = vmatpush3.xpose.msk.msra.mxu0 %vm154_vm0, %v1734_v0  ;;  %7507 = vmatprep.subr.msk.mxu1 %vm154_vm0, %v1715_v35  ;;  %v9677_v0 = vld [vmem:[%s12074_s12] sm:$0xff] }
 0x21b   :  { %7559 = vmatprep.subr.msk.mxu0 %vm154_vm0, %v1733_v22 }
 0x21d   :  { %7508 = vmatpush3.xpose.msk.msra.mxu1 %vm154_vm0, %v1715_v35  ;;  %v9679_v35 = vpop.f32.mrf.mxu1 }
 0x21e   :  { %7560 = vmatpush3.xpose.msk.msra.mxu0 %vm154_vm0, %v1733_v22  ;;  %7509 = vmatprep.subr.msk.mxu1 %vm154_vm0, %v1714_v54  ;;  %v1712_v22 = vmul.f32 %v9677_v0, %v1470_v23  ;;  %v1727_v23 = vmul.f32 %v9572_v55, %v9685_v63 }
 0x21f   :  { %7561 = vmatprep.subr.msk.mxu0 %vm154_vm0, %v1732_v26  ;;  %v9693_v41 = vpop.f32.mrf.mxu1 }
 0x221   :  { %7510 = vmatpush3.xpose.msk.msra.mxu1 %vm154_vm0, %v1714_v54  ;;  %v9688_v54 = vpop.f32.mrf.mxu0  ;;  %v7457_v32 = vpop.f32.mrf.mxu1 }
 0x222   :  { %7562 = vmatpush3.xpose.msk.msra.mxu0 %vm154_vm0, %v1732_v26  ;;  %7511 = vmatprep.subr.msk.mxu1 %vm154_vm0, %v1713_v4 }
 0x223   :  { %7563 = vmatprep.subr.msk.mxu0 %vm154_vm0, %v1731_v2  ;;  %v9704_v26 = vpop.f32.mrf.mxu0 }
 0x225   :  { %7512 = vmatpush3.xpose.msk.msra.mxu1 %vm154_vm0, %v1713_v4  ;;  %v1729_v4 = vmul.f32 %v9664_v31, %v1495_v25  ;;  %v9718_v48 = vpop.f32.mrf.mxu0  ;;  %v9721_v25 = vadd.f32 %v7457_v32, %v9567_v44  ;;  %v1725_v32 = vmul.f32 %v9602_v14, %v9685_v63 }
 0x226   :  { %7564 = vmatpush3.xpose.msk.msra.mxu0 %vm154_vm0, %v1731_v2  ;;  %7513 = vmatprep.subr.msk.mxu1 %vm154_vm0, %v1712_v22  ;;  %v1031_v2 = vadd.f32 %v9429_v34, %v9498_v46  ;;  %v1041_v34 = vadd.f32 %v9433_v36, %v9498_v46 }
 0x227   :  { %7565 = vmatprep.subr.msk.mxu0 %vm154_vm0, %v1730_v6  ;;  %v1751_v36 = vmul.f32 %v9572_v55, %v9721_v25 }
 0x229   :  { %7514 = vmatpush3.xpose.msk.msra.mxu1 %vm154_vm0, %v1712_v22  ;;  %v1726_v22 = vmul.f32 %v9584_v3, %v9700_v8 }
 0x22a   :  { %7566 = vmatpush3.xpose.msk.msra.mxu0 %vm154_vm0, %v1730_v6  ;;  %7527 = vmatprep.subr.msk.mxu1 %vm154_vm0, %v1727_v23  ;;  %v1728_v6 = vmul.f32 %v9677_v0, %v9619_v21 }
 0x22b   :  { %7567 = vmatprep.subr.msk.mxu0 %vm154_vm0, %v1729_v4 }
 0x22c   :  { %7516 = vmatmul.mubr.msk.f32.vlgmr.msra.gmra.mxu1 %vm154_vm0, %v1031_v2  ;;  %v1509_v2 = vpop.f32.mrf.mxu1 }
 0x22d   :  { %7518 = vmatprep.mubr.msk.f32.mxu1 %vm154_vm0, %v1036_v28  ;;  %7528 = vmatpush3.xpose.msk.msra.mxu1 %vm154_vm0, %v1727_v23  ;;  %v9737_v23 = vpop.f32.mrf.mxu0  ;;  %v9746_v21 = vadd.f32 %v9567_v44, %v1509_v2  ;;  %v1056_v28 = vadd.f32 %v9498_v46, %v9462_v12  ;;  %v1126_v12 = vadd.f32 %v9498_v46, %v9512_v24 }
 0x22e   :  { %7568 = vmatpush3.xpose.msk.msra.mxu0 %vm154_vm0, %v1729_v4  ;;  %7529 = vmatprep.subr.msk.mxu1 %vm154_vm0, %v1726_v22  ;;  %v1116_v4 = vadd.f32 %v9498_v46, %v9504_v61  ;;  %v1724_v61 = vmul.f32 %v9616_v30, %v9700_v8  ;;  %v1749_v24 = vmul.f32 %v9602_v14, %v9721_v25 }
 0x22f   :  { %7569 = vmatprep.subr.msk.mxu0 %vm154_vm0, %v1728_v6  ;;  %v9758_v38 = vpop.f32.mrf.mxu0  ;;  %v1131_v2 = vadd.f32 %v9506_v29, %v9498_v46  ;;  %v1748_v29 = vmul.f32 %v9616_v30, %v9746_v21 }
 0x230   :  { %7519 = vmatmul.mubr.msk.f32.gmra.mxu1 %vm154_vm0, %v1041_v34  ;;  %v1066_v34 = vadd.f32 %v9498_v46, %v9474_v7  ;;  %v1723_v7 = vmul.f32 %v9637_v17, %v9685_v63 }
 0x231   :  { %7521 = vmatprep.mubr.msk.f32.mxu1 %vm154_vm0, %v1046_v1  ;;  %7530 = vmatpush3.xpose.msk.msra.mxu1 %vm154_vm0, %v1726_v22  ;;  %v1111_v22 = vadd.f32 %v9493_v60, %v9498_v46  ;;  %v1750_v60 = vmul.f32 %v9584_v3, %v9746_v21  ;;  %v1121_v1 = vadd.f32 %v9502_v27, %v9498_v46 }
 0x232   :  { %7570 = vmatpush3.xpose.msk.msra.mxu0 %vm154_vm0, %v1728_v6  ;;  %7531 = vmatprep.subr.msk.mxu1 %vm154_vm0, %v1725_v32  ;;  %v1061_v6 = vadd.f32 %v9457_v43, %v9498_v46  ;;  %v9780_v43 = vpop.f32.mrf.mxu0  ;;  %v1136_v27 = vadd.f32 %v9498_v46, %v9526_v11  ;;  %v1186_v11 = vadd.f32 %v9498_v46, %v9656_v9 }
 0x233   :  { %7611 = vmatprep.subr.msk.mxu0 %vm154_vm0, %v1751_v36  ;;  %v1747_v9 = vmul.f32 %v9637_v17, %v9721_v25 }
 0x234   :  { %7522 = vmatmul.mubr.msk.f32.gmra.mxu1 %vm154_vm0, %v1051_v5  ;;  %v1141_v5 = vadd.f32 %v9520_v39, %v9498_v46  ;;  %v9822_v39 = vpop.f32.mrf.mxu1 }
 0x235   :  { %7572 = vmatmul.mubr.msk.f32.vlgmr.msra.gmra.mxu0 %vm154_vm0, %v1111_v22  ;;  %7524 = vmatprep.mubr.msk.f32.mxu1 %vm154_vm0, %v1056_v28  ;;  %v1721_v28 = vmul.f32 %v9664_v31, %v9685_v63  ;;  %v9831_v63 = vadd.f32 %v9679_v35, %v9567_v44  ;;  %v9847_v35 = vadd.f32 %v9567_v44, %v9693_v41 }
 0x236   :  { %7532 = vmatpush3.xpose.msk.msra.mxu1 %vm154_vm0, %v1725_v32  ;;  %7574 = vmatprep.mubr.msk.f32.mxu0 %vm154_vm0, %v1116_v4  ;;  %v9797_v32 = vpop.f32.mrf.mxu0  ;;  %v1076_v41 = vadd.f32 %v9498_v46, %v9483_v51  ;;  %v1081_v51 = vadd.f32 %v9481_v45, %v9498_v46 }
 0x237   :  { %7612 = vmatpush3.xpose.msk.msra.mxu0 %vm154_vm0, %v1751_v36  ;;  %7533 = vmatprep.subr.msk.mxu1 %vm154_vm0, %v1724_v61  ;;  %v1722_v36 = vmul.f32 %v9650_v53, %v9700_v8 }
 0x238   :  { %7613 = vmatprep.subr.msk.mxu0 %vm154_vm0, %v1750_v60  ;;  %7525 = vmatmul.mubr.msk.f32.gmra.mxu1 %vm154_vm0, %v1061_v6  ;;  %v9813_v4 = vpop.f32.mrf.mxu0  ;;  %v1746_v6 = vmul.f32 %v9650_v53, %v9746_v21 }
 0x239   :  { %7575 = vmatmul.mubr.msk.f32.gmra.mxu0 %vm154_vm0, %v1121_v1  ;;  %7543 = vmatprep.mubr.msk.f32.mxu1 %vm154_vm0, %v1066_v34  ;;  %v1745_v34 = vmul.f32 %v9664_v31, %v9721_v25  ;;  %v1071_v1 = vadd.f32 %v9469_v13, %v9498_v46  ;;  %v1742_v25 = vmul.f32 %v9584_v3, %v9847_v35 }
 0x23a   :  { %7534 = vmatpush3.xpose.msk.msra.mxu1 %vm154_vm0, %v1724_v61  ;;  %7577 = vmatprep.mubr.msk.f32.mxu0 %vm154_vm0, %v1126_v12  ;;  %v9827_v22 = vpop.f32.mrf.mxu0  ;;  %v1720_v61 = vmul.f32 %v9677_v0, %v9700_v8  ;;  %v9838_v12 = vpop.f32.mrf.mxu1  ;;  %v1743_v8 = vmul.f32 %v9572_v55, %v9831_v63  ;;  %v1744_v13 = vmul.f32 %v9677_v0, %v9746_v21 }
 0x23b   :  { %7614 = vmatpush3.xpose.msk.msra.mxu0 %vm154_vm0, %v1750_v60  ;;  %7535 = vmatprep.subr.msk.mxu1 %vm154_vm0, %v1723_v7  ;;  %v1741_v21 = vmul.f32 %v9602_v14, %v9831_v63 }
 0x23c   :  { %7615 = vmatprep.subr.msk.mxu0 %vm154_vm0, %v1749_v24  ;;  %v9843_v60 = vpop.f32.mrf.mxu0 }
 0x23d   :  { %7578 = vmatmul.mubr.msk.f32.gmra.mxu0 %vm154_vm0, %v1131_v2 }
 0x23e   :  { %7536 = vmatpush3.xpose.msk.msra.mxu1 %vm154_vm0, %v1723_v7  ;;  %7580 = vmatprep.mubr.msk.f32.mxu0 %vm154_vm0, %v1136_v27  ;;  %v7463_v7 = vpop.f32.mrf.mxu1  ;;  %v9861_v27 = vpop.f32.mrf.mxu0 }
 0x23f   :  { %7616 = vmatpush3.xpose.msk.msra.mxu0 %vm154_vm0, %v1749_v24  ;;  %7537 = vmatprep.subr.msk.mxu1 %vm154_vm0, %v1722_v36  ;;  %v9867_v24 = vadd.f32 %v7463_v7, %v9567_v44  ;;  %v1738_v7 = vmul.f32 %v9650_v53, %v9847_v35 }
 0x240   :  { %7617 = vmatprep.subr.msk.mxu0 %vm154_vm0, %v1748_v29  ;;  %v1529_v2 = vpop.f32.mrf.mxu1 }
 0x241   :  { %7581 = vmatmul.mubr.msk.f32.gmra.mxu0 %vm154_vm0, %v1141_v5  ;;  %v1767_v45 = vmul.f32 %v9572_v55, %v9867_v24  ;;  %v1196_v5 = vadd.f32 %v9498_v46, %v9688_v54  ;;  %v1101_v54 = vadd.f32 %v9489_v57, %v9498_v46 }
 0x242   :  { %7538 = vmatpush3.xpose.msk.msra.mxu1 %vm154_vm0, %v1722_v36  ;;  %7627 = vmatprep.mubr.msk.f32.mxu0 %vm154_vm0, %v1186_v11  ;;  %v1086_v36 = vadd.f32 %v9498_v46, %v9487_v56  ;;  %v9890_v11 = vadd.f32 %v9567_v44, %v1529_v2  ;;  %v1091_v56 = vadd.f32 %v9485_v18, %v9498_v46 }
 0x243   :  { %7618 = vmatpush3.xpose.msk.msra.mxu0 %vm154_vm0, %v1748_v29  ;;  %7539 = vmatprep.subr.msk.mxu1 %vm154_vm0, %v1721_v28  ;;  %v9880_v29 = vpop.f32.mrf.mxu0  ;;  %v1740_v18 = vmul.f32 %v9616_v30, %v9847_v35 }
 0x244   :  { %7619 = vmatprep.subr.msk.mxu0 %vm154_vm0, %v1747_v9  ;;  %v1762_v2 = vmul.f32 %v9650_v53, %v9890_v11 }
 0x246   :  { %7540 = vmatpush3.xpose.msk.msra.mxu1 %vm154_vm0, %v1721_v28  ;;  %v1096_v28 = vadd.f32 %v9498_v46, %v9491_v59  ;;  %v1206_v59 = vadd.f32 %v9498_v46, %v9718_v48  ;;  %v1216_v48 = vadd.f32 %v9498_v46, %v9758_v38  ;;  %v1764_v38 = vmul.f32 %v9616_v30, %v9890_v11 }
 0x247   :  { %7620 = vmatpush3.xpose.msk.msra.mxu0 %vm154_vm0, %v1747_v9  ;;  %7541 = vmatprep.subr.msk.mxu1 %vm154_vm0, %v1720_v61  ;;  %v1191_v9 = vadd.f32 %v9643_v40, %v9498_v46  ;;  %v1766_v40 = vmul.f32 %v9584_v3, %v9890_v11 }
 0x248   :  { %7621 = vmatprep.subr.msk.mxu0 %vm154_vm0, %v1746_v6 }
 0x24a   :  { %7542 = vmatpush3.xpose.msk.msra.mxu1 %vm154_vm0, %v1720_v61  ;;  %v9903_v61 = vpop.f32.mrf.mxu0 }
 0x24b   :  { %7622 = vmatpush3.xpose.msk.msra.mxu0 %vm154_vm0, %v1746_v6  ;;  %7583 = vmatprep.subr.msk.mxu1 %vm154_vm0, %v1743_v8  ;;  %v1146_v6 = vadd.f32 %v9498_v46, %v9542_v58  ;;  %v1739_v58 = vmul.f32 %v9637_v17, %v9831_v63 }
 0x24c   :  { %7623 = vmatprep.subr.msk.mxu0 %vm154_vm0, %v1745_v34  ;;  %v9924_v57 = vpop.f32.mrf.mxu0 }
 0x24d   :  { %7544 = vmatmul.mubr.msk.f32.vlgmr.msra.gmra.mxu1 %vm154_vm0, %v1071_v1 }
 0x24e   :  { %7546 = vmatprep.mubr.msk.f32.mxu1 %vm154_vm0, %v1076_v41  ;;  %7584 = vmatpush3.xpose.msk.msra.mxu1 %vm154_vm0, %v1743_v8  ;;  %v1201_v8 = vadd.f32 %v9670_v19, %v9498_v46  ;;  %v1765_v19 = vmul.f32 %v9602_v14, %v9867_v24  ;;  %v1265_v1 = vpop.f32.mrf.mxu0  ;;  %v1221_v41 = vadd.f32 %v9737_v23, %v9498_v46 }
 0x24f   :  { %7624 = vmatpush3.xpose.msk.msra.mxu0 %vm154_vm0, %v1745_v34  ;;  %7585 = vmatprep.subr.msk.mxu1 %vm154_vm0, %v1742_v25  ;;  %v1211_v34 = vadd.f32 %v9704_v26, %v9498_v46  ;;  %v1266_v26 = vadd.f32 %v9498_v46, %v1265_v1  ;;  %v1231_v1 = vadd.f32 %v9780_v43, %v9498_v46 }
 0x250   :  { %7625 = vmatprep.subr.msk.mxu0 %vm154_vm0, %v1744_v13  ;;  %v7416_v23 = vpop.f32.mrf.mxu0  ;;  %v1251_v43 = vadd.f32 %v9843_v60, %v9498_v46 }
 0x251   :  { %7547 = vmatmul.mubr.msk.f32.gmra.mxu1 %vm154_vm0, %v1081_v51  ;;  %v9968_v51 = vadd.f32 %v9822_v39, %v9567_v44 }
 0x252   :  { %7549 = vmatprep.mubr.msk.f32.mxu1 %vm154_vm0, %v1086_v36  ;;  %7586 = vmatpush3.xpose.msk.msra.mxu1 %vm154_vm0, %v1742_v25  ;;  %v1737_v25 = vmul.f32 %v9664_v31, %v9831_v63  ;;  %v1736_v63 = vmul.f32 %v9677_v0, %v9847_v35  ;;  %v1275_v36 = vpop.f32.mrf.mxu0  ;;  %v1761_v35 = vmul.f32 %v9664_v31, %v9867_v24 }
 0x253   :  { %7626 = vmatpush3.xpose.msk.msra.mxu0 %vm154_vm0, %v1744_v13  ;;  %7587 = vmatprep.subr.msk.mxu1 %vm154_vm0, %v1741_v21  ;;  %v1763_v13 = vmul.f32 %v9637_v17, %v9867_v24  ;;  %v1759_v39 = vmul.f32 %v9572_v55, %v9968_v51  ;;  %v1161_v24 = vadd.f32 %v9550_v16, %v9498_v46 }
 0x254   :  { %7667 = vmatprep.subr.msk.mxu0 %vm154_vm0, %v1767_v45  ;;  %v1171_v16 = vadd.f32 %v9577_v49, %v9498_v46 }
 0x255   :  { %7550 = vmatmul.mubr.msk.f32.gmra.mxu1 %vm154_vm0, %v1091_v56  ;;  %v1156_v56 = vadd.f32 %v9498_v46, %v9558_v33  ;;  %v1166_v33 = vadd.f32 %v9498_v46, %v9592_v10  ;;  %v1176_v10 = vadd.f32 %v9498_v46, %v9630_v20 }
 0x256   :  { %7628 = vmatmul.mubr.msk.f32.vlgmr.msra.gmra.mxu0 %vm154_vm0, %v1191_v9  ;;  %7552 = vmatprep.mubr.msk.f32.mxu1 %vm154_vm0, %v1096_v28  ;;  %v1757_v9 = vmul.f32 %v9602_v14, %v9968_v51 }
 0x257   :  { %7588 = vmatpush3.xpose.msk.msra.mxu1 %vm154_vm0, %v1741_v21  ;;  %7630 = vmatprep.mubr.msk.f32.mxu0 %vm154_vm0, %v1196_v5  ;;  %v9980_v21 = vadd.f32 %v9567_v44, %v9838_v12  ;;  %v7419_v12 = vpop.f32.mrf.mxu0 }
 0x258   :  { %7668 = vmatpush3.xpose.msk.msra.mxu0 %vm154_vm0, %v1767_v45  ;;  %7589 = vmatprep.subr.msk.mxu1 %vm154_vm0, %v1740_v18  ;;  %v1151_v45 = vadd.f32 %v9534_v47, %v9498_v46  ;;  %v1760_v47 = vmul.f32 %v9677_v0, %v9890_v11  ;;  %v1276_v11 = vadd.f32 %v9498_v46, %v1275_v36 }
 0x259   :  { %7669 = vmatprep.subr.msk.mxu0 %vm154_vm0, %v1766_v40  ;;  %7553 = vmatmul.mubr.msk.f32.gmra.mxu1 %vm154_vm0, %v1101_v54  ;;  %v1758_v5 = vmul.f32 %v9584_v3, %v9980_v21  ;;  %v1285_v28 = vpop.f32.mrf.mxu0  ;;  %v1756_v49 = vmul.f32 %v9616_v30, %v9980_v21 }
 0x25a   :  { %7631 = vmatmul.mubr.msk.f32.gmra.mxu0 %vm154_vm0, %v1201_v8  ;;  %7599 = vmatprep.mubr.msk.f32.mxu1 %vm154_vm0, %v1146_v6  ;;  %v1286_v20 = vadd.f32 %v9498_v46, %v1285_v28  ;;  %v1281_v6 = vadd.f32 %v7416_v23, %v9498_v46 }
 0x25b   :  { %7590 = vmatpush3.xpose.msk.msra.mxu1 %vm154_vm0, %v1740_v18  ;;  %7633 = vmatprep.mubr.msk.f32.mxu0 %vm154_vm0, %v1206_v59  ;;  %v1271_v18 = vadd.f32 %v9924_v57, %v9498_v46  ;;  %v7422_v54 = vpop.f32.mrf.mxu0  ;;  %v1181_v59 = vadd.f32 %v9609_v15, %v9498_v46  ;;  %v1755_v15 = vmul.f32 %v9637_v17, %v9968_v51 }
 0x25c   :  { %7670 = vmatpush3.xpose.msk.msra.mxu0 %vm154_vm0, %v1766_v40  ;;  %7591 = vmatprep.subr.msk.mxu1 %vm154_vm0, %v1739_v58  ;;  %v1226_v40 = vadd.f32 %v9498_v46, %v9797_v32  ;;  %v1291_v57 = vadd.f32 %v7419_v12, %v9498_v46 }
 0x25d   :  { %7671 = vmatprep.subr.msk.mxu0 %vm154_vm0, %v1765_v19  ;;  %v1295_v8 = vpop.f32.mrf.mxu0 }
 0x25e   :  { %7634 = vmatmul.mubr.msk.f32.gmra.mxu0 %vm154_vm0, %v1211_v34  ;;  %v1296_v32 = vadd.f32 %v9498_v46, %v1295_v8  ;;  %v1752_v34 = vmul.f32 %v9677_v0, %v9980_v21 }
 0x25f   :  { %7592 = vmatpush3.xpose.msk.msra.mxu1 %vm154_vm0, %v1739_v58  ;;  %7636 = vmatprep.mubr.msk.f32.mxu0 %vm154_vm0, %v1216_v48  ;;  %v1754_v58 = vmul.f32 %v9650_v53, %v9980_v21  ;;  %v1301_v48 = vadd.f32 %v7422_v54, %v9498_v46 }
 0x260   :  { %7672 = vmatpush3.xpose.msk.msra.mxu0 %vm154_vm0, %v1765_v19  ;;  %7593 = vmatprep.subr.msk.mxu1 %vm154_vm0, %v1738_v7  ;;  %v1753_v19 = vmul.f32 %v9664_v31, %v9968_v51 }
 0x261   :  { %7673 = vmatprep.subr.msk.mxu0 %vm154_vm0, %v1764_v38 }
 0x262   :  { %7637 = vmatmul.mubr.msk.f32.gmra.mxu0 %vm154_vm0, %v1221_v41  ;;  %v1246_v41 = vadd.f32 %v9498_v46, %v9861_v27  ;;  %v1261_v27 = vadd.f32 %v9880_v29, %v9498_v46 }
 0x263   :  { %7594 = vmatpush3.xpose.msk.msra.mxu1 %vm154_vm0, %v1738_v7  ;;  %7683 = vmatprep.mubr.msk.f32.mxu0 %vm154_vm0, %v1266_v26  ;;  %v1236_v7 = vadd.f32 %v9498_v46, %v9827_v22  ;;  %v10071_v26 = vpop.f32.mrf.mxu0 }
 0x264   :  { %7674 = vmatpush3.xpose.msk.msra.mxu0 %vm154_vm0, %v1764_v38  ;;  %7595 = vmatprep.subr.msk.mxu1 %vm154_vm0, %v1737_v25  ;;  %v1241_v38 = vadd.f32 %v9813_v4, %v9498_v46 }
 0x265   :  { %7675 = vmatprep.subr.msk.mxu0 %vm154_vm0, %v1763_v13  ;;  %v1305_v22 = vpop.f32.mrf.mxu0 }
 0x266   :  { %v1306_v4 = vadd.f32 %v9498_v46, %v1305_v22 }
 0x267   :  { %7596 = vmatpush3.xpose.msk.msra.mxu1 %vm154_vm0, %v1737_v25  ;;  %v1256_v25 = vadd.f32 %v9498_v46, %v9903_v61  ;;  %v10094_v61 = vld [vmem:[%s12073_s11] ss:$0 sm:$0xff] }
 0x268   :  { %7676 = vmatpush3.xpose.msk.msra.mxu0 %vm154_vm0, %v1763_v13  ;;  %7597 = vmatprep.subr.msk.mxu1 %vm154_vm0, %v1736_v63 }
 0x269   :  { %7677 = vmatprep.subr.msk.mxu0 %vm154_vm0, %v1762_v2 }
 0x26b   :  { %7598 = vmatpush3.xpose.msk.msra.mxu1 %vm154_vm0, %v1736_v63 }
 0x26c   :  { %7678 = vmatpush3.xpose.msk.msra.mxu0 %vm154_vm0, %v1762_v2  ;;  %7639 = vmatprep.subr.msk.mxu1 %vm154_vm0, %v1759_v39 }
 0x26d   :  { %7679 = vmatprep.subr.msk.mxu0 %vm154_vm0, %v1761_v35 }
 0x26e   :  { %7600 = vmatmul.mubr.msk.f32.vlgmr.msra.gmra.mxu1 %vm154_vm0, %v1151_v45 }
 0x26f   :  { %7602 = vmatprep.mubr.msk.f32.mxu1 %vm154_vm0, %v1156_v56  ;;  %7640 = vmatpush3.xpose.msk.msra.mxu1 %vm154_vm0, %v1759_v39 }
 0x270   :  { %7680 = vmatpush3.xpose.msk.msra.mxu0 %vm154_vm0, %v1761_v35  ;;  %7641 = vmatprep.subr.msk.mxu1 %vm154_vm0, %v1758_v5 }
 0x271   :  { %7681 = vmatprep.subr.msk.mxu0 %vm154_vm0, %v1760_v47 }
 0x272   :  { %7603 = vmatmul.mubr.msk.f32.gmra.mxu1 %vm154_vm0, %v1161_v24 }
 0x273   :  { %7605 = vmatprep.mubr.msk.f32.mxu1 %vm154_vm0, %v1166_v33  ;;  %7642 = vmatpush3.xpose.msk.msra.mxu1 %vm154_vm0, %v1758_v5 }
 0x274   :  { %7682 = vmatpush3.xpose.msk.msra.mxu0 %vm154_vm0, %v1760_v47  ;;  %7643 = vmatprep.subr.msk.mxu1 %vm154_vm0, %v1757_v9 }
 0x276   :  { %7606 = vmatmul.mubr.msk.f32.gmra.mxu1 %vm154_vm0, %v1171_v16 }
 0x277   :  { %7684 = vmatmul.mubr.msk.f32.vlgmr.msra.gmra.mxu0 %vm154_vm0, %v1271_v18  ;;  %7608 = vmatprep.mubr.msk.f32.mxu1 %vm154_vm0, %v1176_v10 }
 0x278   :  { %7644 = vmatpush3.xpose.msk.msra.mxu1 %vm154_vm0, %v1757_v9  ;;  %7686 = vmatprep.mubr.msk.f32.mxu0 %vm154_vm0, %v1276_v11 }
 0x279   :  { %7645 = vmatprep.subr.msk.mxu1 %vm154_vm0, %v1756_v49 }
 0x27a   :  { %7609 = vmatmul.mubr.msk.f32.gmra.mxu1 %vm154_vm0, %v1181_v59 }
 0x27b   :  { %7687 = vmatmul.mubr.msk.f32.gmra.mxu0 %vm154_vm0, %v1281_v6  ;;  %7655 = vmatprep.mubr.msk.f32.mxu1 %vm154_vm0, %v1226_v40  ;;  %v7428_v40 = vpop.f32.mrf.mxu0 }
 0x27c   :  { %7646 = vmatpush3.xpose.msk.msra.mxu1 %vm154_vm0, %v1756_v49  ;;  %7689 = vmatprep.mubr.msk.f32.mxu0 %vm154_vm0, %v1286_v20 }
 0x27d   :  { %7647 = vmatprep.subr.msk.mxu1 %vm154_vm0, %v1755_v15 }
 0x27f   :  { %7690 = vmatmul.mubr.msk.f32.gmra.mxu0 %vm154_vm0, %v1291_v57 }
 0x280   :  { %7648 = vmatpush3.xpose.msk.msra.mxu1 %vm154_vm0, %v1755_v15  ;;  %7692 = vmatprep.mubr.msk.f32.mxu0 %vm154_vm0, %v1296_v32 }
 0x281   :  { %7649 = vmatprep.subr.msk.mxu1 %vm154_vm0, %v1754_v58 }
 0x283   :  { %7693 = vmatmul.mubr.msk.f32.gmra.mxu0 %vm154_vm0, %v1301_v48 }
 0x284   :  { %7650 = vmatpush3.xpose.msk.msra.mxu1 %vm154_vm0, %v1754_v58 }
 0x285   :  { %7651 = vmatprep.subr.msk.mxu1 %vm154_vm0, %v1753_v19 }
 0x288   :  { %7652 = vmatpush3.xpose.msk.msra.mxu1 %vm154_vm0, %v1753_v19  ;;  %v1315_v19 = vpop.f32.mrf.mxu0 }
 0x289   :  { %7653 = vmatprep.subr.msk.mxu1 %vm154_vm0, %v1752_v34 }
 0x28c   :  { %7654 = vmatpush3.xpose.msk.msra.mxu1 %vm154_vm0, %v1752_v34 }
 0x28f   :  { %7656 = vmatmul.mubr.msk.f32.vlgmr.msra.gmra.mxu1 %vm154_vm0, %v1231_v1 }
 0x290   :  { %7658 = vmatprep.mubr.msk.f32.mxu1 %vm154_vm0, %v1236_v7 }
 0x293   :  { %7659 = vmatmul.mubr.msk.f32.gmra.mxu1 %vm154_vm0, %v1241_v38 }
 0x294   :  { %7661 = vmatprep.mubr.msk.f32.mxu1 %vm154_vm0, %v1246_v41 }
 0x297   :  { %7662 = vmatmul.mubr.msk.f32.gmra.mxu1 %vm154_vm0, %v1251_v43  ;;  %v7431_v43 = vpop.f32.mrf.mxu0 }
 0x298   :  { %7664 = vmatprep.mubr.msk.f32.mxu1 %vm154_vm0, %v1256_v25 }
 0x29b   :  { %7665 = vmatmul.mubr.msk.f32.gmra.mxu1 %vm154_vm0, %v1261_v27 }
 0x29c   :  { %7711 = vmatprep.mubr.msk.f32.mxu1 %vm154_vm0, %v1306_v4 }
 0x2b4   :  { %v7466_v13 = vpop.f32.mrf.mxu1 }
 0x2b5   :  { %v10089_v60 = vadd.f32 %v7466_v13, %v9567_v44 }
 0x2b6   :  { %v1539_v23 = vpop.f32.mrf.mxu1 }
 0x2b7   :  { %v10097_v51 = vadd.f32 %v9567_v44, %v1539_v23  ;;  %v1775_v29 = vmul.f32 %v9572_v55, %v10089_v60  ;;  %v1773_v45 = vmul.f32 %v9602_v14, %v10089_v60  ;;  %v1771_v10 = vmul.f32 %v9637_v17, %v10089_v60  ;;  %v1325_v23 = vpop.f32.mrf.mxu0 }
 0x2b8   :  { %v7477_v63 = vpop.f32.mrf.mxu1  ;;  %v1769_v7 = vmul.f32 %v9664_v31, %v10089_v60 }
 0x2b9   :  { %v1631_v2 = vadd.f32 %v7477_v63, %v10094_v61  ;;  %7695 = vmatprep.subr.msk.mxu1 %vm154_vm0, %v1775_v29  ;;  %v1774_v36 = vmul.f32 %v9584_v3, %v10097_v51  ;;  %v1772_v24 = vmul.f32 %v9616_v30, %v10097_v51  ;;  %v1770_v15 = vmul.f32 %v9650_v53, %v10097_v51 }
 0x2ba   :  { %v1625_v21 = vpop.f32.mrf.mxu1  ;;  %7696 = vmatpush3.xpose.msk.msra.mxu1 %vm154_vm0, %v1775_v29  ;;  %v1768_v27 = vmul.f32 %v9677_v0, %v10097_v51 }
 0x2bb   :  { %v1626_v39 = vadd.f32 %v10094_v61, %v1625_v21  ;;  %7697 = vmatprep.subr.msk.mxu1 %vm154_vm0, %v1774_v36  ;;  %v1783_v44 = vmul.f32 %v9572_v55, %v1631_v2  ;;  %v1781_v5 = vmul.f32 %v9602_v14, %v1631_v2  ;;  %v1779_v16 = vmul.f32 %v9637_v17, %v1631_v2 }
 0x2bc   :  { %v7480_v35 = vpop.f32.mrf.mxu1  ;;  %v1777_v20 = vmul.f32 %v9664_v31, %v1631_v2  ;;  %v1311_v2 = vadd.f32 %v10071_v26, %v9498_v46 }
 0x2bd   :  { %7723 = vmatprep.subr.mxu0 %v1783_v44  ;;  %v1782_v56 = vmul.f32 %v9584_v3, %v1626_v39  ;;  %v1780_v33 = vmul.f32 %v9616_v30, %v1626_v39  ;;  %v1778_v18 = vmul.f32 %v9650_v53, %v1626_v39  ;;  %v1776_v32 = vmul.f32 %v9677_v0, %v1626_v39 }
 0x2be   :  { %v10112_v12 = vpop.f32.mrf.mxu1  ;;  %7698 = vmatpush3.xpose.msk.msra.mxu1 %vm154_vm0, %v1774_v36  ;;  %7724 = vmatpush3.msra.mxu0 %v1783_v44  ;;  %v1641_v25 = vadd.f32 %v7480_v35, %v10094_v61  ;;  %v1316_v39 = vadd.f32 %v9498_v46, %v1315_v19  ;;  %v7434_v35 = vpop.f32.mrf.mxu0 }
 0x2bf   :  { %7699 = vmatprep.subr.msk.mxu1 %vm154_vm0, %v1773_v45  ;;  %7725 = vmatprep.subr.mxu0 %v1782_v56  ;;  %v1636_v63 = vadd.f32 %v10094_v61, %v10112_v12 }
 0x2c0   :  { %v7483_v47 = vpop.f32.mrf.mxu1  ;;  %7726 = vmatpush3.msra.mxu0 %v1782_v56  ;;  %v1791_v51 = vmul.f32 %v9572_v55, %v1641_v25  ;;  %v1326_v56 = vadd.f32 %v9498_v46, %v1325_v23  ;;  %v1789_v12 = vmul.f32 %v9602_v14, %v1641_v25  ;;  %v1787_v14 = vmul.f32 %v9637_v17, %v1641_v25 }
 0x2c1   :  { %7727 = vmatprep.subr.mxu0 %v1781_v5  ;;  %v10133_v49 = vadd.f32 %v7483_v47, %v10094_v61  ;;  %v1790_v26 = vmul.f32 %v9584_v3, %v1636_v63  ;;  %v1331_v47 = vadd.f32 %v7431_v43, %v9498_v46  ;;  %v8428_v3 = vld [vmem:[%s12069_s7] ss:$0 sm:$0xff]  ;;  %v1784_v17 = vmul.f32 %v9677_v0, %v1636_v63 }
 0x2c2   :  { %v1645_v28 = vpop.f32.mrf.mxu1  ;;  %7700 = vmatpush3.xpose.msk.msra.mxu1 %vm154_vm0, %v1773_v45  ;;  %7728 = vmatpush3.msra.mxu0 %v1781_v5  ;;  %v1321_v45 = vadd.f32 %v7428_v40, %v9498_v46  ;;  %v1335_v5 = vpop.f32.mrf.mxu0  ;;  %v1786_v46 = vmul.f32 %v9650_v53, %v1636_v63  ;;  %v10245_v40 = vld [vmem:[%s12075_s13 + $0x10] sm:$0xff] }
 0x2c3   :  { %v10122_v9 = vadd.f32 %v10094_v61, %v1645_v28  ;;  %7701 = vmatprep.subr.msk.mxu1 %vm154_vm0, %v1772_v24  ;;  %7729 = vmatprep.subr.mxu0 %v1780_v33  ;;  %v10153_v48 = vmul.f32 %v9572_v55, %v10133_v49  ;;  %v1341_v28 = vadd.f32 %v8428_v3, %v7434_v35 }
 0x2c4   :  { %v10126_v11 = vpop.f32.mrf.mxu1  ;;  %7730 = vmatpush3.msra.mxu0 %v1780_v33  ;;  %v1336_v33 = vadd.f32 %v8428_v3, %v1335_v5 }
 0x2c5   :  { %7731 = vmatprep.subr.mxu0 %v1779_v16 }
 0x2c6   :  { %v1655_v54 = vpop.f32.mrf.mxu1  ;;  %7702 = vmatpush3.xpose.msk.msra.mxu1 %vm154_vm0, %v1772_v24  ;;  %7732 = vmatpush3.msra.mxu0 %v1779_v16  ;;  %v1788_v24 = vmul.f32 %v9616_v30, %v1636_v63  ;;  %v10209_v30 = vadd.f32 %v10126_v11, %v10094_v61  ;;  %v1785_v16 = vmul.f32 %v9664_v31, %v1641_v25  ;;  %v10227_v11 = vld [vmem:[%s12075_s13] sm:$0xff] }
 0x2c7   :  { %v10136_v59 = vadd.f32 %v10094_v61, %v1655_v54  ;;  %7703 = vmatprep.subr.msk.mxu1 %vm154_vm0, %v1771_v10  ;;  %7733 = vmatprep.subr.mxu0 %v1778_v18 }
 0x2c8   :  { %v7489_v6 = vpop.f32.mrf.mxu1  ;;  %7734 = vmatpush3.msra.mxu0 %v1778_v18  ;;  %12153 = vst [vmem:[#allocation18_spill] sm:$0xff] %v10209_v30  ;;  %v10216_v53 = vmul.f32 %v9572_v55, %v10209_v30 }
 0x2c9   :  { %12148 = vst [vmem:[#allocation13_spill] sm:$0xff] %v10136_v59  ;;  %v10141_v8 = vadd.f32 %v7489_v6, %v10094_v61  ;;  %7735 = vmatprep.subr.mxu0 %v1777_v20 }
 0x2ca   :  { %v1665_v57 = vpop.f32.mrf.mxu1  ;;  %7704 = vmatpush3.xpose.msk.msra.mxu1 %vm154_vm0, %v1771_v10  ;;  %7736 = vmatpush3.msra.mxu0 %v1777_v20  ;;  %12154 = vst [vmem:[#allocation19_spill] sm:$0xff] %v10216_v53  ;;  %v10235_v10 = vld [vmem:[%s12075_s13 + $0x18] sm:$0xff] }
 0x2cb   :  { %v10148_v58 = vadd.f32 %v10094_v61, %v1665_v57  ;;  %7705 = vmatprep.subr.msk.mxu1 %vm154_vm0, %v1770_v15  ;;  %7737 = vmatprep.subr.mxu0 %v1776_v32  ;;  %v10255_v57 = vld [vmem:[%s12075_s13 + $0x28] sm:$0xff] }
 0x2cc   :  { %v7492_v34 = vpop.f32.mrf.mxu1  ;;  %7738 = vmatpush3.msra.mxu0 %v1776_v32 }
 0x2cd   :  { %v10156_v1 = vadd.f32 %v7492_v34, %v10094_v61  ;;  %7779 = vmatprep.subr.mxu0 %v10153_v48 }
 0x2ce   :  { %v1675_v38 = vpop.f32.mrf.mxu1  ;;  %7706 = vmatpush3.xpose.msk.msra.mxu1 %vm154_vm0, %v1770_v15 }
 0x2cf   :  { %12149 = vst [vmem:[#allocation14_spill] sm:$0xff] %v10156_v1  ;;  %v10163_v41 = vadd.f32 %v10094_v61, %v1675_v38  ;;  %7707 = vmatprep.subr.msk.mxu1 %vm154_vm0, %v1769_v7  ;;  %v10265_v38 = vld [vmem:[%s12075_s13 + $0x20] sm:$0xff] }
 0x2d0   :  { %v7495_v22 = vpop.f32.mrf.mxu1 }
 0x2d1   :  { %12150 = vst [vmem:[#allocation15_spill] sm:$0xff] %v10163_v41  ;;  %v10168_v4 = vadd.f32 %v7495_v22, %v10094_v61 }
 0x2d2   :  { %v1685_v13 = vpop.f32.mrf.mxu1  ;;  %7708 = vmatpush3.xpose.msk.msra.mxu1 %vm154_vm0, %v1769_v7 }
 0x2d3   :  { %v10174_v60 = vadd.f32 %v10094_v61, %v1685_v13  ;;  %7709 = vmatprep.subr.msk.mxu1 %vm154_vm0, %v1768_v27  ;;  %v10275_v13 = vld [vmem:[%s12075_s13 + $0x38] sm:$0xff] }
 0x2d4   :  { %v7498_v29 = vpop.f32.mrf.mxu1 }
 0x2d5   :  { %v10182_v36 = vadd.f32 %v7498_v29, %v10094_v61 }
 0x2d6   :  { %v1695_v21 = vpop.f32.mrf.mxu1  ;;  %7710 = vmatpush3.xpose.msk.msra.mxu1 %vm154_vm0, %v1768_v27 }
 0x2d7   :  { %12151 = vst [vmem:[#allocation16_spill] sm:$0xff] %v10182_v36  ;;  %v10188_v44 = vadd.f32 %v10094_v61, %v1695_v21  ;;  %7751 = vmatprep.subr.mxu1 %v1791_v51  ;;  %v10222_v61 = vld [vmem:[%s12075_s13 + $0x8] sm:$0xff] }
 0x2d9   :  { %12152 = vst [vmem:[#allocation17_spill] sm:$0xff] %v10188_v44  ;;  %7712 = vmatmul.mubr.msk.f32.vlgmr.msra.gmra.mxu1 %vm154_vm0, %v1311_v2 }
 0x2da   :  { %7752 = vmatpush3.msra.mxu1 %v1791_v51  ;;  %7714 = vmatprep.mubr.msk.f32.mxu1 %vm154_vm0, %v1316_v39  ;;  %v10285_v51 = vld [vmem:[%s12075_s13 + $0x30] sm:$0xff] }
 0x2db   :  { %7753 = vmatprep.subr.mxu1 %v1790_v26 }
 0x2dc   :  { %7754 = vmatpush3.msra.mxu1 %v1790_v26 }
 0x2dd   :  { %7715 = vmatmul.mubr.msk.f32.gmra.mxu1 %vm154_vm0, %v1321_v45  ;;  %7755 = vmatprep.subr.mxu1 %v1789_v12 }
 0x2de   :  { %7756 = vmatpush3.msra.mxu1 %v1789_v12  ;;  %7717 = vmatprep.mubr.msk.f32.mxu1 %vm154_vm0, %v1326_v56 }
 0x2df   :  { %7757 = vmatprep.subr.mxu1 %v1788_v24 }
 0x2e0   :  { %7758 = vmatpush3.msra.mxu1 %v1788_v24 }
 0x2e1   :  { %7718 = vmatmul.mubr.msk.f32.gmra.mxu1 %vm154_vm0, %v1331_v47  ;;  %7759 = vmatprep.subr.mxu1 %v1787_v14 }
 0x2e2   :  { %7760 = vmatpush3.msra.mxu1 %v1787_v14  ;;  %7720 = vmatprep.mubr.msk.f32.mxu1 %vm154_vm0, %v1336_v33 }
 0x2e3   :  { %7761 = vmatprep.subr.mxu1 %v1786_v46 }
 0x2e4   :  { %7762 = vmatpush3.msra.mxu1 %v1786_v46 }
 0x2e5   :  { %7721 = vmatmul.mubr.msk.f32.gmra.mxu1 %vm154_vm0, %v1341_v28  ;;  %7763 = vmatprep.subr.mxu1 %v1785_v16 }
 0x2e6   :  { %7764 = vmatpush3.msra.mxu1 %v1785_v16 }
 0x2e7   :  { %7765 = vmatprep.subr.mxu1 %v1784_v17 }
 0x2e8   :  { %7766 = vmatpush3.msra.mxu1 %v1784_v17 }
 0x2e9   :  { %7807 = vmatprep.subr.mxu1 %v10216_v53 }
 0x2ec   :  { %v7517_v31 = vpop.f32.mrf.mxu1 }
 0x2ed   :  { %v10230_v0 = vadd.f32 %v7517_v31, %v10222_v61 }
 0x2ee   :  { %v1962_v55 = vpop.f32.mrf.mxu1 }
 0x2ef   :  { %v10238_v18 = vadd.f32 %v1962_v55, %v10227_v11  ;;  %v3076_v54 = vsel %vm3072_vm2, %v10230_v0, -inf }
 0x2f0   :  { %3077 = vmax.xlane.f32.xlu1 %v3076_v54  ;;  %v7520_v20 = vpop.f32.mrf.mxu1 }
 0x2f1   :  { %v10248_v6 = vadd.f32 %v7520_v20, %v10235_v10  ;;  %v3073_v15 = vsel %vm3072_vm2, %v10238_v18, -inf }
 0x2f2   :  { %v1972_v32 = vpop.f32.mrf.mxu1  ;;  %3074 = vmax.xlane.f32.xlu0 %v3073_v15 }
 0x2f3   :  { %v10258_v19 = vadd.f32 %v1972_v32, %v10245_v40  ;;  %v3082_v34 = vsel %vm3072_vm2, %v10248_v6, -inf }
 0x2f4   :  { %3083 = vmax.xlane.f32.xlu1 %v3082_v34  ;;  %v7523_v7 = vpop.f32.mrf.mxu1 }
 0x2f5   :  { %v7573_v43 = vpop.f32.mrf.mxu0  ;;  %v10268_v22 = vadd.f32 %v7523_v7, %v10255_v57  ;;  %v3079_v25 = vsel %vm3072_vm2, %v10258_v19, -inf }
 0x2f6   :  { %v1982_v27 = vpop.f32.mrf.mxu1  ;;  %3080 = vmax.xlane.f32.xlu0 %v3079_v25  ;;  %v10293_v26 = vadd.f32 %v7573_v43, %v10222_v61 }
 0x2f7   :  { %v10278_v23 = vadd.f32 %v1982_v27, %v10265_v38  ;;  %v2268_v29 = vpop.f32.mrf.mxu0  ;;  %v3088_v63 = vsel %vm3072_vm2, %v10268_v22, -inf }
 0x2f8   :  { %3089 = vmax.xlane.f32.xlu1 %v3088_v63  ;;  %v7526_v2 = vpop.f32.mrf.mxu1  ;;  %v10301_v47 = vadd.f32 %v2268_v29, %v10227_v11  ;;  %v3124_v28 = vsel %vm3072_vm2, %v10293_v26, -inf }
 0x2f9   :  { %v7576_v21 = vpop.f32.mrf.mxu0  ;;  %v10288_v39 = vadd.f32 %v7526_v2, %v10275_v13  ;;  %v3085_v35 = vsel %vm3072_vm2, %v10278_v23, -inf }
 0x2fa   :  { %v1992_v45 = vpop.f32.mrf.mxu1  ;;  %3086 = vmax.xlane.f32.xlu0 %v3085_v35  ;;  %v10306_v33 = vadd.f32 %v7576_v21, %v10235_v10  ;;  %v3121_v16 = vsel %vm3072_vm2, %v10301_v47, -inf }
 0x2fb   :  { %v10296_v56 = vadd.f32 %v1992_v45, %v10285_v51  ;;  %v2278_v12 = vpop.f32.mrf.mxu0  ;;  %v3094_v5 = vsel %vm3072_vm2, %v10288_v39, -inf }
 0x2fc   :  { %3095 = vmax.xlane.f32.xlu1 %v3094_v5  ;;  %v10311_v46 = vadd.f32 %v2278_v12, %v10245_v40  ;;  %v3130_v55 = vsel %vm3072_vm2, %v10306_v33, -inf }
 0x2fd   :  { %v7579_v24 = vpop.f32.mrf.mxu0  ;;  %v3091_v3 = vsel %vm3072_vm2, %v10296_v56, -inf }
 0x2fe   :  { %3092 = vmax.xlane.f32.xlu0 %v3091_v3  ;;  %v10316_v31 = vadd.f32 %v7579_v24, %v10255_v57  ;;  %v3127_v20 = vsel %vm3072_vm2, %v10311_v46, -inf }
 0x2ff   :  { %v2288_v14 = vpop.f32.mrf.mxu0 }
 0x300   :  { %3125 = vmax.xlane.f32.xlu1 %v3124_v28  ;;  %v10321_v54 = vadd.f32 %v2288_v14, %v10265_v38  ;;  %v3136_v34 = vsel %vm3072_vm2, %v10316_v31, -inf }
 0x301   :  { %v7582_v17 = vpop.f32.mrf.mxu0 }
 0x302   :  { %3122 = vmax.xlane.f32.xlu0 %v3121_v16  ;;  %v10326_v32 = vadd.f32 %v7582_v17, %v10275_v13  ;;  %v3133_v43 = vsel %vm3072_vm2, %v10321_v54, -inf }
 0x303   :  { %v2298_v15 = vpop.f32.mrf.mxu0 }
 0x304   :  { %3131 = vmax.xlane.f32.xlu1 %v3130_v55  ;;  %v10331_v7 = vadd.f32 %v2298_v15, %v10285_v51  ;;  %v3142_v25 = vsel %vm3072_vm2, %v10326_v32, -inf }
 0x306   :  { %3128 = vmax.xlane.f32.xlu0 %v3127_v20  ;;  %v3139_v27 = vsel %vm3072_vm2, %v10331_v7, -inf }
 0x308   :  { %3137 = vmax.xlane.f32.xlu1 %v3136_v34 }
 0x30a   :  { %3134 = vmax.xlane.f32.xlu0 %v3133_v43 }
 0x30c   :  { %3143 = vmax.xlane.f32.xlu1 %v3142_v25 }
 0x30d   :  { %v10342_v21 = vpop.f32.mrf.mxu1 }
 0x30e   :  { %3140 = vmax.xlane.f32.xlu0 %v3139_v27 }
 0x30f   :  { %v10354_v14 = vpop.f32.mrf.mxu1 }
 0x311   :  { %v7548_v34 = vpop.f32.mrf.mxu1 }
 0x316   :  { %v7629_v29 = vpop.f32.mrf.mxu0 }
 0x317   :  { %v10340_v63 = vadd.f32 %v7629_v29, %v10222_v61 }
 0x318   :  { %v2574_v2 = vpop.f32.mrf.mxu0 }
 0x319   :  { %v10345_v35 = vadd.f32 %v2574_v2, %v10227_v11  ;;  %v3172_v45 = vsel %vm3072_vm2, %v10340_v63, -inf }
 0x31a   :  { %v7632_v12 = vpop.f32.mrf.mxu0  ;;  %3173 = vmax.xlane.f32.xlu1 %v3172_v45 }
 0x31b   :  { %v10350_v5 = vadd.f32 %v7632_v12, %v10235_v10  ;;  %v3169_v24 = vsel %vm3072_vm2, %v10345_v35, -inf  ;;  %v2125_v12 = vpop.f32.mrf.mxu1 }
 0x31c   :  { %v2584_v3 = vpop.f32.mrf.mxu0  ;;  %3170 = vmax.xlane.f32.xlu0 %v3169_v24 }
 0x31d   :  { %v10357_v28 = vadd.f32 %v2584_v3, %v10245_v40  ;;  %v3178_v16 = vsel %vm3072_vm2, %v10350_v5, -inf }
 0x31e   :  { %v7635_v17 = vpop.f32.mrf.mxu0  ;;  %3179 = vmax.xlane.f32.xlu1 %v3178_v16 }
 0x31f   :  { %v10362_v55 = vadd.f32 %v7635_v17, %v10255_v57  ;;  %v3175_v20 = vsel %vm3072_vm2, %v10357_v28, -inf  ;;  %v7551_v17 = vpop.f32.mrf.mxu1 }
 0x320   :  { %v2594_v15 = vpop.f32.mrf.mxu0  ;;  %3176 = vmax.xlane.f32.xlu0 %v3175_v20 }
 0x321   :  { %v10367_v43 = vadd.f32 %v2594_v15, %v10265_v38  ;;  %v3184_v25 = vsel %vm3072_vm2, %v10362_v55, -inf  ;;  %v2135_v20 = vpop.f32.mrf.mxu1 }
 0x322   :  { %v7638_v27 = vpop.f32.mrf.mxu0  ;;  %3185 = vmax.xlane.f32.xlu1 %v3184_v25 }
 0x323   :  { %v10372_v29 = vadd.f32 %v7638_v27, %v10275_v13  ;;  %v3181_v2 = vsel %vm3072_vm2, %v10367_v43, -inf  ;;  %v7554_v15 = vpop.f32.mrf.mxu1 }
 0x324   :  { %v2604_v45 = vpop.f32.mrf.mxu0  ;;  %3182 = vmax.xlane.f32.xlu0 %v3181_v2 }
 0x325   :  { %v10377_v24 = vadd.f32 %v2604_v45, %v10285_v51  ;;  %v3190_v3 = vsel %vm3072_vm2, %v10372_v29, -inf  ;;  %v2145_v25 = vpop.f32.mrf.mxu1 }
 0x326   :  { %3191 = vmax.xlane.f32.xlu1 %v3190_v3 }
 0x327   :  { %v3187_v16 = vsel %vm3072_vm2, %v10377_v24, -inf }
 0x328   :  { %3188 = vmax.xlane.f32.xlu0 %v3187_v16 }
 0x32e   :  { %v7601_v27 = vpop.f32.mrf.mxu1 }
 0x330   :  { %v2421_v42 = vpop.f32.mrf.mxu1 }
 0x332   :  { %v7604_v36 = vpop.f32.mrf.mxu1 }
 0x337   :  { %v7685_v52 = vpop.f32.mrf.mxu0 }
 0x338   :  { %v10384_v2 = vadd.f32 %v7685_v52, %v10222_v61 }
 0x339   :  { %v2880_v50 = vpop.f32.mrf.mxu0 }
 0x33a   :  { %v10387_v45 = vadd.f32 %v2880_v50, %v10227_v11  ;;  %v3220_v3 = vsel %vm3072_vm2, %v10384_v2, -inf }
 0x33b   :  { %v7688_v37 = vpop.f32.mrf.mxu0  ;;  %3221 = vmax.xlane.f32.xlu1 %v3220_v3 }
 0x33c   :  { %v10392_v16 = vadd.f32 %v7688_v37, %v10235_v10  ;;  %v3217_v62 = vsel %vm3072_vm2, %v10387_v45, -inf }
 0x33d   :  { %v2890_v44 = vpop.f32.mrf.mxu0  ;;  %3218 = vmax.xlane.f32.xlu0 %v3217_v62 }
 0x33e   :  { %v10397_v52 = vadd.f32 %v2890_v44, %v10245_v40  ;;  %v3226_v50 = vsel %vm3072_vm2, %v10392_v16, -inf  ;;  %v2431_v44 = vpop.f32.mrf.mxu1 }
 0x33f   :  { %v7691_v41 = vpop.f32.mrf.mxu0  ;;  %3227 = vmax.xlane.f32.xlu1 %v3226_v50 }
 0x340   :  { %12155 = vst [vmem:[#allocation20_spill] sm:$0xff] %v10397_v52  ;;  %v10402_v1 = vadd.f32 %v7691_v41, %v10255_v57  ;;  %v3223_v37 = vsel %vm3072_vm2, %v10397_v52, -inf  ;;  %v7607_v52 = vpop.f32.mrf.mxu1 }
 0x341   :  { %v2900_v3 = vpop.f32.mrf.mxu0  ;;  %3224 = vmax.xlane.f32.xlu0 %v3223_v37  ;;  %v10418_v37 = vadd.f32 %v10342_v21, %v10222_v61 }
 0x342   :  { %12156 = vst [vmem:[#allocation21_spill] sm:$0xff] %v10402_v1  ;;  %v10407_v30 = vadd.f32 %v2900_v3, %v10265_v38  ;;  %v3232_v62 = vsel %vm3072_vm2, %v10402_v1, -inf }
 0x343   :  { %v7694_v53 = vpop.f32.mrf.mxu0  ;;  %3233 = vmax.xlane.f32.xlu1 %v3232_v62  ;;  %v3100_v21 = vsel %vm3072_vm2, %v10418_v37, -inf }
 0x344   :  { %v10412_v59 = vadd.f32 %v7694_v53, %v10275_v13  ;;  %v3229_v41 = vsel %vm3072_vm2, %v10407_v30, -inf  ;;  %v10427_v53 = vadd.f32 %v10354_v14, %v10227_v11  ;;  %v10442_v14 = vadd.f32 %v7551_v17, %v10255_v57 }
 0x345   :  { %v2910_v50 = vpop.f32.mrf.mxu0  ;;  %3230 = vmax.xlane.f32.xlu0 %v3229_v41  ;;  %v10432_v41 = vadd.f32 %v7548_v34, %v10235_v10 }
 0x346   :  { %12157 = vst [vmem:[#allocation22_spill] sm:$0xff] %v10412_v59  ;;  %v10421_v3 = vadd.f32 %v2910_v50, %v10285_v51  ;;  %v3238_v1 = vsel %vm3072_vm2, %v10412_v59, -inf  ;;  %12159 = vst [vmem:[#allocation24_spill] sm:$0xff] %v10427_v53  ;;  %v2441_v50 = vpop.f32.mrf.mxu1  ;;  %v10437_v59 = vadd.f32 %v2125_v12, %v10245_v40  ;;  %v10452_v12 = vadd.f32 %v7554_v15, %v10275_v13 }
 0x347   :  { %3239 = vmax.xlane.f32.xlu1 %v3238_v1  ;;  %12160 = vst [vmem:[#allocation25_spill] sm:$0xff] %v10432_v41  ;;  %v3097_v1 = vsel %vm3072_vm2, %v10427_v53, -inf  ;;  %12161 = vst [vmem:[#allocation26_spill] sm:$0xff] %v10442_v14  ;;  %v10457_v53 = vadd.f32 %v2145_v25, %v10285_v51 }
 0x348   :  { %12158 = vst [vmem:[#allocation23_spill] sm:$0xff] %v10421_v3  ;;  %v3235_v62 = vsel %vm3072_vm2, %v10421_v3, -inf  ;;  %v7610_v34 = vpop.f32.mrf.mxu1  ;;  %v10447_v3 = vadd.f32 %v2135_v20, %v10265_v38  ;;  %12162 = vst [vmem:[#allocation27_spill] sm:$0xff] %v10452_v12  ;;  %v3118_v15 = vsel %vm3072_vm2, %v10452_v12, -inf  ;;  %v10482_v12 = vadd.f32 %v7607_v52, %v10255_v57 }
 0x349   :  { %3236 = vmax.xlane.f32.xlu0 %v3235_v62  ;;  %v3106_v62 = vsel %vm3072_vm2, %v10432_v41, -inf  ;;  %v10462_v41 = vadd.f32 %v7601_v27, %v10222_v61  ;;  %v10477_v27 = vadd.f32 %v2431_v44, %v10245_v40 }
 0x34a   :  { %v2451_v17 = vpop.f32.mrf.mxu1  ;;  %12165 = vst [vmem:[#allocation30_spill] sm:$0xff] %v10482_v12 }
 0x34b   :  { %3101 = vmax.xlane.f32.xlu1 %v3100_v21  ;;  %v3103_v21 = vsel %vm3072_vm2, %v10437_v59, -inf  ;;  %12163 = vst [vmem:[#allocation28_spill] sm:$0xff] %v10462_v41  ;;  %v10497_v52 = vadd.f32 %v2451_v17, %v10285_v51 }
 0x34d   :  { %3098 = vmax.xlane.f32.xlu0 %v3097_v1  ;;  %v3112_v1 = vsel %vm3072_vm2, %v10442_v14, -inf  ;;  %v10472_v14 = vadd.f32 %v7604_v36, %v10235_v10  ;;  %v10487_v36 = vadd.f32 %v2441_v50, %v10265_v38  ;;  %12168 = vst [vmem:[#allocation33_spill] sm:$0xff] %v10497_v52 }
 0x34f   :  { %3107 = vmax.xlane.f32.xlu1 %v3106_v62  ;;  %v3109_v62 = vsel %vm3072_vm2, %v10447_v3, -inf  ;;  %v7657_v20 = vpop.f32.mrf.mxu1  ;;  %12164 = vst [vmem:[#allocation29_spill] sm:$0xff] %v10472_v14  ;;  %12166 = vst [vmem:[#allocation31_spill] sm:$0xff] %v10487_v36 }
 0x351   :  { %3104 = vmax.xlane.f32.xlu0 %v3103_v21  ;;  %v10467_v21 = vadd.f32 %v2421_v42, %v10227_v11  ;;  %v2727_v25 = vpop.f32.mrf.mxu1 }
 0x353   :  { %3113 = vmax.xlane.f32.xlu1 %v3112_v1  ;;  %v3115_v1 = vsel %vm3072_vm2, %v10457_v53, -inf  ;;  %v7660_v42 = vpop.f32.mrf.mxu1 }
 0x355   :  { %3110 = vmax.xlane.f32.xlu0 %v3109_v62  ;;  %v3148_v62 = vsel %vm3072_vm2, %v10462_v41, -inf  ;;  %v2737_v44 = vpop.f32.mrf.mxu1  ;;  %v10492_v41 = vadd.f32 %v7610_v34, %v10275_v13  ;;  %v10507_v34 = vadd.f32 %v2727_v25, %v10227_v11 }
 0x357   :  { %3119 = vmax.xlane.f32.xlu1 %v3118_v15  ;;  %v3145_v15 = vsel %vm3072_vm2, %v10467_v21, -inf  ;;  %12167 = vst [vmem:[#allocation32_spill] sm:$0xff] %v10492_v41  ;;  %v7663_v50 = vpop.f32.mrf.mxu1  ;;  %12170 = vst [vmem:[#allocation35_spill] sm:$0xff] %v10507_v34 }
 0x359   :  { %3116 = vmax.xlane.f32.xlu0 %v3115_v1  ;;  %v3154_v1 = vsel %vm3072_vm2, %v10472_v14, -inf  ;;  %v10502_v14 = vadd.f32 %v7657_v20, %v10222_v61  ;;  %v2747_v17 = vpop.f32.mrf.mxu1  ;;  %v10517_v20 = vadd.f32 %v2737_v44, %v10245_v40 }
 0x35b   :  { %3149 = vmax.xlane.f32.xlu1 %v3148_v62  ;;  %v3151_v62 = vsel %vm3072_vm2, %v10477_v27, -inf  ;;  %12169 = vst [vmem:[#allocation34_spill] sm:$0xff] %v10502_v14  ;;  %12172 = vst [vmem:[#allocation37_spill] sm:$0xff] %v10517_v20  ;;  %v7666_v25 = vpop.f32.mrf.mxu1 }
 0x35d   :  { %3146 = vmax.xlane.f32.xlu0 %v3145_v15  ;;  %v3160_v15 = vsel %vm3072_vm2, %v10482_v12, -inf  ;;  %v10512_v12 = vadd.f32 %v7660_v42, %v10235_v10  ;;  %v10527_v42 = vadd.f32 %v2747_v17, %v10265_v38  ;;  %v2757_v44 = vpop.f32.mrf.mxu1 }
 0x35f   :  { %3155 = vmax.xlane.f32.xlu1 %v3154_v1  ;;  %v3157_v1 = vsel %vm3072_vm2, %v10487_v36, -inf  ;;  %12171 = vst [vmem:[#allocation36_spill] sm:$0xff] %v10512_v12  ;;  %12174 = vst [vmem:[#allocation39_spill] sm:$0xff] %v10527_v42 }
 0x361   :  { %3152 = vmax.xlane.f32.xlu0 %v3151_v62  ;;  %v3166_v62 = vsel %vm3072_vm2, %v10492_v41, -inf  ;;  %v10522_v41 = vadd.f32 %v7663_v50, %v10255_v57  ;;  %v10537_v50 = vadd.f32 %v2757_v44, %v10285_v51 }
 0x363   :  { %3161 = vmax.xlane.f32.xlu1 %v3160_v15  ;;  %v3163_v15 = vsel %vm3072_vm2, %v10497_v52, -inf  ;;  %12173 = vst [vmem:[#allocation38_spill] sm:$0xff] %v10522_v41  ;;  %12176 = vst [vmem:[#allocation41_spill] sm:$0xff] %v10537_v50 }
 0x365   :  { %3158 = vmax.xlane.f32.xlu0 %v3157_v1  ;;  %v3196_v1 = vsel %vm3072_vm2, %v10502_v14, -inf  ;;  %v10532_v14 = vadd.f32 %v7666_v25, %v10275_v13 }
 0x367   :  { %3167 = vmax.xlane.f32.xlu1 %v3166_v62  ;;  %v3193_v62 = vsel %vm3072_vm2, %v10507_v34, -inf  ;;  %12175 = vst [vmem:[#allocation40_spill] sm:$0xff] %v10532_v14  ;;  %v3214_v17 = vsel %vm3072_vm2, %v10532_v14, -inf }
 0x369   :  { %3164 = vmax.xlane.f32.xlu0 %v3163_v15  ;;  %v3202_v15 = vsel %vm3072_vm2, %v10512_v12, -inf }
 0x36b   :  { %3197 = vmax.xlane.f32.xlu1 %v3196_v1  ;;  %v3199_v1 = vsel %vm3072_vm2, %v10517_v20, -inf }
 0x36d   :  { %3194 = vmax.xlane.f32.xlu0 %v3193_v62  ;;  %v3208_v62 = vsel %vm3072_vm2, %v10522_v41, -inf }
 0x36f   :  { %3203 = vmax.xlane.f32.xlu1 %v3202_v15  ;;  %v3205_v15 = vsel %vm3072_vm2, %v10527_v42, -inf }
 0x371   :  { %3200 = vmax.xlane.f32.xlu0 %v3199_v1  ;;  %v3211_v1 = vsel %vm3072_vm2, %v10537_v50, -inf }
 0x373   :  { %3209 = vmax.xlane.f32.xlu1 %v3208_v62 }
 0x375   :  { %3206 = vmax.xlane.f32.xlu0 %v3205_v15 }
 0x377   :  { %3215 = vmax.xlane.f32.xlu1 %v3214_v17 }
 0x379   :  { %3212 = vmax.xlane.f32.xlu0 %v3211_v1  ;;  %v3078_v25 = vpop.xlane.xlu1 %3077 }
 0x37a   :  { %v3266_v20 = vsub.f32 %v10230_v0, %v3078_v25 }
 0x37b   :  { %v3075_v41 = vpop.xlane.xlu0 %3074 }
 0x37c   :  { %v3265_v62 = vsub.f32 %v10238_v18, %v3075_v41  ;;  %v3331_v44 = vmul.f32 1.442695, %v3266_v20 }
 0x37d   :  { %v3084_v12 = vpop.xlane.xlu1 %3083 }
 0x37e   :  { %v3329_v34 = vmul.f32 1.442695, %v3265_v62  ;;  %v3268_v42 = vsub.f32 %v10248_v6, %v3084_v12 }
 0x37f   :  { %v3081_v15 = vpop.xlane.xlu0 %3080 }
 0x380   :  { %8098 = vpow2.f32 %v3329_v34  ;;  %v3267_v14 = vsub.f32 %v10258_v19, %v3081_v15  ;;  %v3335_v17 = vmul.f32 1.442695, %v3268_v42 }
 0x381   :  { %8100 = vpow2.f32 %v3331_v44  ;;  %v3090_v52 = vpop.xlane.xlu1 %3089 }
 0x382   :  { %v3333_v50 = vmul.f32 1.442695, %v3267_v14  ;;  %v3270_v1 = vsub.f32 %v10268_v22, %v3090_v52 }
 0x383   :  { %v3087_v36 = vpop.xlane.xlu0 %3086 }
 0x384   :  { %8102 = vpow2.f32 %v3333_v50  ;;  %v3269_v0 = vsub.f32 %v10278_v23, %v3087_v36  ;;  %v3339_v18 = vmul.f32 1.442695, %v3270_v1  ;;  %v10578_v1 = vld [vmem:[%s12074_s12 + $0x28] sm:$0xff] }
 0x385   :  { %8104 = vpow2.f32 %v3335_v17  ;;  %v3096_v41 = vpop.xlane.xlu1 %3095 }
 0x386   :  { %v3337_v20 = vmul.f32 1.442695, %v3269_v0  ;;  %v3272_v6 = vsub.f32 %v10288_v39, %v3096_v41  ;;  %v1797_v0 = vmul.f32 %v10578_v1, %v10133_v49 }
 0x387   :  { %v3093_v12 = vpop.xlane.xlu0 %3092 }
 0x388   :  { %8106 = vpow2.f32 %v3337_v20  ;;  %v3271_v19 = vsub.f32 %v10296_v56, %v3093_v12  ;;  %v3343_v34 = vmul.f32 1.442695, %v3272_v6  ;;  %v10592_v6 = vld [vmem:[%s12074_s12 + $0x20] sm:$0xff] }
 0x389   :  { %8108 = vpow2.f32 %v3339_v18  ;;  %v3126_v42 = vpop.xlane.xlu1 %3125  ;;  %v1796_v12 = vmul.f32 %v10592_v6, %v10122_v9 }
 0x38a   :  { %v3341_v14 = vmul.f32 1.442695, %v3271_v19  ;;  %v3282_v22 = vsub.f32 %v10293_v26, %v3126_v42  ;;  %v10602_v42 = vld [vmem:[%s12074_s12 + $0x18] sm:$0xff] }
 0x38b   :  { %v3123_v52 = vpop.xlane.xlu0 %3122 }
 0x38c   :  { %8110 = vpow2.f32 %v3341_v14  ;;  %v3281_v23 = vsub.f32 %v10301_v47, %v3123_v52  ;;  %v3363_v39 = vmul.f32 1.442695, %v3282_v22  ;;  %v10567_v47 = vld [vmem:[%s12074_s12 + $0x30] sm:$0xff]  ;;  %v1795_v14 = vmul.f32 %v10602_v42, %v10133_v49 }
 0x38d   :  { %v10555_v36 = vpop.eup %8098  ;;  %8112 = vpow2.f32 %v3343_v34  ;;  %v3132_v50 = vpop.xlane.xlu1 %3131  ;;  %v1798_v44 = vmul.f32 %v10567_v47, %v10122_v9 }
 0x38e   :  { %v10557_v25 = vpop.eup %8100  ;;  %v3361_v62 = vmul.f32 1.442695, %v3281_v23  ;;  %v3284_v56 = vsub.f32 %v10306_v33, %v3132_v50  ;;  %7739 = vmatprep.mubr.msk.f32.mxu0 %vm3072_vm2, %v10555_v36 }
 0x38f   :  { %7740 = vmatmul.mubr.msk.f32.vlgmr.msra.gmra.mxu0 %vm3072_vm2, %v10557_v25  ;;  %v3129_v26 = vpop.xlane.xlu0 %3128 }
 0x390   :  { %8114 = vpow2.f32 %v3361_v62  ;;  %7780 = vmatpush3.msra.mxu0 %v10153_v48  ;;  %v3283_v33 = vsub.f32 %v10311_v46, %v3129_v26  ;;  %v3367_v41 = vmul.f32 1.442695, %v3284_v56 }
 0x391   :  { %v10573_v15 = vpop.eup %8102  ;;  %7781 = vmatprep.subr.mxu0 %v1798_v44  ;;  %v3138_v17 = vpop.xlane.xlu1 %3137  ;;  %8116 = vpow2.f32 %v3363_v39  ;;  %v10616_v39 = vld [vmem:[%s12074_s12 + $0x10] sm:$0xff] }
 0x392   :  { %v10582_v18 = vpop.eup %8104  ;;  %v3365_v20 = vmul.f32 1.442695, %v3283_v33  ;;  %v3286_v48 = vsub.f32 %v10316_v31, %v3138_v17  ;;  %7782 = vmatpush3.msra.mxu0 %v1798_v44  ;;  %7742 = vmatprep.mubr.msk.f32.mxu0 %vm3072_vm2, %v10573_v15  ;;  %v1794_v62 = vmul.f32 %v10616_v39, %v10122_v9  ;;  %v10626_v44 = vld [vmem:[%s12074_s12 + $0x8] sm:$0xff] }
 0x393   :  { %7783 = vmatprep.subr.mxu0 %v1797_v0  ;;  %7743 = vmatmul.mubr.msk.f32.gmra.mxu0 %vm3072_vm2, %v10582_v18  ;;  %v3135_v46 = vpop.xlane.xlu0 %3134  ;;  %v1793_v33 = vmul.f32 %v10626_v44, %v10133_v49  ;;  %v10642_v49 = vld [vmem:[%s12074_s12] sm:$0xff] }
 0x394   :  { %8118 = vpow2.f32 %v3365_v20  ;;  %7784 = vmatpush3.msra.mxu0 %v1797_v0  ;;  %v3285_v31 = vsub.f32 %v10321_v54, %v3135_v46  ;;  %v3371_v52 = vmul.f32 1.442695, %v3286_v48  ;;  %v1792_v48 = vmul.f32 %v10642_v49, %v10122_v9 }
 0x395   :  { %v10597_v19 = vpop.eup %8106  ;;  %7785 = vmatprep.subr.mxu0 %v1796_v12  ;;  %v3144_v34 = vpop.xlane.xlu1 %3143  ;;  %8120 = vpow2.f32 %v3367_v41 }
 0x396   :  { %v10606_v22 = vpop.eup %8108  ;;  %v3369_v23 = vmul.f32 1.442695, %v3285_v31  ;;  %7786 = vmatpush3.msra.mxu0 %v1796_v12  ;;  %7745 = vmatprep.mubr.msk.f32.mxu0 %vm3072_vm2, %v10597_v19  ;;  %v3288_v54 = vsub.f32 %v10326_v32, %v3144_v34  ;;  %v10656_v34 = vld [vmem:[%s12074_s12 + $0x38] sm:$0xff] }
 0x397   :  { %7787 = vmatprep.subr.mxu0 %v1795_v14  ;;  %7746 = vmatmul.mubr.msk.f32.gmra.mxu0 %vm3072_vm2, %v10606_v22  ;;  %v3141_v50 = vpop.xlane.xlu0 %3140  ;;  %v1815_v9 = vmul.f32 %v10656_v34, %v10141_v8 }
 0x398   :  { %8122 = vpow2.f32 %v3369_v23  ;;  %7788 = vmatpush3.msra.mxu0 %v1795_v14  ;;  %v3287_v56 = vsub.f32 %v10331_v7, %v3141_v50  ;;  %v3375_v7 = vmul.f32 1.442695, %v3288_v54 }
 0x399   :  { %v10621_v26 = vpop.eup %8110  ;;  %7789 = vmatprep.subr.mxu0 %v1794_v62  ;;  %v7713_v32 = vpop.f32.mrf.mxu1  ;;  %8124 = vpow2.f32 %v3371_v52 }
 0x39a   :  { %v10630_v17 = vpop.eup %8112  ;;  %v3373_v0 = vmul.f32 1.442695, %v3287_v56  ;;  %v10633_v41 = vadd.f32 %v7713_v32, %v10222_v61  ;;  %7790 = vmatpush3.msra.mxu0 %v1794_v62  ;;  %7748 = vmatprep.mubr.msk.f32.mxu0 %vm3072_vm2, %v10621_v26 }
 0x39b   :  { %7791 = vmatprep.subr.mxu0 %v1793_v33  ;;  %v3033_v20 = vpop.f32.mrf.mxu1  ;;  %7749 = vmatmul.mubr.msk.f32.gmra.mxu0 %vm3072_vm2, %v10630_v17 }
 0x39c   :  { %8126 = vpow2.f32 %v3373_v0  ;;  %v10647_v61 = vadd.f32 %v3033_v20, %v10227_v11  ;;  %7792 = vmatpush3.msra.mxu0 %v1793_v33  ;;  %v3244_v46 = vsel %vm3072_vm2, %v10633_v41, -inf }
 0x39d   :  { %v10651_v12 = vpop.eup %8114  ;;  %7793 = vmatprep.subr.mxu0 %v1792_v48  ;;  %3245 = vmax.xlane.f32.xlu1 %v3244_v46  ;;  %v7716_v31 = vpop.f32.mrf.mxu1  ;;  %8128 = vpow2.f32 %v3375_v7  ;;  %v1812_v46 = vmul.f32 %v10592_v6, %v10148_v58 }
 0x39e   :  { %v10661_v11 = vadd.f32 %v7716_v31, %v10235_v10  ;;  %7794 = vmatpush3.msra.mxu0 %v1792_v48  ;;  %7795 = vmatprep.mubr.msk.f32.mxu0 %vm3072_vm2, %v10651_v12  ;;  %v3241_v14 = vsel %vm3072_vm2, %v10647_v61, -inf  ;;  %v10667_v52 = vpop.eup %8116  ;;  %v1814_v10 = vmul.f32 %v10567_v47, %v10148_v58 }
 0x39f   :  { %7835 = vmatprep.subr.mxu0 %v1815_v9  ;;  %v3043_v23 = vpop.f32.mrf.mxu1  ;;  %3242 = vmax.xlane.f32.xlu0 %v3241_v14 }
 0x3a0   :  { %v10670_v54 = vadd.f32 %v3043_v23, %v10245_v40  ;;  %7796 = vmatmul.mubr.msk.f32.vlgmr.msra.gmra.mxu0 %vm3072_vm2, %v10667_v52  ;;  %v3250_v50 = vsel %vm3072_vm2, %v10661_v11, -inf  ;;  %v1813_v40 = vmul.f32 %v10578_v1, %v10141_v8 }
 0x3a1   :  { %v10678_v62 = vpop.eup %8118  ;;  %7836 = vmatpush3.msra.mxu0 %v1815_v9  ;;  %3251 = vmax.xlane.f32.xlu1 %v3250_v50  ;;  %v7719_v56 = vpop.f32.mrf.mxu1 }
 0x3a2   :  { %7837 = vmatprep.subr.mxu0 %v1814_v10  ;;  %v10681_v32 = vadd.f32 %v7719_v56, %v10255_v57  ;;  %7798 = vmatprep.mubr.msk.f32.mxu0 %vm3072_vm2, %v10678_v62  ;;  %v3247_v33 = vsel %vm3072_vm2, %v10670_v54, -inf  ;;  %v10689_v0 = vpop.eup %8120 }
 0x3a3   :  { %v3174_v7 = vpop.xlane.xlu1 %3173  ;;  %7838 = vmatpush3.msra.mxu0 %v1814_v10  ;;  %v3053_v20 = vpop.f32.mrf.mxu1  ;;  %3248 = vmax.xlane.f32.xlu0 %v3247_v33  ;;  %v1811_v10 = vmul.f32 %v10602_v42, %v10141_v8 }
 0x3a4   :  { %v3298_v48 = vsub.f32 %v10340_v63, %v3174_v7  ;;  %7839 = vmatprep.subr.mxu0 %v1813_v40  ;;  %v10693_v57 = vadd.f32 %v3053_v20, %v10265_v38  ;;  %7799 = vmatmul.mubr.msk.f32.gmra.mxu0 %vm3072_vm2, %v10689_v0  ;;  %v3256_v31 = vsel %vm3072_vm2, %v10681_v32, -inf }
 0x3a5   :  { %v10701_v9 = vpop.eup %8122  ;;  %7840 = vmatpush3.msra.mxu0 %v1813_v40  ;;  %v3171_v14 = vpop.xlane.xlu0 %3170  ;;  %3257 = vmax.xlane.f32.xlu1 %v3256_v31  ;;  %v1810_v31 = vmul.f32 %v10616_v39, %v10148_v58 }
 0x3a6   :  { %v7722_v23 = vpop.f32.mrf.mxu1  ;;  %v3297_v63 = vsub.f32 %v10345_v35, %v3171_v14  ;;  %7841 = vmatprep.subr.mxu0 %v1812_v46  ;;  %7801 = vmatprep.mubr.msk.f32.mxu0 %vm3072_vm2, %v10701_v9  ;;  %v3253_v50 = vsel %vm3072_vm2, %v10693_v57, -inf  ;;  %v10713_v56 = vpop.eup %8124  ;;  %v3395_v40 = vmul.f32 1.442695, %v3298_v48 }
 0x3a7   :  { %v10705_v38 = vadd.f32 %v7722_v23, %v10275_v13  ;;  %v3180_v33 = vpop.xlane.xlu1 %3179  ;;  %7842 = vmatpush3.msra.mxu0 %v1812_v46  ;;  %3254 = vmax.xlane.f32.xlu0 %v3253_v50 }
 0x3a8   :  { %v3063_v7 = vpop.f32.mrf.mxu1  ;;  %v3393_v35 = vmul.f32 1.442695, %v3297_v63  ;;  %v3300_v13 = vsub.f32 %v10350_v5, %v3180_v33  ;;  %7843 = vmatprep.subr.mxu0 %v1811_v10  ;;  %7802 = vmatmul.mubr.msk.f32.gmra.mxu0 %vm3072_vm2, %v10713_v56 }
 0x3a9   :  { %v10717_v20 = vadd.f32 %v3063_v7, %v10285_v51  ;;  %v10723_v14 = vpop.eup %8126  ;;  %7844 = vmatpush3.msra.mxu0 %v1811_v10  ;;  %v3177_v48 = vpop.xlane.xlu0 %3176  ;;  %v3262_v46 = vsel %vm3072_vm2, %v10705_v38, -inf  ;;  %v1809_v51 = vmul.f32 %v10626_v44, %v10141_v8 }
 0x3aa   :  { %8130 = vpow2.f32 %v3393_v35  ;;  %v3299_v5 = vsub.f32 %v10357_v28, %v3177_v48  ;;  %7845 = vmatprep.subr.mxu0 %v1810_v31  ;;  %3263 = vmax.xlane.f32.xlu1 %v3262_v46  ;;  %v3399_v63 = vmul.f32 1.442695, %v3300_v13  ;;  %v10734_v10 = vpop.eup %8128 }
 0x3ab   :  { %12177 = vst [vmem:[#allocation42_spill] sm:$0xff] %v10717_v20  ;;  %v3259_v23 = vsel %vm3072_vm2, %v10717_v20, -inf  ;;  %8132 = vpow2.f32 %v3395_v40  ;;  %v3186_v50 = vpop.xlane.xlu1 %3185  ;;  %7846 = vmatpush3.msra.mxu0 %v1810_v31  ;;  %7804 = vmatprep.mubr.msk.f32.mxu0 %vm3072_vm2, %v10723_v14  ;;  %v1808_v40 = vmul.f32 %v10642_v49, %v10148_v58 }
 0x3ac   :  { %v3397_v33 = vmul.f32 1.442695, %v3299_v5  ;;  %v3302_v28 = vsub.f32 %v10362_v55, %v3186_v50  ;;  %7847 = vmatprep.subr.mxu0 %v1809_v51  ;;  %3260 = vmax.xlane.f32.xlu0 %v3259_v23  ;;  %v1831_v55 = vmul.f32 %v10656_v34, %v10168_v4 }
 0x3ad   :  { %7805 = vmatmul.mubr.msk.f32.gmra.mxu0 %vm3072_vm2, %v10734_v10  ;;  %v3183_v8 = vpop.xlane.xlu0 %3182 }
 0x3ae   :  { %8134 = vpow2.f32 %v3397_v33  ;;  %7848 = vmatpush3.msra.mxu0 %v1809_v51  ;;  %v3301_v7 = vsub.f32 %v10367_v43, %v3183_v8  ;;  %v3403_v35 = vmul.f32 1.442695, %v3302_v28  ;;  %v1828_v33 = vmul.f32 %v10592_v6, %v10174_v60 }
 0x3af   :  { %8136 = vpow2.f32 %v3399_v63  ;;  %7849 = vmatprep.subr.mxu0 %v1808_v40  ;;  %v3192_v13 = vpop.xlane.xlu1 %3191  ;;  %v1829_v63 = vmul.f32 %v10578_v1, %v10168_v4  ;;  %v1827_v8 = vmul.f32 %v10602_v42, %v10168_v4 }
 0x3b0   :  { %v3401_v31 = vmul.f32 1.442695, %v3301_v7  ;;  %v3304_v48 = vsub.f32 %v10372_v29, %v3192_v13  ;;  %7850 = vmatpush3.msra.mxu0 %v1808_v40  ;;  %v1830_v29 = vmul.f32 %v10567_v47, %v10174_v60  ;;  %v1826_v7 = vmul.f32 %v10616_v39, %v10174_v60 }
 0x3b1   :  { %7891 = vmatprep.subr.mxu0 %v1831_v55  ;;  %v3189_v46 = vpop.xlane.xlu0 %3188  ;;  %v1825_v13 = vmul.f32 %v10626_v44, %v10168_v4 }
 0x3b2   :  { %8138 = vpow2.f32 %v3401_v31  ;;  %v3303_v58 = vsub.f32 %v10377_v24, %v3189_v46  ;;  %v3407_v5 = vmul.f32 1.442695, %v3304_v48  ;;  %v1824_v46 = vmul.f32 %v10642_v49, %v10174_v60 }
 0x3b3   :  { %8140 = vpow2.f32 %v3403_v35 }
 0x3b4   :  { %v3405_v51 = vmul.f32 1.442695, %v3303_v58 }
 0x3b6   :  { %8142 = vpow2.f32 %v3405_v51 }
 0x3b7   :  { %v10746_v43 = vpop.eup %8130  ;;  %8144 = vpow2.f32 %v3407_v5 }
 0x3b8   :  { %v10748_v23 = vpop.eup %8132  ;;  %7851 = vmatprep.mubr.msk.f32.mxu0 %vm3072_vm2, %v10746_v43 }
 0x3b9   :  { %7852 = vmatmul.mubr.msk.f32.vlgmr.msra.gmra.mxu0 %vm3072_vm2, %v10748_v23 }
 0x3ba   :  { %7892 = vmatpush3.msra.mxu0 %v1831_v55 }
 0x3bb   :  { %v10756_v24 = vpop.eup %8134  ;;  %7893 = vmatprep.subr.mxu0 %v1830_v29 }
 0x3bc   :  { %v10760_v50 = vpop.eup %8136  ;;  %7894 = vmatpush3.msra.mxu0 %v1830_v29  ;;  %7854 = vmatprep.mubr.msk.f32.mxu0 %vm3072_vm2, %v10756_v24 }
 0x3bd   :  { %7895 = vmatprep.subr.mxu0 %v1829_v63  ;;  %7855 = vmatmul.mubr.msk.f32.gmra.mxu0 %vm3072_vm2, %v10760_v50 }
 0x3be   :  { %7896 = vmatpush3.msra.mxu0 %v1829_v63 }
 0x3bf   :  { %v10768_v28 = vpop.eup %8138  ;;  %7897 = vmatprep.subr.mxu0 %v1828_v33 }
 0x3c0   :  { %v10772_v40 = vpop.eup %8140  ;;  %7898 = vmatpush3.msra.mxu0 %v1828_v33  ;;  %7857 = vmatprep.mubr.msk.f32.mxu0 %vm3072_vm2, %v10768_v28  ;;  %v12179_v33 = vld [vmem:[#allocation20_spill] sm:$0xff] }
 0x3c1   :  { %7899 = vmatprep.subr.mxu0 %v1827_v8  ;;  %7858 = vmatmul.mubr.msk.f32.gmra.mxu0 %vm3072_vm2, %v10772_v40 }
 0x3c2   :  { %7900 = vmatpush3.msra.mxu0 %v1827_v8 }
 0x3c3   :  { %v10780_v35 = vpop.eup %8142  ;;  %7901 = vmatprep.subr.mxu0 %v1826_v7 }
 0x3c4   :  { %v10784_v55 = vpop.eup %8144  ;;  %v3222_v31 = vpop.xlane.xlu1 %3221  ;;  %7902 = vmatpush3.msra.mxu0 %v1826_v7  ;;  %7860 = vmatprep.mubr.msk.f32.mxu0 %vm3072_vm2, %v10780_v35 }
 0x3c5   :  { %12178 = vst [vmem:[#allocation43_spill] sm:$0xff] %v10784_v55  ;;  %v3314_v48 = vsub.f32 %v10384_v2, %v3222_v31  ;;  %7903 = vmatprep.subr.mxu0 %v1825_v13  ;;  %7861 = vmatmul.mubr.msk.f32.gmra.mxu0 %vm3072_vm2, %v10784_v55  ;;  %v12180_v31 = vld [vmem:[#allocation21_spill] sm:$0xff] }
 0x3c6   :  { %7904 = vmatpush3.msra.mxu0 %v1825_v13  ;;  %v3219_v58 = vpop.xlane.xlu0 %3218 }
 0x3c7   :  { %v3313_v4 = vsub.f32 %v10387_v45, %v3219_v58  ;;  %7905 = vmatprep.subr.mxu0 %v1824_v46  ;;  %v3427_v5 = vmul.f32 1.442695, %v3314_v48 }
 0x3c8   :  { %v3228_v51 = vpop.xlane.xlu1 %3227  ;;  %7906 = vmatpush3.msra.mxu0 %v1824_v46 }
 0x3c9   :  { %v3425_v29 = vmul.f32 1.442695, %v3313_v4  ;;  %v3316_v63 = vsub.f32 %v10392_v16, %v3228_v51  ;;  %7947 = vmatprep.subr.mxu0 %v10656_v34  ;;  %v12181_v4 = vld [vmem:[#allocation22_spill] sm:$0xff] }
 0x3ca   :  { %v3225_v2 = vpop.xlane.xlu0 %3224 }
 0x3cb   :  { %8146 = vpow2.f32 %v3425_v29  ;;  %v3315_v8 = vsub.f32 %v12179_v33, %v3225_v2  ;;  %v3431_v7 = vmul.f32 1.442695, %v3316_v63  ;;  %v12182_v29 = vld [vmem:[#allocation23_spill] sm:$0xff] }
 0x3cc   :  { %8148 = vpow2.f32 %v3427_v5  ;;  %v3234_v60 = vpop.xlane.xlu1 %3233 }
 0x3cd   :  { %v3429_v13 = vmul.f32 1.442695, %v3315_v8  ;;  %v3318_v55 = vsub.f32 %v12180_v31, %v3234_v60 }
 0x3ce   :  { %v3231_v45 = vpop.xlane.xlu0 %3230 }
 0x3cf   :  { %8150 = vpow2.f32 %v3429_v13  ;;  %v3317_v48 = vsub.f32 %v10407_v30, %v3231_v45  ;;  %v3435_v46 = vmul.f32 1.442695, %v3318_v55  ;;  %v12183_v13 = vld [vmem:[#allocation24_spill] sm:$0xff] }
 0x3d0   :  { %8152 = vpow2.f32 %v3431_v7  ;;  %v3240_v58 = vpop.xlane.xlu1 %3239 }
 0x3d1   :  { %v3433_v16 = vmul.f32 1.442695, %v3317_v48  ;;  %v3320_v51 = vsub.f32 %v12181_v4, %v3240_v58  ;;  %v12184_v58 = vld [vmem:[#allocation25_spill] sm:$0xff] }
 0x3d2   :  { %v3237_v20 = vpop.xlane.xlu0 %3236 }
 0x3d3   :  { %8154 = vpow2.f32 %v3433_v16  ;;  %v3319_v2 = vsub.f32 %v12182_v29, %v3237_v20  ;;  %v3439_v5 = vmul.f32 1.442695, %v3320_v51 }
 0x3d4   :  { %8156 = vpow2.f32 %v3435_v46  ;;  %v3102_v63 = vpop.xlane.xlu1 %3101 }
 0x3d5   :  { %v3437_v33 = vmul.f32 1.442695, %v3319_v2  ;;  %v3274_v8 = vsub.f32 %v10418_v37, %v3102_v63 }
 0x3d6   :  { %v3099_v60 = vpop.xlane.xlu0 %3098 }
 0x3d7   :  { %8158 = vpow2.f32 %v3437_v33  ;;  %v3273_v30 = vsub.f32 %v12183_v13, %v3099_v60  ;;  %v3347_v55 = vmul.f32 1.442695, %v3274_v8 }
 0x3d8   :  { %v10803_v7 = vpop.eup %8146  ;;  %8160 = vpow2.f32 %v3439_v5  ;;  %v3108_v31 = vpop.xlane.xlu1 %3107  ;;  %v12185_v5 = vld [vmem:[#allocation26_spill] sm:$0xff] }
 0x3d9   :  { %v10805_v45 = vpop.eup %8148  ;;  %v3345_v48 = vmul.f32 1.442695, %v3273_v30  ;;  %v3276_v20 = vsub.f32 %v12184_v58, %v3108_v31  ;;  %7907 = vmatprep.mubr.msk.f32.mxu0 %vm3072_vm2, %v10803_v7  ;;  %v12186_v31 = vld [vmem:[#allocation27_spill] sm:$0xff] }
 0x3da   :  { %7908 = vmatmul.mubr.msk.f32.vlgmr.msra.gmra.mxu0 %vm3072_vm2, %v10805_v45  ;;  %v3105_v37 = vpop.xlane.xlu0 %3104 }
 0x3db   :  { %8162 = vpow2.f32 %v3345_v48  ;;  %v3275_v46 = vsub.f32 %v10437_v59, %v3105_v37  ;;  %7948 = vmatpush3.msra.mxu0 %v10656_v34  ;;  %v3351_v4 = vmul.f32 1.442695, %v3276_v20 }
 0x3dc   :  { %v10814_v16 = vpop.eup %8150  ;;  %8164 = vpow2.f32 %v3347_v55  ;;  %v3114_v51 = vpop.xlane.xlu1 %3113  ;;  %7949 = vmatprep.subr.mxu0 %v10567_v47 }
 0x3dd   :  { %v10817_v29 = vpop.eup %8152  ;;  %v3349_v2 = vmul.f32 1.442695, %v3275_v46  ;;  %v3278_v63 = vsub.f32 %v12185_v5, %v3114_v51  ;;  %7910 = vmatprep.mubr.msk.f32.mxu0 %vm3072_vm2, %v10814_v16  ;;  %7950 = vmatpush3.msra.mxu0 %v10567_v47 }
 0x3de   :  { %7911 = vmatmul.mubr.msk.f32.gmra.mxu0 %vm3072_vm2, %v10817_v29  ;;  %7951 = vmatprep.subr.mxu0 %v10578_v1  ;;  %v3111_v59 = vpop.xlane.xlu0 %3110 }
 0x3df   :  { %8166 = vpow2.f32 %v3349_v2  ;;  %v3277_v33 = vsub.f32 %v10447_v3, %v3111_v59  ;;  %7952 = vmatpush3.msra.mxu0 %v10578_v1  ;;  %v3355_v60 = vmul.f32 1.442695, %v3278_v63  ;;  %v12187_v2 = vld [vmem:[#allocation28_spill] sm:$0xff] }
 0x3e0   :  { %v10828_v8 = vpop.eup %8154  ;;  %8168 = vpow2.f32 %v3351_v4  ;;  %v3120_v13 = vpop.xlane.xlu1 %3119  ;;  %7953 = vmatprep.subr.mxu0 %v10592_v6 }
 0x3e1   :  { %v10831_v30 = vpop.eup %8156  ;;  %v3353_v55 = vmul.f32 1.442695, %v3277_v33  ;;  %v3280_v48 = vsub.f32 %v12186_v31, %v3120_v13  ;;  %7913 = vmatprep.mubr.msk.f32.mxu0 %vm3072_vm2, %v10828_v8  ;;  %7954 = vmatpush3.msra.mxu0 %v10592_v6  ;;  %v12188_v31 = vld [vmem:[#allocation29_spill] sm:$0xff] }
 0x3e2   :  { %7914 = vmatmul.mubr.msk.f32.gmra.mxu0 %vm3072_vm2, %v10831_v30  ;;  %7955 = vmatprep.subr.mxu0 %v10602_v42  ;;  %v3117_v3 = vpop.xlane.xlu0 %3116 }
 0x3e3   :  { %8170 = vpow2.f32 %v3353_v55  ;;  %v3279_v58 = vsub.f32 %v10457_v53, %v3117_v3  ;;  %7956 = vmatpush3.msra.mxu0 %v10602_v42  ;;  %v3359_v37 = vmul.f32 1.442695, %v3280_v48 }
 0x3e4   :  { %v10842_v20 = vpop.eup %8158  ;;  %8172 = vpow2.f32 %v3355_v60  ;;  %v3150_v46 = vpop.xlane.xlu1 %3149  ;;  %7957 = vmatprep.subr.mxu0 %v10616_v39 }
 0x3e5   :  { %v10845_v4 = vpop.eup %8160  ;;  %v3357_v51 = vmul.f32 1.442695, %v3279_v58  ;;  %v3290_v5 = vsub.f32 %v12187_v2, %v3150_v46  ;;  %7916 = vmatprep.mubr.msk.f32.mxu0 %vm3072_vm2, %v10842_v20  ;;  %7958 = vmatpush3.msra.mxu0 %v10616_v39  ;;  %v12190_v58 = vld [vmem:[#allocation19_spill] sm:$0xff] }
 0x3e6   :  { %7917 = vmatmul.mubr.msk.f32.gmra.mxu0 %vm3072_vm2, %v10845_v4  ;;  %7959 = vmatprep.subr.mxu0 %v10626_v44  ;;  %v3147_v53 = vpop.xlane.xlu0 %3146 }
 0x3e7   :  { %8174 = vpow2.f32 %v3357_v51  ;;  %v3289_v63 = vsub.f32 %v10467_v21, %v3147_v53  ;;  %7960 = vmatpush3.msra.mxu0 %v10626_v44  ;;  %7963 = vmatprep.mubr.msk.f32.mxu0 %vm3072_vm2, %v10555_v36  ;;  %v3379_v33 = vmul.f32 1.442695, %v3290_v5  ;;  %v12189_v36 = vld [vmem:[#allocation13_spill] sm:$0xff]  ;;  %v12191_v5 = vld [vmem:[#allocation18_spill] sm:$0xff] }
 0x3e8   :  { %v10858_v59 = vpop.eup %8162  ;;  %8176 = vpow2.f32 %v3359_v37  ;;  %v3156_v60 = vpop.xlane.xlu1 %3155  ;;  %7961 = vmatprep.subr.mxu0 %v10642_v49  ;;  %v1806_v3 = vmul.f32 %v10567_v47, %v12189_v36 }
 0x3e9   :  { %v10861_v13 = vpop.eup %8164  ;;  %v3377_v55 = vmul.f32 1.442695, %v3289_v63  ;;  %v3292_v48 = vsub.f32 %v12188_v31, %v3156_v60  ;;  %7767 = vmatprep.mubr.msk.f32.mxu1 %vm3072_vm2, %v10858_v59  ;;  %7962 = vmatpush3.msra.mxu0 %v10642_v49  ;;  %v12192_v60 = vld [vmem:[#allocation30_spill] sm:$0xff] }
 0x3ea   :  { %7768 = vmatmul.mubr.msk.f32.vlgmr.msra.gmra.mxu1 %vm3072_vm2, %v10861_v13  ;;  %7964 = vmatmul.mubr.msk.f32.vlgmr.msra.gmra.mxu0 %vm3072_vm2, %v10557_v25  ;;  %v3153_v21 = vpop.xlane.xlu0 %3152  ;;  %v1805_v25 = vmul.f32 %v10578_v1, %v12191_v5 }
 0x3eb   :  { %8178 = vpow2.f32 %v3377_v55  ;;  %7808 = vmatpush3.msra.mxu1 %v12190_v58  ;;  %v3291_v37 = vsub.f32 %v10477_v27, %v3153_v21  ;;  %7966 = vmatprep.mubr.msk.f32.mxu0 %vm3072_vm2, %v10573_v15  ;;  %v3383_v51 = vmul.f32 1.442695, %v3292_v48  ;;  %v1804_v15 = vmul.f32 %v10592_v6, %v12189_v36 }
 0x3ec   :  { %v10877_v46 = vpop.eup %8166  ;;  %8180 = vpow2.f32 %v3379_v33  ;;  %7809 = vmatprep.subr.mxu1 %v1806_v3  ;;  %v3162_v2 = vpop.xlane.xlu1 %3161  ;;  %v12193_v33 = vld [vmem:[#allocation31_spill] sm:$0xff]  ;;  %v1803_v58 = vmul.f32 %v10602_v42, %v12191_v5 }
 0x3ed   :  { %v10881_v53 = vpop.eup %8168  ;;  %v3381_v63 = vmul.f32 1.442695, %v3291_v37  ;;  %v3294_v55 = vsub.f32 %v12192_v60, %v3162_v2  ;;  %7810 = vmatpush3.msra.mxu1 %v1806_v3  ;;  %7770 = vmatprep.mubr.msk.f32.mxu1 %vm3072_vm2, %v10877_v46 }
 0x3ee   :  { %7811 = vmatprep.subr.mxu1 %v1805_v25  ;;  %7771 = vmatmul.mubr.msk.f32.gmra.mxu1 %vm3072_vm2, %v10881_v53  ;;  %v3159_v27 = vpop.xlane.xlu0 %3158 }
 0x3ef   :  { %8182 = vpow2.f32 %v3381_v63  ;;  %7812 = vmatpush3.msra.mxu1 %v1805_v25  ;;  %7967 = vmatmul.mubr.msk.f32.gmra.mxu0 %vm3072_vm2, %v10582_v18  ;;  %v3293_v31 = vsub.f32 %v12193_v33, %v3159_v27  ;;  %v3387_v21 = vmul.f32 1.442695, %v3294_v55  ;;  %v12194_v25 = vld [vmem:[#allocation32_spill] sm:$0xff]  ;;  %v1801_v33 = vmul.f32 %v10626_v44, %v12191_v5  ;;  %v12197_v5 = vld [vmem:[#allocation35_spill] sm:$0xff] }
 0x3f0   :  { %v10893_v48 = vpop.eup %8170  ;;  %8184 = vpow2.f32 %v3383_v51  ;;  %7813 = vmatprep.subr.mxu1 %v1804_v15  ;;  %7969 = vmatprep.mubr.msk.f32.mxu0 %vm3072_vm2, %v10597_v19  ;;  %v3168_v3 = vpop.xlane.xlu1 %3167  ;;  %v1802_v19 = vmul.f32 %v10616_v39, %v12189_v36  ;;  %v12195_v51 = vld [vmem:[#allocation33_spill] sm:$0xff] }
 0x3f1   :  { %v10899_v37 = vpop.eup %8172  ;;  %v3385_v2 = vmul.f32 1.442695, %v3293_v31  ;;  %v3296_v63 = vsub.f32 %v12194_v25, %v3168_v3  ;;  %7814 = vmatpush3.msra.mxu1 %v1804_v15  ;;  %7773 = vmatprep.mubr.msk.f32.mxu1 %vm3072_vm2, %v10893_v48 }
 0x3f2   :  { %7815 = vmatprep.subr.mxu1 %v1803_v58  ;;  %7774 = vmatmul.mubr.msk.f32.gmra.mxu1 %vm3072_vm2, %v10899_v37  ;;  %v3165_v18 = vpop.xlane.xlu0 %3164 }
 0x3f3   :  { %8186 = vpow2.f32 %v3385_v2  ;;  %7816 = vmatpush3.msra.mxu1 %v1803_v58  ;;  %7970 = vmatmul.mubr.msk.f32.gmra.mxu0 %vm3072_vm2, %v10606_v22  ;;  %v3295_v60 = vsub.f32 %v12195_v51, %v3165_v18  ;;  %v3391_v27 = vmul.f32 1.442695, %v3296_v63  ;;  %v12196_v58 = vld [vmem:[#allocation34_spill] sm:$0xff] }
 0x3f4   :  { %v10911_v55 = vpop.eup %8174  ;;  %8188 = vpow2.f32 %v3387_v21  ;;  %7817 = vmatprep.subr.mxu1 %v1802_v19  ;;  %7972 = vmatprep.mubr.msk.f32.mxu0 %vm3072_vm2, %v10621_v26  ;;  %v3198_v15 = vpop.xlane.xlu1 %3197  ;;  %v1800_v26 = vmul.f32 %v10642_v49, %v12189_v36 }
 0x3f5   :  { %v10917_v31 = vpop.eup %8176  ;;  %v3389_v3 = vmul.f32 1.442695, %v3295_v60  ;;  %v3306_v2 = vsub.f32 %v12196_v58, %v3198_v15  ;;  %7818 = vmatpush3.msra.mxu1 %v1802_v19  ;;  %7776 = vmatprep.mubr.msk.f32.mxu1 %vm3072_vm2, %v10911_v55  ;;  %v12198_v19 = vld [vmem:[#allocation14_spill] sm:$0xff]  ;;  %v12199_v15 = vld [vmem:[#allocation36_spill] sm:$0xff] }
 0x3f6   :  { %7819 = vmatprep.subr.mxu1 %v1801_v33  ;;  %7777 = vmatmul.mubr.msk.f32.gmra.mxu1 %vm3072_vm2, %v10917_v31  ;;  %v3195_v22 = vpop.xlane.xlu0 %3194  ;;  %v1823_v51 = vmul.f32 %v10656_v34, %v12198_v19 }
 0x3f7   :  { %8190 = vpow2.f32 %v3389_v3  ;;  %7820 = vmatpush3.msra.mxu1 %v1801_v33  ;;  %7973 = vmatmul.mubr.msk.f32.gmra.mxu0 %vm3072_vm2, %v10630_v17  ;;  %v3305_v21 = vsub.f32 %v12197_v5, %v3195_v22  ;;  %v3411_v63 = vmul.f32 1.442695, %v3306_v2  ;;  %v12201_v3 = vld [vmem:[#allocation37_spill] sm:$0xff]  ;;  %v1821_v5 = vmul.f32 %v10578_v1, %v12198_v19 }
 0x3f8   :  { %v10929_v25 = vpop.eup %8178  ;;  %8192 = vpow2.f32 %v3391_v27  ;;  %7821 = vmatprep.subr.mxu1 %v1800_v26  ;;  %7975 = vmatprep.mubr.msk.f32.mxu0 %vm3072_vm2, %v10858_v59  ;;  %v3204_v18 = vpop.xlane.xlu1 %3203  ;;  %v12200_v27 = vld [vmem:[#allocation15_spill] sm:$0xff] }
 0x3f9   :  { %v10935_v36 = vpop.eup %8180  ;;  %v3409_v60 = vmul.f32 1.442695, %v3305_v21  ;;  %v3308_v33 = vsub.f32 %v12199_v15, %v3204_v18  ;;  %7822 = vmatpush3.msra.mxu1 %v1800_v26  ;;  %7823 = vmatprep.mubr.msk.f32.mxu1 %vm3072_vm2, %v10929_v25  ;;  %v1822_v59 = vmul.f32 %v10567_v47, %v12200_v27 }
 0x3fa   :  { %7863 = vmatprep.subr.mxu1 %v1823_v51  ;;  %7824 = vmatmul.mubr.msk.f32.vlgmr.msra.gmra.mxu1 %vm3072_vm2, %v10935_v36  ;;  %v3201_v17 = vpop.xlane.xlu0 %3200 }
 0x3fb   :  { %8194 = vpow2.f32 %v3409_v60  ;;  %7864 = vmatpush3.msra.mxu1 %v1823_v51  ;;  %7976 = vmatmul.mubr.msk.f32.gmra.mxu0 %vm3072_vm2, %v10861_v13  ;;  %v3307_v58 = vsub.f32 %v12201_v3, %v3201_v17  ;;  %v3415_v22 = vmul.f32 1.442695, %v3308_v33  ;;  %v12202_v51 = vld [vmem:[#allocation38_spill] sm:$0xff]  ;;  %v1819_v3 = vmul.f32 %v10602_v42, %v12198_v19 }
 0x3fc   :  { %v10947_v2 = vpop.eup %8182  ;;  %8196 = vpow2.f32 %v3411_v63  ;;  %7865 = vmatprep.subr.mxu1 %v1822_v59  ;;  %7978 = vmatprep.mubr.msk.f32.mxu0 %vm3072_vm2, %v10877_v46  ;;  %v3210_v26 = vpop.xlane.xlu1 %3209  ;;  %v1820_v46 = vmul.f32 %v10592_v6, %v12200_v27  ;;  %v12203_v63 = vld [vmem:[#allocation39_spill] sm:$0xff] }
 0x3fd   :  { %v10953_v21 = vpop.eup %8184  ;;  %v3413_v18 = vmul.f32 1.442695, %v3307_v58  ;;  %v3310_v60 = vsub.f32 %v12202_v51, %v3210_v26  ;;  %7866 = vmatpush3.msra.mxu1 %v1822_v59  ;;  %7826 = vmatprep.mubr.msk.f32.mxu1 %vm3072_vm2, %v10947_v2 }
 0x3fe   :  { %7867 = vmatprep.subr.mxu1 %v1821_v5  ;;  %7827 = vmatmul.mubr.msk.f32.gmra.mxu1 %vm3072_vm2, %v10953_v21  ;;  %v3207_v13 = vpop.xlane.xlu0 %3206 }
 0x3ff   :  { %8198 = vpow2.f32 %v3413_v18  ;;  %7868 = vmatpush3.msra.mxu1 %v1821_v5  ;;  %7979 = vmatmul.mubr.msk.f32.gmra.mxu0 %vm3072_vm2, %v10881_v53  ;;  %v3309_v15 = vsub.f32 %v12203_v63, %v3207_v13  ;;  %v3419_v17 = vmul.f32 1.442695, %v3310_v60  ;;  %v12204_v5 = vld [vmem:[#allocation40_spill] sm:$0xff] }
 0x400   :  { %v10965_v33 = vpop.eup %8186  ;;  %8200 = vpow2.f32 %v3415_v22  ;;  %7869 = vmatprep.subr.mxu1 %v1820_v46  ;;  %7981 = vmatprep.mubr.msk.f32.mxu0 %vm3072_vm2, %v10893_v48  ;;  %v3216_v59 = vpop.xlane.xlu1 %3215  ;;  %v1818_v48 = vmul.f32 %v10616_v39, %v12200_v27  ;;  %v12205_v22 = vld [vmem:[#allocation41_spill] sm:$0xff] }
 0x401   :  { %v10971_v58 = vpop.eup %8188  ;;  %v3417_v26 = vmul.f32 1.442695, %v3309_v15  ;;  %v3312_v18 = vsub.f32 %v12204_v5, %v3216_v59  ;;  %7870 = vmatpush3.msra.mxu1 %v1820_v46  ;;  %7829 = vmatprep.mubr.msk.f32.mxu1 %vm3072_vm2, %v10965_v33  ;;  %v1817_v46 = vmul.f32 %v10626_v44, %v12198_v19  ;;  %v12206_v19 = vld [vmem:[#allocation16_spill] sm:$0xff] }
 0x402   :  { %7871 = vmatprep.subr.mxu1 %v1819_v3  ;;  %7830 = vmatmul.mubr.msk.f32.gmra.mxu1 %vm3072_vm2, %v10971_v58  ;;  %v3213_v53 = vpop.xlane.xlu0 %3212 }
 0x403   :  { %8202 = vpow2.f32 %v3417_v26  ;;  %7872 = vmatpush3.msra.mxu1 %v1819_v3  ;;  %7982 = vmatmul.mubr.msk.f32.gmra.mxu0 %vm3072_vm2, %v10899_v37  ;;  %v3311_v51 = vsub.f32 %v12205_v22, %v3213_v53  ;;  %v3423_v13 = vmul.f32 1.442695, %v3312_v18  ;;  %v1816_v37 = vmul.f32 %v10642_v49, %v12200_v27  ;;  %v12209_v53 = vld [vmem:[#allocation43_spill] sm:$0xff] }
 0x404   :  { %v10983_v60 = vpop.eup %8190  ;;  %8204 = vpow2.f32 %v3419_v17  ;;  %7873 = vmatprep.subr.mxu1 %v1818_v48  ;;  %7984 = vmatprep.mubr.msk.f32.mxu0 %vm3072_vm2, %v10911_v55  ;;  %v1839_v17 = vmul.f32 %v10656_v34, %v12206_v19  ;;  %v1837_v34 = vmul.f32 %v10578_v1, %v12206_v19  ;;  %v1835_v1 = vmul.f32 %v10602_v42, %v12206_v19 }
 0x405   :  { %v10989_v63 = vpop.eup %8192  ;;  %v3421_v15 = vmul.f32 1.442695, %v3311_v51  ;;  %7874 = vmatpush3.msra.mxu1 %v1818_v48  ;;  %7832 = vmatprep.mubr.msk.f32.mxu1 %vm3072_vm2, %v10983_v60  ;;  %v1833_v42 = vmul.f32 %v10626_v44, %v12206_v19 }
 0x406   :  { %7875 = vmatprep.subr.mxu1 %v1817_v46  ;;  %7833 = vmatmul.mubr.msk.f32.gmra.mxu1 %vm3072_vm2, %v10989_v63 }
 0x407   :  { %8206 = vpow2.f32 %v3421_v15  ;;  %7876 = vmatpush3.msra.mxu1 %v1817_v46  ;;  %7985 = vmatmul.mubr.msk.f32.gmra.mxu0 %vm3072_vm2, %v10917_v31  ;;  %v12207_v31 = vld [vmem:[#allocation17_spill] sm:$0xff] }
 0x408   :  { %v10999_v55 = vpop.eup %8194  ;;  %8208 = vpow2.f32 %v3423_v13  ;;  %7877 = vmatprep.subr.mxu1 %v1816_v37  ;;  %7987 = vmatprep.mubr.msk.f32.mxu0 %vm3072_vm2, %v10651_v12  ;;  %v1838_v27 = vmul.f32 %v10567_v47, %v12207_v31  ;;  %v1836_v47 = vmul.f32 %v10592_v6, %v12207_v31  ;;  %v1834_v6 = vmul.f32 %v10616_v39, %v12207_v31 }
 0x409   :  { %v11005_v59 = vpop.eup %8196  ;;  %7878 = vmatpush3.msra.mxu1 %v1816_v37  ;;  %7879 = vmatprep.mubr.msk.f32.mxu1 %vm3072_vm2, %v10999_v55  ;;  %v1832_v39 = vmul.f32 %v10642_v49, %v12207_v31  ;;  %v12214_v37 = vmov 0.0  }
 0x40a   :  { %7919 = vmatprep.subr.mxu1 %v1839_v17  ;;  %7880 = vmatmul.mubr.msk.f32.vlgmr.msra.gmra.mxu1 %vm3072_vm2, %v11005_v59 }
 0x40b   :  { %7920 = vmatpush3.msra.mxu1 %v1839_v17  ;;  %7988 = vmatmul.mubr.msk.f32.gmra.mxu0 %vm3072_vm2, %v10667_v52 }
 0x40c   :  { %v11015_v12 = vpop.eup %8198  ;;  %7921 = vmatprep.subr.mxu1 %v1838_v27  ;;  %7990 = vmatprep.mubr.msk.f32.mxu0 %vm3072_vm2, %v10678_v62 }
 0x40d   :  { %v11021_v3 = vpop.eup %8200  ;;  %7922 = vmatpush3.msra.mxu1 %v1838_v27  ;;  %7882 = vmatprep.mubr.msk.f32.mxu1 %vm3072_vm2, %v11015_v12 }
 0x40e   :  { %7923 = vmatprep.subr.mxu1 %v1837_v34  ;;  %7883 = vmatmul.mubr.msk.f32.gmra.mxu1 %vm3072_vm2, %v11021_v3 }
 0x40f   :  { %7924 = vmatpush3.msra.mxu1 %v1837_v34  ;;  %7991 = vmatmul.mubr.msk.f32.gmra.mxu0 %vm3072_vm2, %v10689_v0 }
 0x410   :  { %v11031_v52 = vpop.eup %8202  ;;  %7925 = vmatprep.subr.mxu1 %v1836_v47  ;;  %7993 = vmatprep.mubr.msk.f32.mxu0 %vm3072_vm2, %v10701_v9 }
 0x411   :  { %v11037_v62 = vpop.eup %8204  ;;  %7926 = vmatpush3.msra.mxu1 %v1836_v47  ;;  %7885 = vmatprep.mubr.msk.f32.mxu1 %vm3072_vm2, %v11031_v52 }
 0x412   :  { %7927 = vmatprep.subr.mxu1 %v1835_v1  ;;  %7886 = vmatmul.mubr.msk.f32.gmra.mxu1 %vm3072_vm2, %v11037_v62 }
 0x413   :  { %7928 = vmatpush3.msra.mxu1 %v1835_v1  ;;  %7994 = vmatmul.mubr.msk.f32.gmra.mxu0 %vm3072_vm2, %v10713_v56 }
 0x414   :  { %v11047_v0 = vpop.eup %8206  ;;  %7929 = vmatprep.subr.mxu1 %v1834_v6  ;;  %7996 = vmatprep.mubr.msk.f32.mxu0 %vm3072_vm2, %v10723_v14 }
 0x415   :  { %v11053_v9 = vpop.eup %8208  ;;  %7930 = vmatpush3.msra.mxu1 %v1834_v6  ;;  %7888 = vmatprep.mubr.msk.f32.mxu1 %vm3072_vm2, %v11047_v0 }
 0x416   :  { %7931 = vmatprep.subr.mxu1 %v1833_v42  ;;  %7889 = vmatmul.mubr.msk.f32.gmra.mxu1 %vm3072_vm2, %v11053_v9 }
 0x417   :  { %7932 = vmatpush3.msra.mxu1 %v1833_v42  ;;  %7997 = vmatmul.mubr.msk.f32.gmra.mxu0 %vm3072_vm2, %v10734_v10 }
 0x418   :  { %7933 = vmatprep.subr.mxu1 %v1832_v39  ;;  %7999 = vmatprep.mubr.msk.f32.mxu0 %vm3072_vm2, %v10929_v25 }
 0x419   :  { %7934 = vmatpush3.msra.mxu1 %v1832_v39 }
 0x41b   :  { %8000 = vmatmul.mubr.msk.f32.gmra.mxu0 %vm3072_vm2, %v10935_v36 }
 0x41c   :  { %8002 = vmatprep.mubr.msk.f32.mxu0 %vm3072_vm2, %v10947_v2 }
 0x41f   :  { %8003 = vmatmul.mubr.msk.f32.gmra.mxu0 %vm3072_vm2, %v10953_v21 }
 0x420   :  { %8005 = vmatprep.mubr.msk.f32.mxu0 %vm3072_vm2, %v10965_v33 }
 0x423   :  { %8006 = vmatmul.mubr.msk.f32.gmra.mxu0 %vm3072_vm2, %v10971_v58 }
 0x424   :  { %8008 = vmatprep.mubr.msk.f32.mxu0 %vm3072_vm2, %v10983_v60 }
 0x426   :  { %v3246_v44 = vpop.xlane.xlu1 %3245 }
 0x427   :  { %8009 = vmatmul.mubr.msk.f32.gmra.mxu0 %vm3072_vm2, %v10989_v63  ;;  %v3322_v49 = vsub.f32 %v10633_v41, %v3246_v44 }
 0x428   :  { %8011 = vmatprep.mubr.msk.f32.mxu0 %vm3072_vm2, %v10746_v43  ;;  %v3243_v56 = vpop.xlane.xlu0 %3242 }
 0x429   :  { %v3321_v14 = vsub.f32 %v10647_v61, %v3243_v56  ;;  %v3443_v10 = vmul.f32 1.442695, %v3322_v49 }
 0x42a   :  { %v3252_v25 = vpop.xlane.xlu1 %3251 }
 0x42b   :  { %8012 = vmatmul.mubr.msk.f32.gmra.mxu0 %vm3072_vm2, %v10748_v23  ;;  %v3441_v36 = vmul.f32 1.442695, %v3321_v14  ;;  %v3324_v2 = vsub.f32 %v10661_v11, %v3252_v25 }
 0x42c   :  { %8014 = vmatprep.mubr.msk.f32.mxu0 %vm3072_vm2, %v10756_v24  ;;  %v3249_v21 = vpop.xlane.xlu0 %3248 }
 0x42d   :  { %8210 = vpow2.f32 %v3441_v36  ;;  %v3323_v41 = vsub.f32 %v10670_v54, %v3249_v21  ;;  %v3447_v43 = vmul.f32 1.442695, %v3324_v2 }
 0x42e   :  { %8212 = vpow2.f32 %v3443_v10  ;;  %v3258_v33 = vpop.xlane.xlu1 %3257 }
 0x42f   :  { %8015 = vmatmul.mubr.msk.f32.gmra.mxu0 %vm3072_vm2, %v10760_v50  ;;  %v3445_v61 = vmul.f32 1.442695, %v3323_v41  ;;  %v3326_v58 = vsub.f32 %v10681_v32, %v3258_v33  ;;  %v11231_v41 = vld [vmem:[%s12076_s14] sm:$0xff] }
 0x430   :  { %8017 = vmatprep.mubr.msk.f32.mxu0 %vm3072_vm2, %v10768_v28  ;;  %v3255_v11 = vpop.xlane.xlu0 %3254  ;;  %v12208_v28 = vld [vmem:[#allocation42_spill] sm:$0xff]  ;;  %12231 = vst [vmem:[#allocation36_spill] sm:$0xff] %v11231_v41 }
 0x431   :  { %8214 = vpow2.f32 %v3445_v61  ;;  %v3325_v23 = vsub.f32 %v10693_v57, %v3255_v11  ;;  %v3451_v24 = vmul.f32 1.442695, %v3326_v58 }
 0x432   :  { %8216 = vpow2.f32 %v3447_v43 }
 0x433   :  { %8018 = vmatmul.mubr.msk.f32.gmra.mxu0 %vm3072_vm2, %v10772_v40  ;;  %v3449_v54 = vmul.f32 1.442695, %v3325_v23  ;;  %v3264_v26 = vpop.xlane.xlu1 %3263 }
 0x434   :  { %8020 = vmatprep.mubr.msk.f32.mxu0 %vm3072_vm2, %v10780_v35  ;;  %v3328_v50 = vsub.f32 %v10705_v38, %v3264_v26 }
 0x435   :  { %8218 = vpow2.f32 %v3449_v54  ;;  %v3261_v32 = vpop.xlane.xlu0 %3260 }
 0x436   :  { %8220 = vpow2.f32 %v3451_v24  ;;  %v3327_v5 = vsub.f32 %v12208_v28, %v3261_v32  ;;  %v3455_v18 = vmul.f32 1.442695, %v3328_v50 }
 0x437   :  { %8021 = vmatmul.mubr.msk.f32.gmra.mxu0 %vm3072_vm2, %v12209_v53 }
 0x438   :  { %8023 = vmatprep.mubr.msk.f32.mxu0 %vm3072_vm2, %v10999_v55  ;;  %v3453_v57 = vmul.f32 1.442695, %v3327_v5 }
 0x43a   :  { %v8211_v40 = vpop.eup %8210  ;;  %8222 = vpow2.f32 %v3453_v57 }
 0x43b   :  { %v8213_v48 = vpop.eup %8212  ;;  %8224 = vpow2.f32 %v3455_v18  ;;  %8024 = vmatmul.mubr.msk.f32.gmra.mxu0 %vm3072_vm2, %v11005_v59  ;;  %7935 = vmatprep.mubr.msk.f32.mxu1 %vm3072_vm2, %v8211_v40 }
 0x43c   :  { %8026 = vmatprep.mubr.msk.f32.mxu0 %vm3072_vm2, %v11015_v12  ;;  %7936 = vmatmul.mubr.msk.f32.vlgmr.msra.gmra.mxu1 %vm3072_vm2, %v8213_v48 }
 0x43e   :  { %v8215_v38 = vpop.eup %8214 }
 0x43f   :  { %v8217_v35 = vpop.eup %8216  ;;  %8027 = vmatmul.mubr.msk.f32.gmra.mxu0 %vm3072_vm2, %v11021_v3  ;;  %7938 = vmatprep.mubr.msk.f32.mxu1 %vm3072_vm2, %v8215_v38 }
 0x440   :  { %8029 = vmatprep.mubr.msk.f32.mxu0 %vm3072_vm2, %v11031_v52  ;;  %7939 = vmatmul.mubr.msk.f32.gmra.mxu1 %vm3072_vm2, %v8217_v35 }
 0x442   :  { %v8219_v22 = vpop.eup %8218 }
 0x443   :  { %v8221_v51 = vpop.eup %8220  ;;  %8030 = vmatmul.mubr.msk.f32.gmra.mxu0 %vm3072_vm2, %v11037_v62  ;;  %7941 = vmatprep.mubr.msk.f32.mxu1 %vm3072_vm2, %v8219_v22 }
 0x444   :  { %8032 = vmatprep.mubr.msk.f32.mxu0 %vm3072_vm2, %v11047_v0  ;;  %7942 = vmatmul.mubr.msk.f32.gmra.mxu1 %vm3072_vm2, %v8221_v51 }
 0x447   :  { %v8223_v60 = vpop.eup %8222  ;;  %8033 = vmatmul.mubr.msk.f32.gmra.mxu0 %vm3072_vm2, %v11053_v9 }
 0x448   :  { %v8225_v13 = vpop.eup %8224  ;;  %8035 = vmatprep.mubr.msk.f32.mxu0 %vm3072_vm2, %v10803_v7  ;;  %7944 = vmatprep.mubr.msk.f32.mxu1 %vm3072_vm2, %v8223_v60 }
 0x449   :  { %7945 = vmatmul.mubr.msk.f32.gmra.mxu1 %vm3072_vm2, %v8225_v13 }
 0x44a   :  { %7260 = vmatprep.mubr.msk.f32.mxu1 %vm154_vm0, %v11231_v41 }
 0x44b   :  { %8036 = vmatmul.mubr.msk.f32.gmra.mxu0 %vm3072_vm2, %v10805_v45 }
 0x44c   :  { %8038 = vmatprep.mubr.msk.f32.mxu0 %vm3072_vm2, %v10814_v16 }
 0x44f   :  { %8039 = vmatmul.mubr.msk.f32.gmra.mxu0 %vm3072_vm2, %v10817_v29  ;;  %v11135_v46 = vpop.f32.mrf.mxu0 }
 0x450   :  { %12210 = vst [vmem:[#allocation20_spill] sm:$0xff] %v11135_v46  ;;  %8041 = vmatprep.mubr.msk.f32.mxu0 %vm3072_vm2, %v10828_v8 }
 0x451   :  { %v11139_v63 = vpop.f32.mrf.mxu0 }
 0x452   :  { %12211 = vst [vmem:[#allocation21_spill] sm:$0xff] %v11139_v63 }
 0x453   :  { %8042 = vmatmul.mubr.msk.f32.gmra.mxu0 %vm3072_vm2, %v10831_v30  ;;  %v11143_v7 = vpop.f32.mrf.mxu0 }
 0x454   :  { %8044 = vmatprep.mubr.msk.f32.mxu0 %vm3072_vm2, %v10842_v20 }
 0x455   :  { %v11147_v45 = vpop.f32.mrf.mxu0 }
 0x457   :  { %8045 = vmatmul.mubr.msk.f32.gmra.mxu0 %vm3072_vm2, %v10845_v4  ;;  %v11151_v16 = vpop.f32.mrf.mxu0 }
 0x458   :  { %8047 = vmatprep.mubr.msk.f32.mxu0 %vm3072_vm2, %v8211_v40 }
 0x459   :  { %v11154_v29 = vpop.f32.mrf.mxu0 }
 0x45b   :  { %8048 = vmatmul.mubr.msk.f32.gmra.mxu0 %vm3072_vm2, %v8213_v48  ;;  %v11157_v8 = vpop.f32.mrf.mxu0 }
 0x45c   :  { %8050 = vmatprep.mubr.msk.f32.mxu0 %vm3072_vm2, %v8215_v38 }
 0x45d   :  { %v11160_v30 = vpop.f32.mrf.mxu0 }
 0x45f   :  { %8051 = vmatmul.mubr.msk.f32.gmra.mxu0 %vm3072_vm2, %v8217_v35 }
 0x460   :  { %8053 = vmatprep.mubr.msk.f32.mxu0 %vm3072_vm2, %v8219_v22  ;;  %v11164_v20 = vpop.f32.mrf.mxu0 }
 0x461   :  { %12212 = vst [vmem:[#allocation22_spill] sm:$0xff] %v11164_v20 }
 0x462   :  { %v11166_v4 = vpop.f32.mrf.mxu0 }
 0x463   :  { %12213 = vst [vmem:[#allocation23_spill] sm:$0xff] %v11166_v4  ;;  %8054 = vmatmul.mubr.msk.f32.gmra.mxu0 %vm3072_vm2, %v8221_v51 }
 0x464   :  { %8056 = vmatprep.mubr.msk.f32.mxu0 %vm3072_vm2, %v8223_v60  ;;  %v11170_v15 = vpop.f32.mrf.mxu0 }
 0x466   :  { %v11174_v55 = vpop.f32.mrf.mxu0 }
 0x467   :  { %8057 = vmatmul.mubr.msk.f32.gmra.mxu0 %vm3072_vm2, %v8225_v13 }
 0x468   :  { %5770 = vmatprep.mubr.f32.mxu0 %v12214_v37  ;;  %v11176_v19 = vpop.f32.mrf.mxu0 }
 0x46a   :  { %v11178_v17 = vpop.f32.mrf.mxu0 }
 0x46d   :  { %v11180_v59 = vpop.f32.mrf.mxu0 }
 0x46f   :  { %v11182_v31 = vpop.f32.mrf.mxu0 }
 0x479   :  { %v11184_v27 = vpop.f32.mrf.mxu0 }
 0x47a   :  { %12215 = vst [vmem:[#allocation24_spill] sm:$0xff] %v11184_v27 }
 0x47b   :  { %v11186_v12 = vpop.f32.mrf.mxu0 }
 0x47c   :  { %12216 = vst [vmem:[#allocation25_spill] sm:$0xff] %v11186_v12 }
 0x47d   :  { %v11188_v34 = vpop.f32.mrf.mxu0 }
 0x47e   :  { %12217 = vst [vmem:[#allocation26_spill] sm:$0xff] %v11188_v34 }
 0x47f   :  { %v11190_v3 = vpop.f32.mrf.mxu0 }
 0x480   :  { %12218 = vst [vmem:[#allocation27_spill] sm:$0xff] %v11190_v3 }
 0x481   :  { %v11192_v47 = vpop.f32.mrf.mxu0 }
 0x482   :  { %12219 = vst [vmem:[#allocation28_spill] sm:$0xff] %v11192_v47 }
 0x483   :  { %v11194_v52 = vpop.f32.mrf.mxu0 }
 0x484   :  { %12220 = vst [vmem:[#allocation29_spill] sm:$0xff] %v11194_v52 }
 0x485   :  { %v11196_v1 = vpop.f32.mrf.mxu0 }
 0x486   :  { %12221 = vst [vmem:[#allocation13_spill] sm:$0xff] %v11196_v1 }
 0x487   :  { %v11198_v62 = vpop.f32.mrf.mxu0 }
 0x488   :  { %12222 = vst [vmem:[#allocation19_spill] sm:$0xff] %v11198_v62 }
 0x49a   :  { %v11200_v6 = vpop.f32.mrf.mxu0 }
 0x49b   :  { %12223 = vst [vmem:[#allocation18_spill] sm:$0xff] %v11200_v6 }
 0x49c   :  { %v11202_v0 = vpop.f32.mrf.mxu0 }
 0x49d   :  { %12224 = vst [vmem:[#allocation30_spill] sm:$0xff] %v11202_v0 }
 0x49e   :  { %v11204_v42 = vpop.f32.mrf.mxu0 }
 0x49f   :  { %12225 = vst [vmem:[#allocation31_spill] sm:$0xff] %v11204_v42 }
 0x4a0   :  { %v11206_v9 = vpop.f32.mrf.mxu0 }
 0x4a1   :  { %12226 = vst [vmem:[#allocation32_spill] sm:$0xff] %v11206_v9 }
 0x4a2   :  { %v11208_v39 = vpop.f32.mrf.mxu0 }
 0x4a3   :  { %12227 = vst [vmem:[#allocation33_spill] sm:$0xff] %v11208_v39 }
 0x4a4   :  { %v11210_v44 = vpop.f32.mrf.mxu0 }
 0x4a5   :  { %12228 = vst [vmem:[#allocation34_spill] sm:$0xff] %v11210_v44 }
 0x4a6   :  { %v11212_v49 = vpop.f32.mrf.mxu0 }
 0x4a7   :  { %12229 = vst [vmem:[#allocation35_spill] sm:$0xff] %v11212_v49 }
 0x4a8   :  { %v11214_v56 = vpop.f32.mrf.mxu0 }
 0x4a9   :  { %12230 = vst [vmem:[#allocation14_spill] sm:$0xff] %v11214_v56 }
 0x4aa   :  { %v11216_v14 = vpop.f32.mrf.mxu0  ;;  %v11239_v61 = vpop.f32.mrf.mxu1 }
 0x4ac   :  { %v11218_v10 = vpop.f32.mrf.mxu0  ;;  %v11245_v23 = vpop.f32.mrf.mxu1 }
 0x4ae   :  { %v11249_v26 = vpop.f32.mrf.mxu1 }
 0x4af   :  { %v11220_v25 = vpop.f32.mrf.mxu0 }
 0x4b0   :  { %v11251_v28 = vpop.f32.mrf.mxu1 }
 0x4b1   :  { %v11222_v36 = vpop.f32.mrf.mxu0 }
 0x4b2   :  { %v11253_v53 = vpop.f32.mrf.mxu1 }
 0x4b3   :  { %v11224_v2 = vpop.f32.mrf.mxu0 }
 0x4b4   :  { %v11259_v48 = vpop.f32.mrf.mxu1 }
 0x4b5   :  { %v11226_v21 = vpop.f32.mrf.mxu0 }
 0x4b6   :  { %v7778_v22 = vpop.f32.mrf.mxu1 }
 0x4b7   :  { %v11235_v43 = vpop.f32.mrf.mxu0 }
 0x4b8   :  { %v3706_v13 = vpop.f32.mrf.mxu1 }
 0x4b9   :  { %v11237_v33 = vpop.f32.mrf.mxu0 }
 0x4ba   :  { %v11273_v0 = vpop.f32.mrf.mxu1 }
 0x4bb   :  { %v11241_v58 = vpop.f32.mrf.mxu0 }
 0x4bc   :  { %v11277_v3 = vpop.f32.mrf.mxu1 }
 0x4bd   :  { %v11243_v11 = vpop.f32.mrf.mxu0 }
 0x4be   :  { %v11279_v42 = vpop.f32.mrf.mxu1 }
 0x4bf   :  { %v7980_v24 = vpop.f32.mrf.mxu0 }
 0x4c0   :  { %v11281_v47 = vpop.f32.mrf.mxu1 }
 0x4c1   :  { %v11247_v54 = vpop.f32.mrf.mxu0 }
 0x4c2   :  { %v7831_v56 = vpop.f32.mrf.mxu1 }
 0x4c3   :  { %v7983_v50 = vpop.f32.mrf.mxu0 }
 0x4c4   :  { %v3954_v41 = vpop.f32.mrf.mxu1 }
 0x4c5   :  { %v4615_v32 = vpop.f32.mrf.mxu0 }
 0x4c7   :  { %v7986_v5 = vpop.f32.mrf.mxu0 }
 0x4c8   :  { %8226 = vrcp.f32 %v7986_v5  ;;  %v7834_v5 = vpop.f32.mrf.mxu1 }
 0x4c9   :  { %v4625_v18 = vpop.f32.mrf.mxu0 }
 0x4cb   :  { %v11255_v57 = vpop.f32.mrf.mxu0 }
 0x4cd   :  { %v11257_v40 = vpop.f32.mrf.mxu0 }
 0x4cf   :  { %v11261_v38 = vpop.f32.mrf.mxu0 }
 0x4d1   :  { %v11263_v35 = vpop.f32.mrf.mxu0 }
 0x4d3   :  { %v11265_v51 = vpop.f32.mrf.mxu0 }
 0x4d5   :  { %v11267_v60 = vpop.f32.mrf.mxu0 }
 0x4d7   :  { %v11269_v37 = vpop.f32.mrf.mxu0 }
 0x4d9   :  { %v11271_v12 = vpop.f32.mrf.mxu0 }
 0x4db   :  { %v8001_v27 = vpop.f32.mrf.mxu0 }
 0x4dd   :  { %v11275_v6 = vpop.f32.mrf.mxu0 }
 0x4df   :  { %v8004_v9 = vpop.f32.mrf.mxu0 }
 0x4e1   :  { %v4685_v34 = vpop.f32.mrf.mxu0 }
 0x4e3   :  { %v8007_v52 = vpop.f32.mrf.mxu0 }
 0x4e5   :  { %v4695_v44 = vpop.f32.mrf.mxu0 }
 0x4e7   :  { %v8010_v39 = vpop.f32.mrf.mxu0 }
 0x4e8   :  { %8228 = vrcp.f32 %v8010_v39  ;;  %v8227_v39 = vpop.eup %8226 }
 0x4e9   :  { %v4705_v62 = vpop.f32.mrf.mxu0  ;;  %v4953_v20 = vmul.f32 %v8227_v39, %v7778_v22 }
 0x4ea   :  { %8230 = vrcp.f32 %v4705_v62 }
 0x4eb   :  { %8232 = vrcp.f32 %v4625_v18  ;;  %v11283_v1 = vpop.f32.mrf.mxu0 }
 0x4ec   :  { %12232 = vst [vmem:[#allocation15_spill] sm:$0xff] %v11283_v1  ;;  %8234 = vrcp.f32 %v8007_v52 }
 0x4ed   :  { %v11285_v49 = vpop.f32.mrf.mxu0  ;;  %8236 = vrcp.f32 %v7983_v50 }
 0x4ee   :  { %12233 = vst [vmem:[#allocation37_spill] sm:$0xff] %v11285_v49  ;;  %8238 = vrcp.f32 %v4695_v44  ;;  %v3964_v49 = vpop.f32.mrf.mxu1 }
 0x4ef   :  { %v11287_v63 = vpop.f32.mrf.mxu0  ;;  %8240 = vrcp.f32 %v4615_v32 }
 0x4f0   :  { %12234 = vst [vmem:[#allocation38_spill] sm:$0xff] %v11287_v63  ;;  %8242 = vrcp.f32 %v8004_v9 }
 0x4f1   :  { %v11289_v4 = vpop.f32.mrf.mxu0  ;;  %8244 = vrcp.f32 %v7980_v24 }
 0x4f2   :  { %12235 = vst [vmem:[#allocation39_spill] sm:$0xff] %v11289_v4  ;;  %8246 = vrcp.f32 %v4685_v34  ;;  %v5356_v34 = vld [vmem:[%s12077_s15] sm:$0xff] }
 0x4f3   :  { %v11291_v46 = vpop.f32.mrf.mxu0  ;;  %8248 = vrcp.f32 %v11247_v54  ;;  %v5525_v54 = vld [vmem:[%s12081_s19 + $0x20] sm:$0xff] }
 0x4f4   :  { %8250 = vrcp.f32 %v8001_v27 }
 0x4f5   :  { %v8229_v62 = vpop.eup %8228  ;;  %v11293_v18 = vpop.f32.mrf.mxu0  ;;  %8252 = vrcp.f32 %v11241_v58  ;;  %v5474_v58 = vld [vmem:[%s12078_s16 + $0x8] sm:$0xff] }
 0x4f6   :  { %v4969_v1 = vmul.f32 %v8229_v62, %v7834_v5  ;;  %8254 = vrcp.f32 %v11275_v6 }
 0x4f7   :  { %v8231_v52 = vpop.eup %8230  ;;  %v11295_v50 = vpop.f32.mrf.mxu0  ;;  %8256 = vrcp.f32 %v11243_v11  ;;  %v5473_v11 = vld [vmem:[%s12078_s16] sm:$0xff] }
 0x4f8   :  { %v8233_v63 = vpop.eup %8232  ;;  %7228 = vmatprep.subr.msk.mxu1 %vm154_vm0, %v4969_v1  ;;  %v4968_v44 = vmul.f32 %v8231_v52, %v3964_v49  ;;  %v11308_v49 = vpop.f32.mrf.mxu1  ;;  %8258 = vrcp.f32 %v11269_v37 }
 0x4f9   :  { %v8235_v32 = vpop.eup %8234  ;;  %v11298_v4 = vpop.f32.mrf.mxu0  ;;  %7229 = vmatpush3.xpose.msk.msra.mxu1 %vm154_vm0, %v4953_v20  ;;  %v4952_v24 = vmul.f32 %v8233_v63, %v3706_v13  ;;  %v8460_v20 = vmov 0   ;;  %v5357_v63 = vld [vmem:[%s12077_s15 + $0x8] sm:$0xff]  ;;  %8260 = vrcp.f32 %v11235_v43 }
 0x4fa   :  { %7230 = vmatprep.subr.msk.mxu1 %vm154_vm0, %v4968_v44  ;;  %v8237_v5 = vpop.eup %8236  ;;  %v4967_v22 = vmul.f32 %v8235_v32, %v7831_v56  ;;  %8064 = vset.pattern.permute.xlu0 %v8460_v20  ;;  %v11325_v44 = vpop.f32.mrf.mxu1  ;;  %8262 = vrcp.f32 %v11271_v12  ;;  %v5494_v43 = vld [vmem:[%s12079_s17 + $0x8] sm:$0xff] }
 0x4fb   :  { %v11303_v9 = vpop.f32.mrf.mxu0  ;;  %v8239_v1 = vpop.eup %8238  ;;  %5360 = vperm.xlu0 %8064, %v5356_v34   ;;  %v4951_v56 = vmul.f32 %v8237_v5, %v11253_v53  ;;  %8065 = vset.pattern.permute.xlu1 %v8460_v20  ;;  %8264 = vrcp.f32 %v11237_v33  ;;  %v5493_v33 = vld [vmem:[%s12079_s17] sm:$0xff] }
 0x4fc   :  { %v8241_v13 = vpop.eup %8240  ;;  %v4966_v62 = vmul.f32 %v8239_v1, %v3954_v41  ;;  %5365 = vperm.xlu1 %8065, %v5357_v63   ;;  %v5523_v41 = vld [vmem:[%s12081_s19 + $0x10] sm:$0xff]  ;;  %v11343_v34 = vpop.f32.mrf.mxu1  ;;  %8266 = vrcp.f32 %v11265_v51 }
 0x4fd   :  { %v11310_v39 = vpop.f32.mrf.mxu0  ;;  %7231 = vmatpush3.xpose.msk.msra.mxu1 %vm154_vm0, %v4952_v24  ;;  %v8243_v52 = vpop.eup %8242  ;;  %v4950_v6 = vmul.f32 %v8241_v13, %v11259_v48  ;;  %v5521_v48 = vld [vmem:[%s12081_s19] sm:$0xff]  ;;  %8268 = vrcp.f32 %v11224_v2  ;;  %v5528_v2 = vld [vmem:[%s12081_s19 + $0x38] sm:$0xff] }
 0x4fe   :  { %7232 = vmatprep.subr.msk.mxu1 %vm154_vm0, %v4967_v22  ;;  %v8245_v24 = vpop.eup %8244  ;;  %v4965_v5 = vmul.f32 %v8243_v52, %v11279_v42  ;;  %8270 = vrcp.f32 %v11267_v60 }
 0x4ff   :  { %v11318_v27 = vpop.f32.mrf.mxu0  ;;  %5551 = vperm.xlu0 %8064, %v5525_v54   ;;  %v8247_v22 = vpop.eup %8246  ;;  %v4949_v42 = vmul.f32 %v8245_v24, %v11249_v26  ;;  %v6110_v26 = vld [vmem:[%s12083_s21 + $0x8] sm:$0xff]  ;;  %8272 = vrcp.f32 %v11226_v21  ;;  %v5527_v21 = vld [vmem:[%s12081_s19 + $0x30] sm:$0xff] }
 0x500   :  { %5482 = vperm.xlu1 %8065, %v5474_v58   ;;  %v8249_v20 = vpop.eup %8248  ;;  %v4964_v63 = vmul.f32 %v8247_v22, %v11281_v47  ;;  %v11361_v54 = vpop.f32.mrf.mxu1  ;;  %8274 = vrcp.f32 %v11261_v38 }
 0x501   :  { %v11327_v32 = vpop.f32.mrf.mxu0  ;;  %7233 = vmatpush3.xpose.msk.msra.mxu1 %vm154_vm0, %v4951_v56  ;;  %v8251_v56 = vpop.eup %8250  ;;  %v4948_v47 = vmul.f32 %v8249_v20, %v11251_v28  ;;  %8276 = vrcp.f32 %v11220_v25  ;;  %v5526_v25 = vld [vmem:[%s12081_s19 + $0x28] sm:$0xff] }
 0x502   :  { %7234 = vmatprep.subr.msk.mxu1 %vm154_vm0, %v4966_v62  ;;  %v8253_v62 = vpop.eup %8252  ;;  %v4963_v52 = vmul.f32 %v8251_v56, %v11273_v0  ;;  %8278 = vrcp.f32 %v11263_v35 }
 0x503   :  { %v11335_v53 = vpop.f32.mrf.mxu0  ;;  %5541 = vperm.xlu0 %8064, %v5523_v41   ;;  %v8255_v58 = vpop.eup %8254  ;;  %v4947_v0 = vmul.f32 %v8253_v62, %v11239_v61  ;;  %8280 = vrcp.f32 %v11222_v36  ;;  %v5524_v36 = vld [vmem:[%s12081_s19 + $0x18] sm:$0xff] }
 0x504   :  { %5477 = vperm.xlu1 %8065, %v5473_v11   ;;  %v8257_v51 = vpop.eup %8256  ;;  %v4962_v24 = vmul.f32 %v8255_v58, %v11277_v3  ;;  %8282 = vrcp.f32 %v11255_v57 }
 0x505   :  { %v11345_v1 = vpop.f32.mrf.mxu0  ;;  %7235 = vmatpush3.xpose.msk.msra.mxu1 %vm154_vm0, %v4950_v6  ;;  %v11379_v6 = vpop.f32.mrf.mxu1  ;;  %v4946_v3 = vmul.f32 %v8257_v51, %v11245_v23  ;;  %8284 = vrcp.f32 %v11216_v14 }
 0x506   :  { %7236 = vmatprep.subr.msk.mxu1 %vm154_vm0, %v4965_v5  ;;  %v8259_v5 = vpop.eup %8258  ;;  %8286 = vrcp.f32 %v11257_v40 }
 0x507   :  { %v11353_v37 = vpop.f32.mrf.mxu0  ;;  %5531 = vperm.xlu0 %8064, %v5521_v48   ;;  %v11394_v22 = vpop.f32.mrf.mxu1  ;;  %8288 = vrcp.f32 %v11218_v10 }
 0x508   :  { %5502 = vperm.xlu1 %8065, %v5494_v43   ;;  %v8261_v60 = vpop.eup %8260  ;;  %8290 = vrcp.f32 %v11353_v37 }
 0x509   :  { %v11363_v13 = vpop.f32.mrf.mxu0  ;;  %7237 = vmatpush3.xpose.msk.msra.mxu1 %vm154_vm0, %v4949_v42  ;;  %v4961_v42 = vmul.f32 %v8259_v5, %v11180_v59  ;;  %v8263_v48 = vpop.eup %8262  ;;  %v4945_v59 = vmul.f32 %v8261_v60, %v11157_v8 }
 0x50a   :  { %7238 = vmatprep.subr.msk.mxu1 %vm154_vm0, %v4964_v63  ;;  %v11409_v20 = vpop.f32.mrf.mxu1  ;;  %v8265_v38 = vpop.eup %8264  ;;  %v4960_v56 = vmul.f32 %v8263_v48, %v11182_v31  ;;  %v6109_v48 = vld [vmem:[%s12083_s21] sm:$0xff] }
 0x50b   :  { %v11371_v12 = vpop.f32.mrf.mxu0  ;;  %6118 = vperm.xlu0 %8064, %v6110_v26   ;;  %v8267_v43 = vpop.eup %8266  ;;  %v4944_v31 = vmul.f32 %v8265_v38, %v11160_v30 }
 0x50c   :  { %5497 = vperm.xlu1 %8065, %v5493_v33   ;;  %v8269_v62 = vpop.eup %8268 }
 0x50d   :  { %v11381_v41 = vpop.f32.mrf.mxu0  ;;  %7239 = vmatpush3.xpose.msk.msra.mxu1 %vm154_vm0, %v4948_v47  ;;  %v11424_v47 = vpop.f32.mrf.mxu1  ;;  %v4943_v57 = vmul.f32 %v8269_v62, %v11151_v16 }
 0x50e   :  { %7240 = vmatprep.subr.msk.mxu1 %vm154_vm0, %v4963_v52  ;;  %v4959_v52 = vmul.f32 %v8267_v43, %v11176_v19  ;;  %v8271_v58 = vpop.eup %8270 }
 0x50f   :  { %v11389_v28 = vpop.f32.mrf.mxu0  ;;  %v11434_v8 = vpop.f32.mrf.mxu1  ;;  %v4958_v51 = vmul.f32 %v8271_v58, %v11178_v17 }
 0x510   :  { %5566 = vperm.xlu1 %8065, %v5528_v2   ;;  %v8273_v19 = vpop.eup %8272  ;;  %v5522_v2 = vld [vmem:[%s12081_s19 + $0x8] sm:$0xff] }
 0x511   :  { %v11396_v11 = vpop.f32.mrf.mxu0  ;;  %7241 = vmatpush3.xpose.msk.msra.mxu1 %vm154_vm0, %v4947_v0  ;;  %v11449_v30 = vpop.f32.mrf.mxu1  ;;  %v4942_v40 = vmul.f32 %v8273_v19, %v11154_v29  ;;  %v12239_v19 = vld [vmem:[#allocation21_spill] sm:$0xff] }
 0x512   :  { %7242 = vmatprep.subr.msk.mxu1 %vm154_vm0, %v4962_v24  ;;  %v8275_v24 = vpop.eup %8274 }
 0x513   :  { %v11404_v61 = vpop.f32.mrf.mxu0  ;;  %v11460_v14 = vpop.f32.mrf.mxu1  ;;  %v4957_v17 = vmul.f32 %v8275_v24, %v11170_v15 }
 0x514   :  { %5561 = vperm.xlu1 %8065, %v5527_v21  }
 0x515   :  { %v11411_v63 = vpop.f32.mrf.mxu0  ;;  %7243 = vmatpush3.xpose.msk.msra.mxu1 %vm154_vm0, %v4946_v3  ;;  %v8277_v3 = vpop.eup %8276 }
 0x516   :  { %7244 = vmatprep.subr.msk.mxu1 %vm154_vm0, %v4961_v42  ;;  %v8279_v60 = vpop.eup %8278  ;;  %v11469_v10 = vpop.f32.mrf.mxu1  ;;  %v4941_v29 = vmul.f32 %v8277_v3, %v11143_v7  ;;  %v12236_v7 = vld [vmem:[#allocation22_spill] sm:$0xff] }
 0x517   :  { %v11419_v23 = vpop.f32.mrf.mxu0  ;;  %v4956_v15 = vmul.f32 %v8279_v60, %v11174_v55  ;;  %v12240_v60 = vld [vmem:[#allocation36_spill] sm:$0xff] }
 0x518   :  { %5556 = vperm.xlu1 %8065, %v5526_v25   ;;  %v7943_v43 = vpop.f32.mrf.mxu1 }
 0x519   :  { %v11426_v26 = vpop.f32.mrf.mxu0  ;;  %7245 = vmatpush3.xpose.msk.msra.mxu1 %vm154_vm0, %v4945_v59  ;;  %v8281_v59 = vpop.eup %8280 }
 0x51a   :  { %7246 = vmatprep.subr.msk.mxu1 %vm154_vm0, %v4960_v56  ;;  %v8283_v38 = vpop.eup %8282  ;;  %v4940_v37 = vmul.f32 %v8281_v59, %v11147_v45  ;;  %v4470_v55 = vpop.f32.mrf.mxu1 }
 0x51b   :  { %v11436_v35 = vpop.f32.mrf.mxu0  ;;  %v8285_v25 = vpop.eup %8284 }
 0x51c   :  { %5546 = vperm.xlu1 %8065, %v5524_v36   ;;  %v8287_v62 = vpop.eup %8286  ;;  %v7946_v45 = vpop.f32.mrf.mxu1 }
 0x51d   :  { %v11441_v33 = vpop.f32.mrf.mxu0  ;;  %7247 = vmatpush3.xpose.msk.msra.mxu1 %vm154_vm0, %v4944_v31  ;;  %v4955_v31 = vmul.f32 %v8283_v38, %v12236_v7  ;;  %v8289_v36 = vpop.eup %8288 }
 0x51e   :  { %7248 = vmatprep.subr.msk.mxu1 %vm154_vm0, %v4959_v52  ;;  %v12237_v52 = vld [vmem:[#allocation20_spill] sm:$0xff]  ;;  %v8291_v24 = vpop.eup %8290  ;;  %v4480_v3 = vpop.f32.mrf.mxu1 }
 0x51f   :  { %v8052_v0 = vpop.f32.mrf.mxu0  ;;  %v4939_v58 = vmul.f32 %v8285_v25, %v12237_v52  ;;  %v12246_v25 = vld [vmem:[#allocation19_spill] sm:$0xff] }
 0x520   :  { %5536 = vperm.xlu1 %8065, %v5522_v2  }
 0x521   :  { %v4845_v5 = vpop.f32.mrf.mxu0  ;;  %7249 = vmatpush3.xpose.msk.msra.mxu1 %vm154_vm0, %v4943_v57  ;;  %v12238_v57 = vld [vmem:[#allocation23_spill] sm:$0xff] }
 0x522   :  { %7250 = vmatprep.subr.msk.mxu1 %vm154_vm0, %v4958_v51  ;;  %v4938_v51 = vmul.f32 %v8289_v36, %v12239_v19 }
 0x523   :  { %v8055_v16 = vpop.f32.mrf.mxu0 }
 0x524   :  { %6113 = vperm.xlu1 %8065, %v6109_v48  }
 0x525   :  { %v4855_v42 = vpop.f32.mrf.mxu0  ;;  %7251 = vmatpush3.xpose.msk.msra.mxu1 %vm154_vm0, %v4942_v40 }
 0x526   :  { %7252 = vmatprep.subr.msk.mxu1 %vm154_vm0, %v4957_v17 }
 0x527   :  { %v8058_v21 = vpop.f32.mrf.mxu0 }
 0x528   :  { %8292 = vrcp.f32 %v8058_v21 }
 0x529   :  { %v4865_v56 = vpop.f32.mrf.mxu0  ;;  %7253 = vmatpush3.xpose.msk.msra.mxu1 %vm154_vm0, %v4941_v29 }
 0x52a   :  { %8294 = vrcp.f32 %v4865_v56  ;;  %7254 = vmatprep.subr.msk.mxu1 %vm154_vm0, %v4956_v15 }
 0x52b   :  { %8296 = vrcp.f32 %v11363_v13  ;;  %v4954_v13 = vmul.f32 %v8287_v62, %v12238_v57  ;;  %v12247_v62 = vld [vmem:[#allocation33_spill] sm:$0xff] }
 0x52c   :  { %8298 = vrcp.f32 %v8055_v16  ;;  %v11492_v16 = vld [vmem:[%s12076_s14 + $0x8] sm:$0xff] }
 0x52d   :  { %7255 = vmatpush3.xpose.msk.msra.mxu1 %vm154_vm0, %v4940_v37  ;;  %8300 = vrcp.f32 %v11335_v53 }
 0x52e   :  { %7256 = vmatprep.subr.msk.mxu1 %vm154_vm0, %v4955_v31  ;;  %8302 = vrcp.f32 %v4855_v42 }
 0x52f   :  { %8304 = vrcp.f32 %v11345_v1  ;;  %v4985_v1 = vmul.f32 %v8291_v24, %v11409_v20 }
 0x530   :  { %8306 = vrcp.f32 %v8052_v0 }
 0x531   :  { %7257 = vmatpush3.xpose.msk.msra.mxu1 %vm154_vm0, %v4939_v58  ;;  %8308 = vrcp.f32 %v11318_v27  ;;  %v12249_v58 = vld [vmem:[#allocation28_spill] sm:$0xff] }
 0x532   :  { %7258 = vmatprep.subr.msk.mxu1 %vm154_vm0, %v4954_v13  ;;  %8310 = vrcp.f32 %v4845_v5  ;;  %v12250_v13 = vld [vmem:[#allocation34_spill] sm:$0xff] }
 0x533   :  { %8312 = vrcp.f32 %v11327_v32 }
 0x534   :  { %8314 = vrcp.f32 %v11436_v35 }
 0x535   :  { %v8293_v2 = vpop.eup %8292  ;;  %7259 = vmatpush3.xpose.msk.msra.mxu1 %vm154_vm0, %v4938_v51  ;;  %8316 = vrcp.f32 %v11303_v9  ;;  %v12252_v51 = vld [vmem:[#allocation29_spill] sm:$0xff] }
 0x536   :  { %v5001_v53 = vmul.f32 %v8293_v2, %v7946_v45  ;;  %8318 = vrcp.f32 %v11441_v33 }
 0x537   :  { %v8295_v40 = vpop.eup %8294  ;;  %8320 = vrcp.f32 %v11310_v39 }
 0x538   :  { %v8297_v17 = vpop.eup %8296  ;;  %7261 = vmatmul.mubr.msk.f32.vlgmr.msra.gmra.mxu1 %vm154_vm0, %v12240_v60  ;;  %7264 = vmatprep.subr.msk.mxu1 %vm154_vm0, %v5001_v53  ;;  %v5000_v0 = vmul.f32 %v8295_v40, %v4480_v3  ;;  %8322 = vrcp.f32 %v11419_v23  ;;  %v12253_v53 = vld [vmem:[#allocation31_spill] sm:$0xff] }
 0x539   :  { %v8299_v42 = vpop.eup %8298  ;;  %7265 = vmatpush3.xpose.msk.msra.mxu1 %vm154_vm0, %v4985_v1  ;;  %7262 = vmatprep.mubr.msk.f32.mxu1 %vm154_vm0, %v11492_v16  ;;  %v4984_v27 = vmul.f32 %v8297_v17, %v11424_v47  ;;  %8324 = vrcp.f32 %v11295_v50 }
 0x53a   :  { %7266 = vmatprep.subr.msk.mxu1 %vm154_vm0, %v5000_v0  ;;  %v8301_v20 = vpop.eup %8300  ;;  %v4999_v5 = vmul.f32 %v8299_v42, %v7943_v43  ;;  %8326 = vrcp.f32 %v11426_v26  ;;  %v12255_v0 = vld [vmem:[#allocation32_spill] sm:$0xff] }
 0x53b   :  { %v8303_v48 = vpop.eup %8302  ;;  %v4983_v32 = vmul.f32 %v8301_v20, %v11379_v6  ;;  %8328 = vrcp.f32 %v11298_v4  ;;  %v12256_v20 = vld [vmem:[#allocation27_spill] sm:$0xff] }
 0x53c   :  { %7263 = vmatmul.mubr.msk.f32.gmra.mxu1 %vm154_vm0, %v11492_v16  ;;  %v8305_v47 = vpop.eup %8304  ;;  %v4998_v35 = vmul.f32 %v8303_v48, %v4470_v55  ;;  %8330 = vrcp.f32 %v11404_v61 }
 0x53d   :  { %7267 = vmatpush3.xpose.msk.msra.mxu1 %vm154_vm0, %v4984_v27  ;;  %7296 = vmatprep.mubr.msk.f32.mxu1 %vm154_vm0, %v12240_v60  ;;  %v8307_v21 = vpop.eup %8306  ;;  %v4982_v29 = vmul.f32 %v8305_v47, %v11394_v22  ;;  %8332 = vrcp.f32 %v11291_v46  ;;  %v12241_v46 = vld [vmem:[#allocation35_spill] sm:$0xff] }
 0x53e   :  { %7268 = vmatprep.subr.msk.mxu1 %vm154_vm0, %v4999_v5  ;;  %v8309_v59 = vpop.eup %8308  ;;  %v4997_v9 = vmul.f32 %v8307_v21, %v11460_v14  ;;  %8334 = vrcp.f32 %v11411_v63  ;;  %v12242_v63 = vld [vmem:[#allocation38_spill] sm:$0xff]  ;;  %v12258_v21 = vld [vmem:[#allocation24_spill] sm:$0xff] }
 0x53f   :  { %v8311_v15 = vpop.eup %8310  ;;  %v4981_v6 = vmul.f32 %v8309_v59, %v11343_v34  ;;  %8336 = vrcp.f32 %v11293_v18  ;;  %v12244_v18 = vld [vmem:[#allocation14_spill] sm:$0xff] }
 0x540   :  { %v8313_v33 = vpop.eup %8312  ;;  %v4996_v39 = vmul.f32 %v8311_v15, %v11469_v10  ;;  %8338 = vrcp.f32 %v11389_v28  ;;  %v12245_v28 = vld [vmem:[#allocation39_spill] sm:$0xff] }
 0x541   :  { %7269 = vmatpush3.xpose.msk.msra.mxu1 %vm154_vm0, %v4983_v32  ;;  %v8315_v22 = vpop.eup %8314  ;;  %v4980_v23 = vmul.f32 %v8313_v33, %v11361_v54  ;;  %8340 = vrcp.f32 %v12242_v63  ;;  %v12257_v32 = vld [vmem:[#allocation18_spill] sm:$0xff] }
 0x542   :  { %7270 = vmatprep.subr.msk.mxu1 %vm154_vm0, %v4998_v35  ;;  %v8317_v14 = vpop.eup %8316  ;;  %v4995_v50 = vmul.f32 %v8315_v22, %v11434_v8  ;;  %8342 = vrcp.f32 %v11396_v11  ;;  %v12248_v11 = vld [vmem:[#allocation15_spill] sm:$0xff] }
 0x543   :  { %v8319_v34 = vpop.eup %8318  ;;  %v4979_v26 = vmul.f32 %v8317_v14, %v11308_v49  ;;  %8344 = vrcp.f32 %v12245_v28  ;;  %v12262_v14 = vld [vmem:[#allocation5_spill] sm:$0xff] }
 0x544   :  { %v8321_v10 = vpop.eup %8320  ;;  %v4994_v4 = vmul.f32 %v8319_v34, %v11449_v30  ;;  %v12243_v30 = vld [vmem:[#allocation13_spill] sm:$0xff]  ;;  %8346 = vrcp.f32 %v11371_v12 }
 0x545   :  { %7271 = vmatpush3.xpose.msk.msra.mxu1 %vm154_vm0, %v4982_v29  ;;  %v8323_v54 = vpop.eup %8322  ;;  %v4978_v61 = vmul.f32 %v8321_v10, %v11325_v44  ;;  %8348 = vrcp.f32 %v12248_v11  ;;  %v12251_v12 = vld [vmem:[#allocation37_spill] sm:$0xff] }
 0x546   :  { %7272 = vmatprep.subr.msk.mxu1 %vm154_vm0, %v4997_v9  ;;  %v8325_v8 = vpop.eup %8324  ;;  %v4993_v38 = vmul.f32 %v8323_v54, %v12241_v46  ;;  %8350 = vrcp.f32 %v11381_v41  ;;  %v12254_v41 = vld [vmem:[#allocation26_spill] sm:$0xff] }
 0x547   :  { %v8327_v49 = vpop.eup %8326  ;;  %v4977_v56 = vmul.f32 %v8325_v8, %v12243_v30  ;;  %8352 = vrcp.f32 %v12251_v12  ;;  %v12259_v9 = vld [vmem:[#allocation30_spill] sm:$0xff] }
 0x548   :  { %v8329_v43 = vpop.eup %8328  ;;  %v4992_v37 = vmul.f32 %v8327_v49, %v12244_v18 }
 0x549   :  { %7273 = vmatpush3.xpose.msk.msra.mxu1 %vm154_vm0, %v4981_v6  ;;  %v8331_v44 = vpop.eup %8330  ;;  %v4976_v7 = vmul.f32 %v8329_v43, %v12246_v25  ;;  %v12260_v6 = vld [vmem:[#allocation25_spill] sm:$0xff] }
 0x54a   :  { %7274 = vmatprep.subr.msk.mxu1 %vm154_vm0, %v4996_v39  ;;  %v8333_v31 = vpop.eup %8332  ;;  %v4991_v55 = vmul.f32 %v8331_v44, %v12247_v62  ;;  %v12261_v39 = vmov 0.0  }
 0x54b   :  { %v8335_v52 = vpop.eup %8334  ;;  %v4975_v36 = vmul.f32 %v8333_v31, %v12249_v58 }
 0x54c   :  { %v8337_v57 = vpop.eup %8336  ;;  %v4990_v45 = vmul.f32 %v8335_v52, %v12250_v13 }
 0x54d   :  { %7275 = vmatpush3.xpose.msk.msra.mxu1 %vm154_vm0, %v4980_v23  ;;  %v8339_v19 = vpop.eup %8338  ;;  %v4974_v24 = vmul.f32 %v8337_v57, %v12252_v51 }
 0x54e   :  { %7276 = vmatprep.subr.msk.mxu1 %vm154_vm0, %v4995_v50  ;;  %v8341_v2 = vpop.eup %8340  ;;  %v4989_v40 = vmul.f32 %v8339_v19, %v12253_v53 }
 0x54f   :  { %v8343_v3 = vpop.eup %8342  ;;  %v4973_v1 = vmul.f32 %v8341_v2, %v12254_v41 }
 0x550   :  { %v8345_v17 = vpop.eup %8344  ;;  %v4988_v42 = vmul.f32 %v8343_v3, %v12255_v0 }
 0x551   :  { %7277 = vmatpush3.xpose.msk.msra.mxu1 %vm154_vm0, %v4979_v26  ;;  %v8347_v27 = vpop.eup %8346  ;;  %v4972_v5 = vmul.f32 %v8345_v17, %v12256_v20 }
 0x552   :  { %7278 = vmatprep.subr.msk.mxu1 %vm154_vm0, %v4994_v4  ;;  %v8349_v48 = vpop.eup %8348  ;;  %v4987_v47 = vmul.f32 %v8347_v27, %v12257_v32  ;;  %v12263_v4 = vld [vmem:[#allocation6_spill] sm:$0xff] }
 0x553   :  { %v8351_v35 = vpop.eup %8350  ;;  %v4971_v29 = vmul.f32 %v8349_v48, %v12258_v21 }
 0x554   :  { %v8353_v59 = vpop.eup %8352  ;;  %v4986_v15 = vmul.f32 %v8351_v35, %v12259_v9 }
 0x555   :  { %7279 = vmatpush3.xpose.msk.msra.mxu1 %vm154_vm0, %v4978_v61  ;;  %v4970_v33 = vmul.f32 %v8353_v59, %v12260_v6 }
 0x556   :  { %7280 = vmatprep.subr.msk.mxu1 %vm154_vm0, %v4993_v38  ;;  %v12265_v38 = vld [vmem:[#allocation8_spill] sm:$0xff] }
 0x559   :  { %7281 = vmatpush3.xpose.msk.msra.mxu1 %vm154_vm0, %v4977_v56 }
 0x55a   :  { %7282 = vmatprep.subr.msk.mxu1 %vm154_vm0, %v4992_v37 }
 0x55d   :  { %7283 = vmatpush3.xpose.msk.msra.mxu1 %vm154_vm0, %v4976_v7 }
 0x55e   :  { %7284 = vmatprep.subr.msk.mxu1 %vm154_vm0, %v4991_v55 }
 0x561   :  { %7285 = vmatpush3.xpose.msk.msra.mxu1 %vm154_vm0, %v4975_v36 }
 0x562   :  { %7286 = vmatprep.subr.msk.mxu1 %vm154_vm0, %v4990_v45 }
 0x565   :  { %7287 = vmatpush3.xpose.msk.msra.mxu1 %vm154_vm0, %v4974_v24 }
 0x566   :  { %7288 = vmatprep.subr.msk.mxu1 %vm154_vm0, %v4989_v40 }
 0x569   :  { %7289 = vmatpush3.xpose.msk.msra.mxu1 %vm154_vm0, %v4973_v1 }
 0x56a   :  { %7290 = vmatprep.subr.msk.mxu1 %vm154_vm0, %v4988_v42 }
 0x56d   :  { %7291 = vmatpush3.xpose.msk.msra.mxu1 %vm154_vm0, %v4972_v5 }
 0x56e   :  { %7292 = vmatprep.subr.msk.mxu1 %vm154_vm0, %v4987_v47 }
 0x571   :  { %7293 = vmatpush3.xpose.msk.msra.mxu1 %vm154_vm0, %v4971_v29 }
 0x572   :  { %7294 = vmatprep.subr.msk.mxu1 %vm154_vm0, %v4986_v15 }
 0x575   :  { %7295 = vmatpush3.xpose.msk.msra.mxu1 %vm154_vm0, %v4970_v33 }
 0x576   :  { %v11592_v34 = vpop.permute.xlu0 %5360 }
 0x577   :  { %v11594_v10 = vpop.permute.xlu1 %5365 }
 0x578   :  { %7297 = vmatmul.mubr.msk.f32.vlgmr.msra.gmra.mxu1 %vm154_vm0, %v12240_v60  ;;  %v12264_v60 = vld [vmem:[#allocation7_spill] sm:$0xff] }
 0x579   :  { %7298 = vmatprep.mubr.msk.f32.mxu1 %vm154_vm0, %v11492_v16 }
 0x57b   :  { %v11619_v15 = vpop.permute.xlu1 %5482 }
 0x57c   :  { %7299 = vmatmul.mubr.msk.f32.gmra.mxu1 %vm154_vm0, %v11492_v16 }
 0x57d   :  { %5657 = vmatprep.mubr.f32.mxu1 %v12261_v39 }
 0x57f   :  { %v11621_v6 = vpop.permute.xlu1 %5477 }
 0x5f8   :  { %v5268_v22 = vpop.f32.mrf.mxu1 }
 0x5f9   :  { %v5269_v50 = vadd.f32 %v5268_v22, %v12262_v14 }
 0x5fa   :  { %v5270_v23 = vpop.f32.mrf.mxu1 }
 0x5fb   :  { %v5271_v54 = vadd.f32 %v5270_v23, %v12263_v4  ;;  %v11599_v46 = vadd.f32 %v11592_v34, %v5269_v50  ;;  %v11623_v50 = vpop.permute.xlu1 %5502 }
 0x5fc   :  { %v5274_v26 = vpop.f32.mrf.mxu1 }
 0x5fd   :  { %v5275_v61 = vadd.f32 %v5274_v26, %v12264_v60  ;;  %v11606_v63 = vadd.f32 %v11592_v34, %v5271_v54 }
 0x5fe   :  { %v5276_v8 = vpop.f32.mrf.mxu1 }
 0x5ff   :  { %v11602_v16 = vadd.f32 %v11594_v10, %v5275_v61  ;;  %v5277_v49 = vadd.f32 %v5276_v8, %v12265_v38 }
 0x601   :  { %v5376_v30 = vadd.f32 %v11602_v16, %v11599_v46  ;;  %v11611_v56 = vadd.f32 %v11594_v10, %v5277_v49 }
 0x603   :  { %v5377_v43 = vrot.slane %v5376_v30, 4  ;;  %v5383_v18 = vadd.f32 %v11611_v56, %v11606_v63 }
 0x605   :  { %v5378_v37 = vadd.f32 %v5377_v43, %v5376_v30  ;;  %v5384_v44 = vrot.slane %v5383_v18, 4  ;;  %v12266_v30 = vld [vmem:[#allocation9_spill] sm:$0xff] }
 0x607   :  { %v5379_v28 = vrot.slane %v5378_v37, 2  ;;  %v5385_v25 = vadd.f32 %v5384_v44, %v5383_v18  ;;  %v11632_v44 = vpop.permute.xlu1 %5497 }
 0x609   :  { %v5386_v7 = vrot.slane %v5385_v25, 2  ;;  %v5380_v31 = vadd.f32 %v5379_v28, %v5378_v37 }
 0x60b   :  { %v5387_v62 = vadd.f32 %v5386_v7, %v5385_v25  ;;  %v5381_v55 = vrot.slane %v5380_v31, 1  ;;  %v12267_v25 = vld [vmem:[#allocation10_spill] sm:$0xff] }
 0x60d   :  { %v5388_v52 = vrot.slane %v5387_v62, 1  ;;  %v5382_v11 = vadd.f32 %v5381_v55, %v5380_v31  ;;  %v12268_v31 = vld [vmem:[#allocation11_spill] sm:$0xff] }
 0x60f   :  { %v5389_v58 = vadd.f32 %v5388_v52, %v5387_v62  ;;  %v5405_v36 = vmul.f32 0.0625, %v5382_v11 }
 0x611   :  { %v5406_v57 = vmul.f32 0.0625, %v5389_v58  ;;  %v5409_v13 = vsub.f32 %v11599_v46, %v5405_v36  ;;  %v5413_v45 = vsub.f32 %v11602_v16, %v5405_v36  ;;  %v11641_v58 = vld [vmem:[%s12080_s18] sm:$0xff] }
 0x613   :  { %v5410_v19 = vsub.f32 %v11606_v63, %v5406_v57  ;;  %v5414_v12 = vsub.f32 %v11611_v56, %v5406_v57  ;;  %v5417_v51 = vmul.f32 %v5409_v13, %v5409_v13  ;;  %v5421_v24 = vmul.f32 %v5413_v45, %v5413_v45 }
 0x615   :  { %v5418_v2 = vmul.f32 %v5410_v19, %v5410_v19  ;;  %v5422_v53 = vmul.f32 %v5414_v12, %v5414_v12  ;;  %v5425_v40 = vadd.f32 %v5421_v24, %v5417_v51  ;;  %v11664_v24 = vld [vmem:[%s12080_s18 + $0x8] sm:$0xff] }
 0x617   :  { %v5432_v3 = vadd.f32 %v5422_v53, %v5418_v2  ;;  %v5426_v41 = vrot.slane %v5425_v40, 4 }
 0x619   :  { %v5433_v1 = vrot.slane %v5432_v3, 4  ;;  %v5427_v17 = vadd.f32 %v5426_v41, %v5425_v40 }
 0x61b   :  { %v5434_v0 = vadd.f32 %v5433_v1, %v5432_v3  ;;  %v5428_v42 = vrot.slane %v5427_v17, 2 }
 0x61d   :  { %v5435_v27 = vrot.slane %v5434_v0, 2  ;;  %v5429_v20 = vadd.f32 %v5428_v42, %v5427_v17 }
 0x61f   :  { %v5436_v5 = vadd.f32 %v5435_v27, %v5434_v0  ;;  %v5430_v48 = vrot.slane %v5429_v20, 1  ;;  %v11682_v0 = vld [vmem:[%s12080_s18 + $0x18] sm:$0xff] }
 0x621   :  { %v5437_v32 = vrot.slane %v5436_v5, 1  ;;  %v5431_v47 = vadd.f32 %v5430_v48, %v5429_v20  ;;  %v11690_v48 = vld [vmem:[%s12080_s18 + $0x20] sm:$0xff] }
 0x623   :  { %v5438_v35 = vadd.f32 %v5437_v32, %v5436_v5  ;;  %v5453_v21 = vmul.f32 0.0625, %v5431_v47 }
 0x625   :  { %v5454_v29 = vmul.f32 0.0625, %v5438_v35  ;;  %v5457_v59 = vadd.f32 1e-05, %v5453_v21 }
 0x627   :  { %v5458_v9 = vadd.f32 1e-05, %v5454_v29  ;;  %8354 = vrsqrt.f32 %v5457_v59  ;;  %v11700_v59 = vld [vmem:[%s12080_s18 + $0x28] sm:$0xff] }
 0x629   :  { %8356 = vrsqrt.f32 %v5458_v9 }
 0x634   :  { %v8355_v33 = vpop.eup %8354 }
 0x635   :  { %v5469_v22 = vmul.f32 %v8355_v33, %v5413_v45  ;;  %v5465_v14 = vmul.f32 %v8355_v33, %v5409_v13  ;;  %v12269_v13 = vld [vmem:[#allocation12_spill] sm:$0xff] }
 0x636   :  { %v8357_v23 = vpop.eup %8356 }
 0x637   :  { %v5470_v26 = vmul.f32 %v8357_v23, %v5414_v12  ;;  %v5466_v4 = vmul.f32 %v8357_v23, %v5410_v19  ;;  %v5489_v54 = vmul.f32 %v11619_v15, %v5469_v22  ;;  %v5485_v38 = vmul.f32 %v11621_v6, %v5465_v14 }
 0x638   :  { %v5345_v60 = vpop.f32.mrf.mxu1 }
 0x639   :  { %v5490_v61 = vmul.f32 %v11619_v15, %v5470_v26  ;;  %v5486_v8 = vmul.f32 %v11621_v6, %v5466_v4  ;;  %v5346_v43 = vadd.f32 %v5345_v60, %v12266_v30  ;;  %v5509_v37 = vadd.f32 %v11623_v50, %v5489_v54  ;;  %v5519_v54 = vld [vmem:[%s12080_s18 + $0x30] sm:$0xff] }
 0x63a   :  { %v5347_v49 = vpop.f32.mrf.mxu1  ;;  %v5505_v52 = vadd.f32 %v11632_v44, %v5485_v38 }
 0x63b   :  { %v5510_v18 = vadd.f32 %v11623_v50, %v5490_v61  ;;  %v5348_v7 = vadd.f32 %v5347_v49, %v12267_v25  ;;  %v5506_v55 = vadd.f32 %v11632_v44, %v5486_v8  ;;  %v11644_v36 = vadd.f32 %v11592_v34, %v5346_v43  ;;  %v5520_v49 = vld [vmem:[%s12080_s18 + $0x38] sm:$0xff] }
 0x63c   :  { %v5351_v28 = vpop.f32.mrf.mxu1 }
 0x63d   :  { %v5352_v62 = vadd.f32 %v5351_v28, %v12268_v31  ;;  %5621 = vmatprep.subr.mxu1 %v5510_v18  ;;  %v11651_v19 = vadd.f32 %v11592_v34, %v5348_v7 }
 0x63e   :  { %v5353_v11 = vpop.f32.mrf.mxu1  ;;  %5622 = vmatpush1.msra.mxu1 %v5509_v37 }
 0x63f   :  { %v11647_v57 = vadd.f32 %v11594_v10, %v5352_v62  ;;  %v5354_v45 = vadd.f32 %v5353_v11, %v12269_v13  ;;  %5623 = vmatprep.subr.mxu1 %v5506_v55 }
 0x640   :  { %5624 = vmatpush1.msra.mxu1 %v5505_v52 }
 0x641   :  { %v5390_v12 = vadd.f32 %v11647_v57, %v11644_v36  ;;  %v11656_v51 = vadd.f32 %v11594_v10, %v5354_v45  ;;  %6756 = vmatmul.mubr.msk.f32.vlgmr.msra.gmra.mxu1 %vm766_vm1, %v11641_v58  ;;  %v11674_v10 = vld [vmem:[%s12080_s18 + $0x10] sm:$0xff] }
 0x642   :  { %5663 = vmatprep.mubr.f32.mxu1 %v12261_v39 }
 0x643   :  { %v5391_v2 = vrot.slane %v5390_v12, 4  ;;  %v5397_v34 = vadd.f32 %v11656_v51, %v11651_v19 }
 0x645   :  { %v5392_v53 = vadd.f32 %v5391_v2, %v5390_v12  ;;  %v5398_v40 = vrot.slane %v5397_v34, 4  ;;  %6757 = vmatmul.mubr.msk.f32.gmra.mxu1 %vm766_vm1, %v11664_v24 }
 0x646   :  { %5669 = vmatprep.mubr.f32.mxu1 %v12261_v39 }
 0x647   :  { %v5393_v3 = vrot.slane %v5392_v53, 2  ;;  %v5399_v41 = vadd.f32 %v5398_v40, %v5397_v34 }
 0x649   :  { %v5394_v1 = vadd.f32 %v5393_v3, %v5392_v53  ;;  %v5400_v17 = vrot.slane %v5399_v41, 2  ;;  %6758 = vmatmul.mubr.msk.f32.gmra.mxu1 %vm766_vm1, %v11674_v10 }
 0x64a   :  { %5675 = vmatprep.mubr.f32.mxu1 %v12261_v39 }
 0x64b   :  { %v5395_v42 = vrot.slane %v5394_v1, 1  ;;  %v5401_v27 = vadd.f32 %v5400_v17, %v5399_v41 }
 0x64d   :  { %v5396_v20 = vadd.f32 %v5395_v42, %v5394_v1  ;;  %v5402_v5 = vrot.slane %v5401_v27, 1  ;;  %6759 = vmatmul.mubr.msk.f32.gmra.mxu1 %vm766_vm1, %v11682_v0 }
 0x64e   :  { %5681 = vmatprep.mubr.f32.mxu1 %v12261_v39 }
 0x64f   :  { %v5407_v32 = vmul.f32 0.0625, %v5396_v20  ;;  %v5403_v47 = vadd.f32 %v5402_v5, %v5401_v27 }
 0x651   :  { %v5411_v35 = vsub.f32 %v11644_v36, %v5407_v32  ;;  %v5415_v21 = vsub.f32 %v11647_v57, %v5407_v32  ;;  %v5408_v29 = vmul.f32 0.0625, %v5403_v47  ;;  %6760 = vmatmul.mubr.msk.f32.gmra.mxu1 %vm766_vm1, %v11690_v48 }
 0x652   :  { %5687 = vmatprep.mubr.f32.mxu1 %v12261_v39 }
 0x653   :  { %v5419_v9 = vmul.f32 %v5411_v35, %v5411_v35  ;;  %v5423_v33 = vmul.f32 %v5415_v21, %v5415_v21  ;;  %v5412_v22 = vsub.f32 %v11651_v19, %v5408_v29  ;;  %v5416_v23 = vsub.f32 %v11656_v51, %v5408_v29 }
 0x655   :  { %v5439_v14 = vadd.f32 %v5423_v33, %v5419_v9  ;;  %v5420_v26 = vmul.f32 %v5412_v22, %v5412_v22  ;;  %v5424_v4 = vmul.f32 %v5416_v23, %v5416_v23  ;;  %6761 = vmatmul.mubr.msk.f32.gmra.mxu1 %vm766_vm1, %v11700_v59 }
 0x656   :  { %5693 = vmatprep.mubr.f32.mxu1 %v12261_v39 }
 0x657   :  { %v5440_v60 = vrot.slane %v5439_v14, 4  ;;  %v5446_v61 = vadd.f32 %v5424_v4, %v5420_v26 }
 0x659   :  { %v5441_v8 = vadd.f32 %v5440_v60, %v5439_v14  ;;  %v5447_v38 = vrot.slane %v5446_v61, 4  ;;  %6762 = vmatmul.mubr.msk.f32.gmra.mxu1 %vm766_vm1, %v5519_v54 }
 0x65a   :  { %5699 = vmatprep.mubr.f32.mxu1 %v12261_v39 }
 0x65b   :  { %v5442_v30 = vrot.slane %v5441_v8, 2  ;;  %v5448_v43 = vadd.f32 %v5447_v38, %v5446_v61 }
 0x65d   :  { %v5443_v18 = vadd.f32 %v5442_v30, %v5441_v8  ;;  %v5449_v37 = vrot.slane %v5448_v43, 2  ;;  %6763 = vmatmul.mubr.msk.f32.gmra.mxu1 %vm766_vm1, %v5520_v49 }
 0x65e   :  { %6191 = vmatprep.mubr.f32.mxu1 %v12261_v39 }
 0x65f   :  { %v5444_v28 = vrot.slane %v5443_v18, 1  ;;  %v5450_v25 = vadd.f32 %v5449_v37, %v5448_v43 }
 0x661   :  { %v5445_v7 = vadd.f32 %v5444_v28, %v5443_v18  ;;  %v5451_v31 = vrot.slane %v5450_v25, 1 }
 0x663   :  { %v5455_v62 = vmul.f32 0.0625, %v5445_v7  ;;  %v5452_v55 = vadd.f32 %v5451_v31, %v5450_v25 }
 0x665   :  { %v5459_v52 = vadd.f32 1e-05, %v5455_v62  ;;  %v5456_v11 = vmul.f32 0.0625, %v5452_v55 }
 0x667   :  { %8358 = vrsqrt.f32 %v5459_v52  ;;  %v5460_v13 = vadd.f32 1e-05, %v5456_v11 }
 0x669   :  { %8360 = vrsqrt.f32 %v5460_v13 }
 0x674   :  { %v8359_v45 = vpop.eup %8358 }
 0x675   :  { %v5471_v12 = vmul.f32 %v8359_v45, %v5415_v21  ;;  %v5467_v34 = vmul.f32 %v8359_v45, %v5411_v35 }
 0x676   :  { %v8361_v2 = vpop.eup %8360 }
 0x677   :  { %v5472_v53 = vmul.f32 %v8361_v2, %v5416_v23  ;;  %v5468_v40 = vmul.f32 %v8361_v2, %v5412_v22  ;;  %v5491_v3 = vmul.f32 %v11619_v15, %v5471_v12  ;;  %v5487_v17 = vmul.f32 %v11621_v6, %v5467_v34 }
 0x679   :  { %v5492_v41 = vmul.f32 %v11619_v15, %v5472_v53  ;;  %v5488_v1 = vmul.f32 %v11621_v6, %v5468_v40  ;;  %v5511_v27 = vadd.f32 %v11623_v50, %v5491_v3  ;;  %v5507_v5 = vadd.f32 %v11632_v44, %v5487_v17  ;;  %v11747_v15 = vpop.permute.xlu1 %5566 }
 0x67b   :  { %v5512_v42 = vadd.f32 %v11623_v50, %v5492_v41  ;;  %v5508_v20 = vadd.f32 %v11632_v44, %v5488_v1 }
 0x67d   :  { %5734 = vmatprep.subr.mxu0 %v5512_v42  ;;  %v11749_v6 = vpop.permute.xlu1 %5561 }
 0x67e   :  { %5735 = vmatpush1.msra.mxu0 %v5511_v27 }
 0x67f   :  { %5736 = vmatprep.subr.mxu0 %v5508_v20 }
 0x680   :  { %5737 = vmatpush1.msra.mxu0 %v5507_v5 }
 0x681   :  { %6764 = vmatmul.mubr.msk.f32.vlgmr.msra.gmra.mxu0 %vm766_vm1, %v11641_v58  ;;  %v11751_v58 = vpop.permute.xlu0 %5551 }
 0x682   :  { %5776 = vmatprep.mubr.f32.mxu0 %v12261_v39 }
 0x685   :  { %6765 = vmatmul.mubr.msk.f32.gmra.mxu0 %vm766_vm1, %v11664_v24  ;;  %v11755_v32 = vpop.permute.xlu0 %5541 }
 0x686   :  { %5782 = vmatprep.mubr.f32.mxu0 %v12261_v39 }
 0x689   :  { %6766 = vmatmul.mubr.msk.f32.gmra.mxu0 %vm766_vm1, %v11674_v10  ;;  %v11753_v10 = vpop.permute.xlu1 %5556 }
 0x68a   :  { %5788 = vmatprep.mubr.f32.mxu0 %v12261_v39 }
 0x68d   :  { %6767 = vmatmul.mubr.msk.f32.gmra.mxu0 %vm766_vm1, %v11682_v0  ;;  %v11757_v35 = vpop.permute.xlu1 %5546 }
 0x68e   :  { %5794 = vmatprep.mubr.f32.mxu0 %v12261_v39 }
 0x691   :  { %6768 = vmatmul.mubr.msk.f32.gmra.mxu0 %vm766_vm1, %v11690_v48  ;;  %v11764_v22 = vpop.permute.xlu1 %5536 }
 0x692   :  { %5800 = vmatprep.mubr.f32.mxu0 %v12261_v39 }
 0x695   :  { %6769 = vmatmul.mubr.msk.f32.gmra.mxu0 %vm766_vm1, %v11700_v59  ;;  %v11759_v59 = vpop.permute.xlu0 %5531 }
 0x696   :  { %5806 = vmatprep.mubr.f32.mxu0 %v12261_v39 }
 0x699   :  { %6770 = vmatmul.mubr.msk.f32.gmra.mxu0 %vm766_vm1, %v5519_v54 }
 0x69a   :  { %5812 = vmatprep.mubr.f32.mxu0 %v12261_v39 }
 0x69d   :  { %6771 = vmatmul.mubr.msk.f32.gmra.mxu0 %vm766_vm1, %v5520_v49 }
 0x69e   :  { %6268 = vmatprep.mubr.f32.mxu0 %v12261_v39 }
 0x701   :  { %v5659_v50 = vpop.f32.mrf.mxu1 }
 0x702   :  { %v11767_v23 = vadd.f32 %v5659_v50, %v11759_v59 }
 0x703   :  { %v5661_v44 = vpop.f32.mrf.mxu1 }
 0x704   :  { %v11762_v9 = vadd.f32 %v5661_v44, %v11759_v59  ;;  %v5851_v60 = vmul.f32 0.044715, %v11767_v23 }
 0x705   :  { %v5665_v24 = vpop.f32.mrf.mxu1 }
 0x706   :  { %v11770_v14 = vadd.f32 %v5665_v24, %v11764_v22  ;;  %v5852_v4 = vmul.f32 0.044715, %v11762_v9  ;;  %v11802_v55 = vmul.f32 %v5851_v60, %v11767_v23 }
 0x707   :  { %v5667_v0 = vpop.f32.mrf.mxu1 }
 0x708   :  { %v5855_v38 = vmul.f32 0.044715, %v11770_v14  ;;  %v11788_v18 = vadd.f32 %v5667_v0, %v11764_v22  ;;  %v5884_v28 = vmul.f32 %v5852_v4, %v11762_v9 }
 0x709   :  { %v5671_v48 = vpop.f32.mrf.mxu1 }
 0x70a   :  { %v5887_v45 = vmul.f32 %v5855_v38, %v11770_v14  ;;  %v11811_v12 = vadd.f32 %v5671_v48, %v11755_v32  ;;  %v5856_v40 = vmul.f32 0.044715, %v11788_v18  ;;  %v11825_v5 = vmul.f32 %v5884_v28, %v11762_v9 }
 0x70b   :  { %v5673_v47 = vpop.f32.mrf.mxu1 }
 0x70c   :  { %v11795_v25 = vadd.f32 %v5673_v47, %v11755_v32  ;;  %v5859_v48 = vmul.f32 0.044715, %v11811_v12  ;;  %v5888_v38 = vmul.f32 %v5856_v40, %v11788_v18 }
 0x70d   :  { %v5677_v21 = vpop.f32.mrf.mxu1 }
 0x70e   :  { %v11798_v7 = vadd.f32 %v5677_v21, %v11757_v35  ;;  %v5860_v17 = vmul.f32 0.044715, %v11795_v25 }
 0x70f   :  { %v5679_v29 = vpop.f32.mrf.mxu1 }
 0x710   :  { %v11782_v49 = vadd.f32 %v5679_v29, %v11757_v35  ;;  %v5863_v42 = vmul.f32 0.044715, %v11798_v7 }
 0x711   :  { %v5683_v33 = vpop.f32.mrf.mxu1 }
 0x712   :  { %v11785_v30 = vadd.f32 %v5683_v33, %v11751_v58  ;;  %v5864_v2 = vmul.f32 0.044715, %v11782_v49 }
 0x713   :  { %v5685_v26 = vpop.f32.mrf.mxu1 }
 0x714   :  { %v11775_v61 = vadd.f32 %v5685_v26, %v11751_v58  ;;  %v5867_v34 = vmul.f32 0.044715, %v11785_v30  ;;  %v5896_v47 = vmul.f32 %v5864_v2, %v11782_v49 }
 0x715   :  { %v5689_v54 = vpop.f32.mrf.mxu1 }
 0x716   :  { %v11778_v8 = vadd.f32 %v5689_v54, %v11753_v10  ;;  %v5868_v52 = vmul.f32 0.044715, %v11775_v61  ;;  %v5899_v21 = vmul.f32 %v5867_v34, %v11785_v30  ;;  %v5891_v34 = vmul.f32 %v5859_v48, %v11811_v12 }
 0x717   :  { %v5691_v43 = vpop.f32.mrf.mxu1 }
 0x718   :  { %v11791_v37 = vadd.f32 %v5691_v43, %v11753_v10  ;;  %v5871_v31 = vmul.f32 0.044715, %v11778_v8  ;;  %v5900_v50 = vmul.f32 %v5868_v52, %v11775_v61  ;;  %v5895_v43 = vmul.f32 %v5863_v42, %v11798_v7 }
 0x719   :  { %v5695_v62 = vpop.f32.mrf.mxu1 }
 0x71a   :  { %v5872_v11 = vmul.f32 0.044715, %v11791_v37  ;;  %v11807_v13 = vadd.f32 %v5695_v62, %v11749_v6  ;;  %v5903_v27 = vmul.f32 %v5871_v31, %v11778_v8  ;;  %v5892_v62 = vmul.f32 %v5860_v17, %v11795_v25 }
 0x71b   :  { %v5697_v53 = vpop.f32.mrf.mxu1  ;;  %v5932_v2 = vmul.f32 %v5900_v50, %v11775_v61  ;;  %v5928_v17 = vmul.f32 %v5896_v47, %v11782_v49 }
 0x71c   :  { %v5904_v3 = vmul.f32 %v5872_v11, %v11791_v37  ;;  %v5875_v41 = vmul.f32 0.044715, %v11807_v13  ;;  %v11819_v1 = vadd.f32 %v5697_v53, %v11749_v6  ;;  %v5935_v28 = vmul.f32 %v5903_v27, %v11778_v8 }
 0x71d   :  { %v5701_v20 = vpop.f32.mrf.mxu1  ;;  %v5931_v53 = vmul.f32 %v5899_v21, %v11785_v30 }
 0x71e   :  { %v5907_v44 = vmul.f32 %v5875_v41, %v11807_v13  ;;  %v5876_v24 = vmul.f32 0.044715, %v11819_v1  ;;  %v11831_v0 = vadd.f32 %v5701_v20, %v11747_v15  ;;  %v5936_v33 = vmul.f32 %v5904_v3, %v11791_v37 }
 0x71f   :  { %v5703_v29 = vpop.f32.mrf.mxu1  ;;  %v5927_v20 = vmul.f32 %v5895_v43, %v11798_v7  ;;  %v5963_v47 = vadd.f32 %v5931_v53, %v11785_v30  ;;  %v5915_v53 = vmul.f32 %v11802_v55, %v11767_v23 }
 0x720   :  { %v5939_v26 = vmul.f32 %v5907_v44, %v11807_v13  ;;  %v5908_v4 = vmul.f32 %v5876_v24, %v11819_v1  ;;  %v5879_v54 = vmul.f32 0.044715, %v11831_v0  ;;  %v11841_v60 = vadd.f32 %v5703_v29, %v11747_v15 }
 0x721   :  { %v5968_v31 = vadd.f32 %v5936_v33, %v11791_v37  ;;  %v5967_v44 = vadd.f32 %v5935_v28, %v11778_v8  ;;  %v5920_v24 = vmul.f32 %v5888_v38, %v11788_v18  ;;  %v5964_v29 = vadd.f32 %v5932_v2, %v11775_v61 }
 0x722   :  { %v5911_v52 = vmul.f32 %v5879_v54, %v11831_v0  ;;  %v5880_v11 = vmul.f32 0.044715, %v11841_v60  ;;  %v5971_v40 = vadd.f32 %v5939_v26, %v11807_v13  ;;  %v5940_v3 = vmul.f32 %v5908_v4, %v11819_v1 }
 0x723   :  { %v6000_v27 = vmul.f32 0.7978846, %v5968_v31  ;;  %v5924_v33 = vmul.f32 %v5892_v62, %v11795_v25  ;;  %v5923_v26 = vmul.f32 %v5891_v34, %v11811_v12  ;;  %v5960_v38 = vadd.f32 %v5928_v17, %v11782_v49 }
 0x724   :  { %v5943_v41 = vmul.f32 %v5911_v52, %v11831_v0  ;;  %v5912_v42 = vmul.f32 %v5880_v11, %v11841_v60  ;;  %v5972_v50 = vadd.f32 %v5940_v3, %v11819_v1  ;;  %v6003_v54 = vmul.f32 0.7978846, %v5971_v40 }
 0x725   :  { %8362 = vtanh.f32 %v6000_v27  ;;  %v5919_v31 = vmul.f32 %v5887_v45, %v11770_v14  ;;  %v5959_v52 = vadd.f32 %v5927_v20, %v11798_v7  ;;  %v5999_v11 = vmul.f32 0.7978846, %v5967_v44 }
 0x726   :  { %v5975_v48 = vadd.f32 %v5943_v41, %v11831_v0  ;;  %v5944_v21 = vmul.f32 %v5912_v42, %v11841_v60  ;;  %v6004_v4 = vmul.f32 0.7978846, %v5972_v50  ;;  %v5996_v62 = vmul.f32 0.7978846, %v5964_v29 }
 0x727   :  { %v5956_v34 = vadd.f32 %v5924_v33, %v11795_v25  ;;  %v5955_v40 = vadd.f32 %v5923_v26, %v11811_v12  ;;  %v5995_v3 = vmul.f32 0.7978846, %v5963_v47  ;;  %v5992_v41 = vmul.f32 0.7978846, %v5960_v38 }
 0x728   :  { %v5976_v43 = vadd.f32 %v5944_v21, %v11841_v60  ;;  %v6007_v28 = vmul.f32 0.7978846, %v5975_v48  ;;  %8364 = vtanh.f32 %v6004_v4  ;;  %v5952_v45 = vadd.f32 %v5920_v24, %v11788_v18 }
 0x729   :  { %v5951_v42 = vadd.f32 %v5919_v31, %v11770_v14  ;;  %v5991_v27 = vmul.f32 0.7978846, %v5959_v52  ;;  %v5988_v17 = vmul.f32 0.7978846, %v5956_v34  ;;  %v5948_v20 = vadd.f32 %v11825_v5, %v11762_v9 }
 0x72a   :  { %v6008_v2 = vmul.f32 0.7978846, %v5976_v43  ;;  %8366 = vtanh.f32 %v6007_v28  ;;  %v5947_v44 = vadd.f32 %v5915_v53, %v11767_v23  ;;  %v5987_v55 = vmul.f32 0.7978846, %v5955_v40 }
 0x72b   :  { %8368 = vtanh.f32 %v6003_v54  ;;  %v5984_v50 = vmul.f32 0.7978846, %v5952_v45  ;;  %v5983_v48 = vmul.f32 0.7978846, %v5951_v42  ;;  %v5980_v21 = vmul.f32 0.7978846, %v5948_v20 }
 0x72c   :  { %8370 = vtanh.f32 %v6008_v2  ;;  %v5979_v24 = vmul.f32 0.7978846, %v5947_v44  ;;  %v5848_v43 = vmul.f32 0.5, %v11841_v60  ;;  %v5847_v52 = vmul.f32 0.5, %v11831_v0 }
 0x72d   :  { %8372 = vtanh.f32 %v5999_v11  ;;  %v5844_v34 = vmul.f32 0.5, %v11819_v1  ;;  %v5840_v60 = vmul.f32 0.5, %v11791_v37  ;;  %v5839_v44 = vmul.f32 0.5, %v11778_v8 }
 0x72e   :  { %8374 = vtanh.f32 %v5996_v62 }
 0x72f   :  { %8376 = vtanh.f32 %v5995_v3 }
 0x730   :  { %8378 = vtanh.f32 %v5992_v41  ;;  %v5843_v41 = vmul.f32 0.5, %v11807_v13 }
 0x731   :  { %8380 = vtanh.f32 %v5991_v27 }
 0x732   :  { %8382 = vtanh.f32 %v5988_v17  ;;  %v8363_v29 = vpop.eup %8362 }
 0x733   :  { %8384 = vtanh.f32 %v5987_v55  ;;  %v6064_v53 = vadd.f32 1.0, %v8363_v29 }
 0x734   :  { %8386 = vtanh.f32 %v5984_v50 }
 0x735   :  { %8388 = vtanh.f32 %v5983_v48  ;;  %v8365_v33 = vpop.eup %8364  ;;  %v6096_v1 = vmul.f32 %v6064_v53, %v5840_v60  ;;  %v5836_v48 = vmul.f32 0.5, %v11775_v61  ;;  %v5831_v61 = vmul.f32 0.5, %v11798_v7 }
 0x736   :  { %8390 = vtanh.f32 %v5980_v21  ;;  %v6068_v38 = vadd.f32 1.0, %v8365_v33  ;;  %v5835_v33 = vmul.f32 0.5, %v11785_v30  ;;  %v5824_v53 = vmul.f32 0.5, %v11788_v18 }
 0x737   :  { %v8367_v26 = vpop.eup %8366  ;;  %8392 = vtanh.f32 %v5979_v24 }
 0x738   :  { %v8369_v5 = vpop.eup %8368  ;;  %v6071_v4 = vadd.f32 1.0, %v8367_v26  ;;  %v6100_v27 = vmul.f32 %v6068_v38, %v5844_v34 }
 0x739   :  { %v8371_v47 = vpop.eup %8370  ;;  %v6067_v11 = vadd.f32 1.0, %v8369_v5 }
 0x73a   :  { %v8373_v54 = vpop.eup %8372  ;;  %v6072_v28 = vadd.f32 1.0, %v8371_v47  ;;  %v6103_v3 = vmul.f32 %v6071_v4, %v5847_v52  ;;  %v5832_v47 = vmul.f32 0.5, %v11782_v49  ;;  %v5828_v52 = vmul.f32 0.5, %v11795_v25 }
 0x73b   :  { %v8375_v31 = vpop.eup %8374  ;;  %v6063_v45 = vadd.f32 1.0, %v8373_v54  ;;  %v6099_v0 = vmul.f32 %v6067_v11, %v5843_v41  ;;  %v5823_v41 = vmul.f32 0.5, %v11770_v14 }
 0x73c   :  { %v8377_v2 = vpop.eup %8376  ;;  %v6104_v62 = vmul.f32 %v6072_v28, %v5848_v43  ;;  %v6060_v17 = vadd.f32 1.0, %v8375_v31 }
 0x73d   :  { %v8379_v40 = vpop.eup %8378  ;;  %v6059_v55 = vadd.f32 1.0, %v8377_v2  ;;  %v6095_v29 = vmul.f32 %v6063_v45, %v5839_v44 }
 0x73e   :  { %v8381_v42 = vpop.eup %8380  ;;  %6143 = vmatprep.subr.mxu1 %v6104_v62  ;;  %v6056_v21 = vadd.f32 1.0, %v8379_v40  ;;  %v6092_v5 = vmul.f32 %v6060_v17, %v5836_v48  ;;  %v5827_v62 = vmul.f32 0.5, %v11811_v12  ;;  %v5819_v12 = vmul.f32 0.5, %v11767_v23  ;;  %v11908_v23 = vld [vmem:[%s12082_s20 + $0x8] sm:$0xff] }
 0x73f   :  { %v8383_v20 = vpop.eup %8382  ;;  %6144 = vmatpush1.msra.mxu1 %v6103_v3  ;;  %v6055_v37 = vadd.f32 1.0, %v8381_v42  ;;  %v6091_v43 = vmul.f32 %v6059_v55, %v5835_v33  ;;  %v5820_v42 = vmul.f32 0.5, %v11762_v9 }
 0x740   :  { %v8385_v50 = vpop.eup %8384  ;;  %6145 = vmatprep.subr.mxu1 %v6100_v27  ;;  %v6052_v8 = vadd.f32 1.0, %v8383_v20  ;;  %v6088_v31 = vmul.f32 %v6056_v21, %v5832_v47 }
 0x741   :  { %v8387_v13 = vpop.eup %8386  ;;  %v5772_v24 = vpop.f32.mrf.mxu0  ;;  %6146 = vmatpush1.msra.mxu1 %v6099_v0  ;;  %v6051_v28 = vadd.f32 1.0, %v8385_v50  ;;  %v6087_v2 = vmul.f32 %v6055_v37, %v5831_v61  ;;  %v11900_v0 = vld [vmem:[%s12082_s20] sm:$0xff]  ;;  %s8461_s20 = smov [#allocation2]  }
 0x742   :  { %v8389_v26 = vpop.eup %8388  ;;  %6147 = vmatprep.subr.mxu1 %v6096_v1  ;;  %v6048_v30 = vadd.f32 1.0, %v8387_v13  ;;  %v6084_v34 = vmul.f32 %v6052_v8, %v5828_v52  ;;  %v11914_v50 = vadd.f32 %v5772_v24, %v11759_v59  ;;  %s6302_s25 = sshll.u32 %s8461_s20, 4  ;;  %s6303_s25 = int_to_ptr.vmem [resolvable:$true] %s6302_s25 }
 0x743   :  { %v8391_v4 = vpop.eup %8390  ;;  %v5774_v54 = vpop.f32.mrf.mxu0  ;;  %6148 = vmatpush1.msra.mxu1 %v6095_v29  ;;  %v6047_v49 = vadd.f32 1.0, %v8389_v26  ;;  %v6083_v7 = vmul.f32 %v6051_v28, %v5827_v62  ;;  %s8437_s1 = scalar_lea.vmem %s6303_s25, 1024  ;;  %p8442_p1 = scmp.lt.s32.totalorder %s6303_s25, %s6303_s25 }
 0x744   :  { %v8393_v38 = vpop.eup %8392  ;;  %6149 = vmatprep.subr.mxu1 %v6092_v5  ;;  %v6044_v40 = vadd.f32 1.0, %v8391_v4  ;;  %v6080_v25 = vmul.f32 %v6048_v30, %v5824_v53  ;;  %v11911_v44 = vadd.f32 %v5774_v54, %v11759_v59  ;;  %v5853_v29 = vmul.f32 0.044715, %v11914_v50  ;;  %p8438_p0 = scmp.ne.s32.totalorder %s6303_s25, %s8437_s1  ;;  %p8443_p2 = scmp.lt.s32.totalorder %s8437_s1, %s8437_s1 }
 0x745   :  { %v5778_v11 = vpop.f32.mrf.mxu0  ;;  %6150 = vmatpush1.msra.mxu1 %v6091_v43  ;;  %v6043_v45 = vadd.f32 1.0, %v8393_v38  ;;  %v6079_v60 = vmul.f32 %v6047_v49, %v5823_v41 }
 0x746   :  { %6151 = vmatprep.subr.mxu1 %v6088_v31  ;;  %v6076_v17 = vmul.f32 %v6044_v40, %v5820_v42  ;;  %v11919_v1 = vadd.f32 %v5778_v11, %v11764_v22  ;;  %v5854_v21 = vmul.f32 0.044715, %v11911_v44  ;;  %p8444_p3 = por %p8443_p2, %p8442_p1 }
 0x747   :  { %v5780_v3 = vpop.f32.mrf.mxu0  ;;  %6152 = vmatpush1.msra.mxu1 %v6087_v2  ;;  %v6075_v18 = vmul.f32 %v6043_v45, %v5819_v12 }
 0x748   :  { %6153 = vmatprep.subr.mxu1 %v6084_v34  ;;  %v5857_v59 = vmul.f32 0.044715, %v11919_v1  ;;  %v11937_v47 = vadd.f32 %v5780_v3, %v11764_v22  ;;  %v5886_v4 = vmul.f32 %v5854_v21, %v11911_v44  ;;  %p8445_p4 = pnand %p8444_p3, %p8438_p0 }
 0x749   :  { %v5784_v27 = vpop.f32.mrf.mxu0  ;;  %6154 = vmatpush1.msra.mxu1 %v6083_v7 }
 0x74a   :  { %6155 = vmatprep.subr.mxu1 %v6080_v25  ;;  %v5889_v31 = vmul.f32 %v5857_v59, %v11919_v1  ;;  %v11960_v52 = vadd.f32 %v5784_v27, %v11755_v32  ;;  %v5858_v2 = vmul.f32 0.044715, %v11937_v47  ;;  %v11974_v7 = vmul.f32 %v5886_v4, %v11911_v44 }
 0x74b   :  { %v5786_v20 = vpop.f32.mrf.mxu0  ;;  %6156 = vmatpush1.msra.mxu1 %v6079_v60 }
 0x74c   :  { %6157 = vmatprep.subr.mxu1 %v6076_v17  ;;  %v11944_v54 = vadd.f32 %v5786_v20, %v11755_v32 }
 0x74d   :  { %v5790_v14 = vpop.f32.mrf.mxu0  ;;  %6158 = vmatpush1.msra.mxu1 %v6075_v18 }
 0x74e   :  { %6772 = vmatmul.mubr.msk.f32.vlgmr.msra.gmra.mxu1 %vm3072_vm2, %v11900_v0  ;;  %v11947_v43 = vadd.f32 %v5790_v14, %v11757_v35  ;;  %v5862_v53 = vmul.f32 0.044715, %v11944_v54 }
 0x74f   :  { %v5792_v9 = vpop.f32.mrf.mxu0  ;;  %6197 = vmatprep.mubr.f32.mxu1 %v12261_v39 }
 0x750   :  { %v11931_v24 = vadd.f32 %v5792_v9, %v11757_v35  ;;  %v5865_v40 = vmul.f32 0.044715, %v11947_v43 }
 0x751   :  { %v5796_v55 = vpop.f32.mrf.mxu0 }
 0x752   :  { %6773 = vmatmul.mubr.msk.f32.gmra.mxu1 %vm3072_vm2, %v11908_v23  ;;  %v11934_v26 = vadd.f32 %v5796_v55, %v11751_v58  ;;  %v5866_v35 = vmul.f32 0.044715, %v11931_v24  ;;  %v5890_v55 = vmul.f32 %v5858_v2, %v11937_v47 }
 0x753   :  { %v5798_v48 = vpop.f32.mrf.mxu0 }
 0x754   :  { %v11924_v33 = vadd.f32 %v5798_v48, %v11751_v58  ;;  %v11951_v58 = vmul.f32 %v5853_v29, %v11914_v50  ;;  %v5869_v30 = vmul.f32 0.044715, %v11934_v26  ;;  %v5898_v27 = vmul.f32 %v5866_v35, %v11931_v24 }
 0x755   :  { %v5802_v13 = vpop.f32.mrf.mxu0  ;;  %v5897_v48 = vmul.f32 %v5865_v40, %v11947_v43  ;;  %v5894_v29 = vmul.f32 %v5862_v53, %v11944_v54  ;;  %v5922_v53 = vmul.f32 %v5890_v55, %v11937_v47 }
 0x756   :  { %v11927_v37 = vadd.f32 %v5802_v13, %v11753_v10  ;;  %v5870_v22 = vmul.f32 0.044715, %v11924_v33  ;;  %v5901_v60 = vmul.f32 %v5869_v30, %v11934_v26 }
 0x757   :  { %v5804_v5 = vpop.f32.mrf.mxu0  ;;  %v5929_v2 = vmul.f32 %v5897_v48, %v11947_v43 }
 0x758   :  { %v11940_v8 = vadd.f32 %v5804_v5, %v11753_v10  ;;  %v5873_v61 = vmul.f32 0.044715, %v11927_v37  ;;  %v5902_v41 = vmul.f32 %v5870_v22, %v11924_v33 }
 0x759   :  { %v5808_v28 = vpop.f32.mrf.mxu0 }
 0x75a   :  { %v5874_v38 = vmul.f32 0.044715, %v11940_v8  ;;  %v11956_v10 = vadd.f32 %v5808_v28, %v11749_v6  ;;  %v5905_v32 = vmul.f32 %v5873_v61, %v11927_v37  ;;  %v5934_v4 = vmul.f32 %v5902_v41, %v11924_v33 }
 0x75b   :  { %v5810_v11 = vpop.f32.mrf.mxu0  ;;  %v5926_v41 = vmul.f32 %v5894_v29, %v11944_v54 }
 0x75c   :  { %v5906_v62 = vmul.f32 %v5874_v38, %v11940_v8  ;;  %v5877_v49 = vmul.f32 0.044715, %v11956_v10  ;;  %v11968_v34 = vadd.f32 %v5810_v11, %v11749_v6  ;;  %v5861_v6 = vmul.f32 0.044715, %v11960_v52 }
 0x75d   :  { %v5814_v3 = vpop.f32.mrf.mxu0  ;;  %v5937_v21 = vmul.f32 %v5905_v32, %v11927_v37  ;;  %v5930_v11 = vmul.f32 %v5898_v27, %v11931_v24 }
 0x75e   :  { %v5909_v45 = vmul.f32 %v5877_v49, %v11956_v10  ;;  %v5878_v25 = vmul.f32 0.044715, %v11968_v34  ;;  %v11980_v42 = vadd.f32 %v5814_v3, %v11747_v15  ;;  %v5938_v17 = vmul.f32 %v5906_v62, %v11940_v8 }
 0x75f   :  { %v5816_v12 = vpop.f32.mrf.mxu0  ;;  %v5893_v61 = vmul.f32 %v5861_v6, %v11960_v52  ;;  %v5969_v62 = vadd.f32 %v5937_v21, %v11927_v37  ;;  %v5966_v3 = vadd.f32 %v5934_v4, %v11924_v33  ;;  %v5958_v21 = vadd.f32 %v5926_v41, %v11944_v54 }
 0x760   :  { %v5941_v20 = vmul.f32 %v5909_v45, %v11956_v10  ;;  %v5910_v18 = vmul.f32 %v5878_v25, %v11968_v34  ;;  %v5881_v14 = vmul.f32 0.044715, %v11980_v42  ;;  %v11990_v9 = vadd.f32 %v5816_v12, %v11747_v15 }
 0x761   :  { %v5970_v13 = vadd.f32 %v5938_v17, %v11940_v8  ;;  %v5933_v15 = vmul.f32 %v5901_v60, %v11934_v26  ;;  %v5925_v45 = vmul.f32 %v5893_v61, %v11960_v52  ;;  %v5962_v17 = vadd.f32 %v5930_v11, %v11931_v24 }
 0x762   :  { %v5913_v59 = vmul.f32 %v5881_v14, %v11980_v42  ;;  %v5882_v5 = vmul.f32 0.044715, %v11990_v9  ;;  %v5973_v28 = vadd.f32 %v5941_v20, %v11956_v10  ;;  %v5942_v22 = vmul.f32 %v5910_v18, %v11968_v34 }
 0x763   :  { %v6002_v30 = vmul.f32 0.7978846, %v5970_v13  ;;  %v5965_v25 = vadd.f32 %v5933_v15, %v11934_v26  ;;  %v5921_v20 = vmul.f32 %v5889_v31, %v11919_v1  ;;  %v5961_v18 = vadd.f32 %v5929_v2, %v11947_v43 }
 0x764   :  { %v5945_v38 = vmul.f32 %v5913_v59, %v11980_v42  ;;  %v5914_v35 = vmul.f32 %v5882_v5, %v11990_v9  ;;  %v5974_v49 = vadd.f32 %v5942_v22, %v11968_v34  ;;  %v6005_v27 = vmul.f32 0.7978846, %v5973_v28 }
 0x765   :  { %8394 = vtanh.f32 %v6002_v30  ;;  %v6001_v14 = vmul.f32 0.7978846, %v5969_v62  ;;  %v5998_v48 = vmul.f32 0.7978846, %v5966_v3  ;;  %v5917_v13 = vmul.f32 %v11951_v58, %v11914_v50 }
 0x766   :  { %v5977_v40 = vadd.f32 %v5945_v38, %v11980_v42  ;;  %v5946_v32 = vmul.f32 %v5914_v35, %v11990_v9  ;;  %v6006_v6 = vmul.f32 0.7978846, %v5974_v49  ;;  %v5957_v29 = vadd.f32 %v5925_v45, %v11960_v52 }
 0x767   :  { %v5997_v59 = vmul.f32 0.7978846, %v5965_v25  ;;  %v5994_v5 = vmul.f32 0.7978846, %v5962_v17  ;;  %v5954_v31 = vadd.f32 %v5922_v53, %v11937_v47  ;;  %v5953_v4 = vadd.f32 %v5921_v20, %v11919_v1 }
 0x768   :  { %v5978_v60 = vadd.f32 %v5946_v32, %v11990_v9  ;;  %v6009_v12 = vmul.f32 0.7978846, %v5977_v40  ;;  %8396 = vtanh.f32 %v6006_v6  ;;  %v5993_v61 = vmul.f32 0.7978846, %v5961_v18 }
 0x769   :  { %v5990_v15 = vmul.f32 0.7978846, %v5958_v21  ;;  %v5950_v28 = vadd.f32 %v11974_v7, %v11911_v44  ;;  %v5949_v22 = vadd.f32 %v5917_v13, %v11914_v50  ;;  %v5989_v58 = vmul.f32 0.7978846, %v5957_v29 }
 0x76a   :  { %v6010_v55 = vmul.f32 0.7978846, %v5978_v60  ;;  %8398 = vtanh.f32 %v6009_v12  ;;  %v5986_v38 = vmul.f32 0.7978846, %v5954_v31  ;;  %v5985_v35 = vmul.f32 0.7978846, %v5953_v4 }
 0x76b   :  { %8400 = vtanh.f32 %v6005_v27  ;;  %v5982_v30 = vmul.f32 0.7978846, %v5950_v28  ;;  %v5981_v11 = vmul.f32 0.7978846, %v5949_v22  ;;  %v5850_v3 = vmul.f32 0.5, %v11990_v9 }
 0x76c   :  { %8402 = vtanh.f32 %v6010_v55  ;;  %v5849_v6 = vmul.f32 0.5, %v11980_v42  ;;  %v5846_v17 = vmul.f32 0.5, %v11968_v34  ;;  %v5845_v55 = vmul.f32 0.5, %v11956_v10 }
 0x76d   :  { %8404 = vtanh.f32 %v6001_v14  ;;  %v5842_v9 = vmul.f32 0.5, %v11940_v8  ;;  %v5837_v22 = vmul.f32 0.5, %v11934_v26 }
 0x76e   :  { %8406 = vtanh.f32 %v5998_v48 }
 0x76f   :  { %8408 = vtanh.f32 %v5997_v59 }
 0x770   :  { %8410 = vtanh.f32 %v5994_v5  ;;  %v5841_v5 = vmul.f32 0.5, %v11927_v37 }
 0x771   :  { %8412 = vtanh.f32 %v5993_v61  ;;  %v5838_v61 = vmul.f32 0.5, %v11924_v33 }
 0x772   :  { %8414 = vtanh.f32 %v5990_v15  ;;  %v8395_v2 = vpop.eup %8394 }
 0x773   :  { %8416 = vtanh.f32 %v5989_v58  ;;  %v6066_v20 = vadd.f32 1.0, %v8395_v2  ;;  %v5833_v2 = vmul.f32 0.5, %v11947_v43  ;;  %v5825_v43 = vmul.f32 0.5, %v11919_v1  ;;  %v6114_v1 = vpop.permute.xlu1 %6113 }
 0x774   :  { %8418 = vtanh.f32 %v5986_v38 }
 0x775   :  { %8420 = vtanh.f32 %v5985_v35  ;;  %v8397_v62 = vpop.eup %8396  ;;  %v6098_v34 = vmul.f32 %v6066_v20, %v5842_v9  ;;  %v5834_v35 = vmul.f32 0.5, %v11931_v24 }
 0x776   :  { %8422 = vtanh.f32 %v5982_v30  ;;  %v6070_v45 = vadd.f32 1.0, %v8397_v62 }
 0x777   :  { %v8399_v49 = vpop.eup %8398  ;;  %8424 = vtanh.f32 %v5981_v11 }
 0x778   :  { %v8401_v7 = vpop.eup %8400  ;;  %v6073_v40 = vadd.f32 1.0, %v8399_v49  ;;  %v6102_v13 = vmul.f32 %v6070_v45, %v5846_v17 }
 0x779   :  { %v8403_v53 = vpop.eup %8402  ;;  %v6069_v27 = vadd.f32 1.0, %v8401_v7  ;;  %v5830_v7 = vmul.f32 0.5, %v11944_v54  ;;  %v5822_v54 = vmul.f32 0.5, %v11911_v44 }
 0x77a   :  { %v8405_v32 = vpop.eup %8404  ;;  %v6074_v41 = vadd.f32 1.0, %v8403_v53  ;;  %v6105_v14 = vmul.f32 %v6073_v40, %v5849_v6  ;;  %v5829_v40 = vmul.f32 0.5, %v11960_v52 }
 0x77b   :  { %v8407_v25 = vpop.eup %8406  ;;  %v6065_v48 = vadd.f32 1.0, %v8405_v32  ;;  %v6101_v42 = vmul.f32 %v6069_v27, %v5845_v55 }
 0x77c   :  { %v8409_v60 = vpop.eup %8408  ;;  %v6106_v12 = vmul.f32 %v6074_v41, %v5850_v3  ;;  %v6062_v29 = vadd.f32 1.0, %v8407_v25  ;;  %v5826_v3 = vmul.f32 0.5, %v11937_v47 }
 0x77d   :  { %v8411_v18 = vpop.eup %8410  ;;  %v6061_v31 = vadd.f32 1.0, %v8409_v60  ;;  %v6097_v28 = vmul.f32 %v6065_v48, %v5841_v5  ;;  %v5821_v60 = vmul.f32 0.5, %v11914_v50 }
 0x77e   :  { %v8413_v21 = vpop.eup %8412  ;;  %6220 = vmatprep.subr.mxu0 %v6106_v12  ;;  %v6058_v15 = vadd.f32 1.0, %v8411_v18  ;;  %v6094_v38 = vmul.f32 %v6062_v29, %v5838_v61  ;;  %v6119_v18 = vpop.permute.xlu0 %6118 }
 0x77f   :  { %v8415_v59 = vpop.eup %8414  ;;  %6221 = vmatpush1.msra.mxu0 %v6105_v14  ;;  %v6057_v58 = vadd.f32 1.0, %v8413_v21  ;;  %v6093_v11 = vmul.f32 %v6061_v31, %v5837_v22 }
 0x780   :  { %v8417_v4 = vpop.eup %8416  ;;  %6222 = vmatprep.subr.mxu0 %v6102_v13  ;;  %v6054_v30 = vadd.f32 1.0, %v8415_v59  ;;  %v6090_v49 = vmul.f32 %v6058_v15, %v5834_v35 }
 0x781   :  { %v8419_v10 = vpop.eup %8418  ;;  %6223 = vmatpush1.msra.mxu0 %v6101_v42  ;;  %v6053_v62 = vadd.f32 1.0, %v8417_v4  ;;  %v6089_v26 = vmul.f32 %v6057_v58, %v5833_v2 }
 0x782   :  { %v8421_v8 = vpop.eup %8420  ;;  %6224 = vmatprep.subr.mxu0 %v6098_v34  ;;  %v6050_v53 = vadd.f32 1.0, %v8419_v10  ;;  %v6086_v24 = vmul.f32 %v6054_v30, %v5830_v7 }
 0x783   :  { %v8423_v37 = vpop.eup %8422  ;;  %6225 = vmatpush1.msra.mxu0 %v6097_v28  ;;  %v6049_v32 = vadd.f32 1.0, %v8421_v8  ;;  %v6085_v45 = vmul.f32 %v6053_v62, %v5829_v40 }
 0x784   :  { %v8425_v33 = vpop.eup %8424  ;;  %6226 = vmatprep.subr.mxu0 %v6094_v38  ;;  %v6046_v41 = vadd.f32 1.0, %v8423_v37  ;;  %v6082_v6 = vmul.f32 %v6050_v53, %v5826_v3 }
 0x785   :  { %6227 = vmatpush1.msra.mxu0 %v6093_v11  ;;  %v6045_v25 = vadd.f32 1.0, %v8425_v33  ;;  %v6081_v27 = vmul.f32 %v6049_v32, %v5825_v43 }
 0x786   :  { %6228 = vmatprep.subr.mxu0 %v6090_v49  ;;  %v6078_v52 = vmul.f32 %v6046_v41, %v5822_v54 }
 0x787   :  { %6229 = vmatpush1.msra.mxu0 %v6089_v26  ;;  %v6077_v12 = vmul.f32 %v6045_v25, %v5821_v60 }
 0x788   :  { %6230 = vmatprep.subr.mxu0 %v6086_v24 }
 0x789   :  { %6231 = vmatpush1.msra.mxu0 %v6085_v45 }
 0x78a   :  { %6232 = vmatprep.subr.mxu0 %v6082_v6 }
 0x78b   :  { %6233 = vmatpush1.msra.mxu0 %v6081_v27 }
 0x78c   :  { %6234 = vmatprep.subr.mxu0 %v6078_v52 }
 0x78d   :  { %6235 = vmatpush1.msra.mxu0 %v6077_v12 }
 0x78e   :  { %6774 = vmatmul.mubr.msk.f32.vlgmr.msra.gmra.mxu0 %vm3072_vm2, %v11900_v0 }
 0x78f   :  { %6274 = vmatprep.mubr.f32.mxu0 %v12261_v39 }
 0x792   :  { %6775 = vmatmul.mubr.msk.f32.gmra.mxu0 %vm3072_vm2, %v11908_v23 }
 0x80e   :  { %v6193_v44 = vpop.f32.mrf.mxu1 }
 0x80f   :  { %v6194_v47 = vadd.f32 %v6193_v44, %v6114_v1 }
 0x810   :  { %v6195_v17 = vpop.f32.mrf.mxu1 }
 0x811   :  { %v6281_v50 = vadd.f32 %v6194_v47, %v11599_v46  ;;  %v6196_v20 = vadd.f32 %v6195_v17, %v6114_v1 }
 0x812   :  { %v6199_v14 = vpop.f32.mrf.mxu1 }
 0x813   :  { %6289 = vst [vmem:[#allocation2] sm:$0xff] %v6281_v50  ;;  %v6282_v55 = vadd.f32 %v6196_v20, %v11606_v63  ;;  %v6200_v48 = vadd.f32 %v6199_v14, %v6119_v18 }
 0x814   :  { %v6201_v21 = vpop.f32.mrf.mxu1 }
 0x815   :  { %6290 = vst [vmem:[#allocation2 + $0x8] sm:$0xff] %v6282_v55  ;;  %v6285_v39 = vadd.f32 %v6200_v48, %v11602_v16  ;;  %v6202_v0 = vadd.f32 %v6201_v21, %v6119_v18 }
 0x817   :  { %6293 = vst [vmem:[#allocation2 + $0x20] sm:$0xff] %v6285_v39  ;;  %v6286_v23 = vadd.f32 %v6202_v0, %v11611_v56 }
 0x819   :  { %6294 = vst [vmem:[#allocation2 + $0x28] sm:$0xff] %v6286_v23 }
 0x84e   :  { %v6270_v13 = vpop.f32.mrf.mxu0 }
 0x84f   :  { %v6271_v9 = vadd.f32 %v6270_v13, %v6114_v1 }
 0x850   :  { %v6272_v29 = vpop.f32.mrf.mxu0 }
 0x851   :  { %v6283_v46 = vadd.f32 %v6271_v9, %v11644_v36  ;;  %v6273_v59 = vadd.f32 %v6272_v29, %v6114_v1 }
 0x852   :  { %v6276_v42 = vpop.f32.mrf.mxu0 }
 0x853   :  { %6291 = vst [vmem:[#allocation2 + $0x10] sm:$0xff] %v6283_v46  ;;  %v6284_v63 = vadd.f32 %v6273_v59, %v11651_v19  ;;  %v6277_v5 = vadd.f32 %v6276_v42, %v6119_v18 }
 0x854   :  { %v6278_v31 = vpop.f32.mrf.mxu0 }
 0x855   :  { %6292 = vst [vmem:[#allocation2 + $0x18] sm:$0xff] %v6284_v63  ;;  %v6287_v16 = vadd.f32 %v6277_v5, %v11647_v57  ;;  %v6279_v4 = vadd.f32 %v6278_v31, %v6119_v18 }
 0x857   :  { %6295 = vst [vmem:[#allocation2 + $0x30] sm:$0xff] %v6287_v16  ;;  %v6288_v56 = vadd.f32 %v6279_v4, %v11656_v51 }
 0x859   :  { %6296 = vst [vmem:[#allocation2 + $0x38] sm:$0xff] %v6288_v56 }
 0x85a   :  { %8448 = shalt.err (!%p8445_p4)
}
 0x85b   :  { %s8462_s24 = smov 512   ;;  %s8463_s6 = smov 32  }
 0x85c   :  { %6308 = dma.vmem_to_hbm [thread:$0]  %s6303_s25, 1024, %s12084_s22, [#allocation3], %s8462_s24, %s8462_s24, %s8463_s6  }
 0x85d   :  { %8457 = dma.done.wait [#allocation3], 1024  }
 0x85e   :  { %8458 = vsyncadd [#allocation3], 4294966272 }
 0x85f   :  { %6312 = vsyncpa [#allocation3], 1 }

</bundles_post_ra>
